<compile_context>
chip_gen: v6e
topology: v6e:2x2x1
jax: 0.10.0
libtpu: 0.0.40
codegen_flags: <defaults>
</compile_context>

<pallas_src>
import functools

import numpy as np
import jax
import jax.numpy as jnp
from jax.experimental import pallas as pl
from jax.experimental.pallas import tpu as pltpu

EPS = 1e-5


# ----------------------------------------------------------------------------
# Fused Pallas kernel: one image of the whole IncRes block per grid step
# ----------------------------------------------------------------------------
def incres_fused_kernel(x_ref, m_ref, w1_ref, b1_ref, w3_ref, b3_ref,
                        wf_ref, bf_ref, o_ref, *, h, w):
    """
    x_ref : (1, Cin, H*W)  input image, channels-first, spatial on lanes (f32)
    m_ref : (9, H*W)       per-tap zero-padding masks ({0,1}, compute dtype)
    w1/b1 : (128, Cin) / (128, 1)   three leading 1x1 convs (BN folded), fused
    w3/b3 : (9, 128, 128) / (128, 1) both 3x3 convs (block-diag) + x0 pass-thru
    wf/bf : (Cin, 128) / (Cin, 1)   trailing 1x1 convs + out conv + scale, folded
    o_ref : (1, Cin, H*W)
    """
    hw = h * w
    cdt = w1_ref.dtype                          # matmul operand dtype
    xt = x_ref[0]                               # (Cin, HW), f32 for the residual

    # ---- stage 1: the three leading 1x1 convs (BN folded) in ONE matmul ----
    # row layout of s: [t1 0:32 | t2 32:64 | x0 64:96 | zero 96:128]
    s = jnp.dot(w1_ref[...], xt.astype(cdt),
                preferred_element_type=jnp.float32) + b1_ref[...]
    s = s.astype(cdt)                           # (128, HW)

    # ---- stage 2: both 3x3 convs as 9 lane-rolled matmuls (f32 accum) ------
    # Shift along the flattened H*W lane axis reproduces the (dy, dx) window;
    # the precomputed mask zeroes wrapped / out-of-image source columns,
    # matching the 3x3 convs' zero padding of their input activations.
    acc = jnp.zeros((128, hw), jnp.float32)
    for k in range(9):
        dy, dx = divmod(k, 3)
        shift = ((1 - dy) * w + (1 - dx)) % hw
        t = s if shift == 0 else pltpu.roll(s, shift=shift, axis=1)
        if k != 4:                              # centre tap needs no mask
            t = t * m_ref[k]
        acc = acc + jnp.dot(w3_ref[k], t, preferred_element_type=jnp.float32)
    u = (acc + b3_ref[...]).astype(cdt)
    # u rows: [b1-3x3 0:32 | b2-3x3 32:80 | zero 80:96 | x0 96:128]

    # ---- folded (trailing 1x1 convs + out conv + scale) + residual + ReLU --
    y = jnp.dot(wf_ref[...], u, preferred_element_type=jnp.float32) \
        + bf_ref[...] + xt
    o_ref[0] = jnp.maximum(y, 0.0).astype(o_ref.dtype)


# ----------------------------------------------------------------------------
# Host glue: BN / scale / W4 folding into fused left-multiply weights
# ----------------------------------------------------------------------------
def fold_bn(conv, bn):
    w, b = conv
    gamma, beta, mean, var = bn
    sc = gamma / jnp.sqrt(var + EPS)
    return w * sc[:, None, None, None], (b - mean) * sc + beta


def build_fused_weights(params, in_planes, scale, compute_dtype):
    # stage 1: rows of s = [branch1 conv1+bn | branch2 conv1+bn | branch0 | 0]
    w_b1c1, b_b1c1 = fold_bn(params["b1_conv1"], params["b1_bn1"])
    w_b2c1, b_b2c1 = fold_bn(params["b2_conv1"], params["b2_bn1"])
    w_b0, b_b0 = params["b0_conv"]              # branch0bn unused in forward()
    W1 = jnp.zeros((128, in_planes), jnp.float32)
    W1 = W1.at[0:32].set(w_b1c1[:, :, 0, 0])
    W1 = W1.at[32:64].set(w_b2c1[:, :, 0, 0])
    W1 = W1.at[64:96].set(w_b0[:, :, 0, 0])
    B1 = jnp.zeros((128,), jnp.float32)
    B1 = B1.at[0:32].set(b_b1c1).at[32:64].set(b_b2c1).at[64:96].set(b_b0)

    # stage 2: both 3x3 convs, block-diagonal per tap, + identity on the
    # centre tap carrying x0 (s rows 64:96) through to u rows 96:128.
    w_b1c2, b_b1c2 = fold_bn(params["b1_conv2"], params["b1_bn2"])   # (32,32,3,3)
    w_b2c2, b_b2c2 = fold_bn(params["b2_conv2"], params["b2_bn2"])   # (48,32,3,3)
    W3 = jnp.zeros((9, 128, 128), jnp.float32)
    for k in range(9):
        dy, dx = divmod(k, 3)
        W3 = W3.at[k, 0:32, 0:32].set(w_b1c2[:, :, dy, dx])
        W3 = W3.at[k, 32:80, 32:64].set(w_b2c2[:, :, dy, dx])
    W3 = W3.at[4, 96:128, 64:96].set(jnp.eye(32, dtype=jnp.float32))
    B3 = jnp.zeros((128,), jnp.float32)
    B3 = B3.at[0:32].set(b_b1c2).at[32:80].set(b_b2c2)

    # final: fold both trailing 1x1+BN convs and `scale` into the out conv.
    A1, a1 = fold_bn(params["b1_conv3"], params["b1_bn3"])           # (32,32,1,1)
    A2, a2 = fold_bn(params["b2_conv3"], params["b2_bn3"])           # (64,48,1,1)
    A1, A2 = A1[:, :, 0, 0], A2[:, :, 0, 0]
    wf, bf = params["out_conv"]
    Wf = wf[:, :, 0, 0]                         # (Cin, 128); cols = [x0|x1|x2]
    WF = jnp.zeros((in_planes, 128), jnp.float32)
    WF = WF.at[:, 0:32].set(Wf[:, 32:64] @ A1)          # pre-x1 rows of u
    WF = WF.at[:, 32:80].set(Wf[:, 64:128] @ A2)        # pre-x2 rows of u
    WF = WF.at[:, 96:128].set(Wf[:, 0:32])              # x0 rows of u
    WF = WF * scale
    BF = (Wf[:, 32:64] @ a1 + Wf[:, 64:128] @ a2 + bf) * scale

    cdt = compute_dtype
    return (W1.astype(cdt), B1.reshape(128, 1),
            W3.astype(cdt), B3.reshape(128, 1),
            WF.astype(cdt), BF.reshape(in_planes, 1))


def build_tap_masks(h, w, dtype):
    # {0,1} per-tap validity of the 3x3 source position, flattened over H*W.
    ys, xs = np.divmod(np.arange(h * w), w)
    masks = []
    for k in range(9):
        dy, dx = divmod(k, 3)
        sy, sx = ys + dy - 1, xs + dx - 1
        masks.append((sy >= 0) & (sy < h) & (sx >= 0) & (sx < w))
    return jnp.asarray(np.stack(masks).astype(np.float32), dtype=dtype)


def incres_forward_pallas(x_nchw, params, scale, compute_dtype=jnp.bfloat16):
    n, c, h, w = x_nchw.shape
    hw = h * w
    x2 = x_nchw.reshape(n, c, hw)               # free: NCHW is already contiguous
    W1, B1, W3, B3, WF, BF = build_fused_weights(params, c, scale, compute_dtype)
    tap_mask = build_tap_masks(h, w, compute_dtype)

    kernel = functools.partial(incres_fused_kernel, h=h, w=w)
    pin2 = lambda i: (0, 0)

    out = pl.pallas_call(
        kernel,
        out_shape=jax.ShapeDtypeStruct((n, c, hw), jnp.float32),
        grid=(n,),
        in_specs=[
            pl.BlockSpec((1, c, hw), lambda i: (i, 0, 0)),        # x
            pl.BlockSpec((9, hw), pin2),                          # tap masks
            pl.BlockSpec((128, c), pin2),                         # W1
            pl.BlockSpec((128, 1), pin2),                         # B1
            pl.BlockSpec((9, 128, 128), lambda i: (0, 0, 0)),     # W3
            pl.BlockSpec((128, 1), pin2),                         # B3
            pl.BlockSpec((c, 128), pin2),                         # WF (W4+scale folded)
            pl.BlockSpec((c, 1), pin2),                           # BF
        ],
        out_specs=pl.BlockSpec((1, c, hw), lambda i: (i, 0, 0)),
        compiler_params=pltpu.CompilerParams(
            dimension_semantics=("parallel",),
        ),
    )(x2, tap_mask, W1, B1, W3, B3, WF, BF)
    return out.reshape(n, c, h, w)


# ----------------------------------------------------------------------------
# Parameter init (same layout as the PyTorch module, eval-mode BN stats)
# ----------------------------------------------------------------------------
def init_conv(key, cout, cin, kh, kw):
    k1, k2 = jax.random.split(key)
    w = jax.random.normal(k1, (cout, cin, kh, kw), jnp.float32) * 0.05
    b = jax.random.normal(k2, (cout,), jnp.float32) * 0.05
    return w, b


def init_bn(key, c):
    k1, k2, k3, k4 = jax.random.split(key, 4)
    gamma = 1.0 + 0.1 * jax.random.normal(k1, (c,), jnp.float32)
    beta = 0.1 * jax.random.normal(k2, (c,), jnp.float32)
    mean = 0.1 * jax.random.normal(k3, (c,), jnp.float32)
    var = 1.0 + 0.1 * jax.random.uniform(k4, (c,), jnp.float32)
    return gamma, beta, mean, var


def init_params(key, in_planes):
    ks = jax.random.split(key, 16)
    p = {}
    p["b0_conv"] = init_conv(ks[0], 32, in_planes, 1, 1)   # branch0bn unused
    p["b1_conv1"] = init_conv(ks[1], 32, in_planes, 1, 1)
    p["b1_bn1"] = init_bn(ks[2], 32)
    p["b1_conv2"] = init_conv(ks[3], 32, 32, 3, 3)
    p["b1_bn2"] = init_bn(ks[4], 32)
    p["b1_conv3"] = init_conv(ks[5], 32, 32, 1, 1)
    p["b1_bn3"] = init_bn(ks[6], 32)
    p["b2_conv1"] = init_conv(ks[7], 32, in_planes, 1, 1)
    p["b2_bn1"] = init_bn(ks[8], 32)
    p["b2_conv2"] = init_conv(ks[9], 48, 32, 3, 3)
    p["b2_bn2"] = init_bn(ks[10], 48)
    p["b2_conv3"] = init_conv(ks[11], 64, 48, 1, 1)
    p["b2_bn3"] = init_bn(ks[12], 64)
    p["out_conv"] = init_conv(ks[13], in_planes, 128, 1, 1)
    return p


# ----------------------------------------------------------------------------
# Pure-JAX reference (NCHW, lax conv) for verification
# ----------------------------------------------------------------------------
def conv_ref(x, w, b, padding):
    y = jax.lax.conv_general_dilated(
        x, w, window_strides=(1, 1), padding=padding,
        dimension_numbers=("NCHW", "OIHW", "NCHW"))
    return y + b[None, :, None, None]


def bn_ref(x, bn):
    gamma, beta, mean, var = bn
    inv = gamma / jnp.sqrt(var + EPS)
    return (x - mean[None, :, None, None]) * inv[None, :, None, None] \
        + beta[None, :, None, None]


def incres_forward_ref(x, params, scale):
    x0 = conv_ref(x, *params["b0_conv"], "VALID")
    t = bn_ref(conv_ref(x, *params["b1_conv1"], "VALID"), params["b1_bn1"])
    t = bn_ref(conv_ref(t, *params["b1_conv2"], ((1, 1), (1, 1))), params["b1_bn2"])
    x1 = bn_ref(conv_ref(t, *params["b1_conv3"], "VALID"), params["b1_bn3"])
    t = bn_ref(conv_ref(x, *params["b2_conv1"], "VALID"), params["b2_bn1"])
    t = bn_ref(conv_ref(t, *params["b2_conv2"], ((1, 1), (1, 1))), params["b2_bn2"])
    x2 = bn_ref(conv_ref(t, *params["b2_conv3"], "VALID"), params["b2_bn3"])
    cat = jnp.concatenate([x0, x1, x2], axis=1)
    out = conv_ref(cat, *params["out_conv"], "VALID")
    out = out * scale + x
    return jnp.maximum(out, 0.0)


# ----------------------------------------------------------------------------
if __name__ == "__main__":
    N, C, H, W = 2, 64, 16, 16
    SCALE = 0.5

    key = jax.random.PRNGKey(0)
    kx, kp = jax.random.split(key)
    x = jax.random.normal(kx, (N, C, H, W), jnp.float32)
    params = init_params(kp, C)

    ref = incres_forward_ref(x, params, SCALE)

    # 1) f32 compute path: tight numerical check of the fused kernel.
    fwd32 = jax.jit(functools.partial(incres_forward_pallas,
                                      compute_dtype=jnp.float32))
    out32 = jax.block_until_ready(fwd32(x, params, SCALE))
    assert out32.shape == (N, C, H, W)
    err32 = float(jnp.max(jnp.abs(out32 - ref)))
    assert jnp.allclose(out32, ref, atol=5e-4, rtol=5e-4), \
        f"f32 mismatch, max abs err = {err32}"

    # 2) bf16 perf path (bf16 MXU operands, f32 accumulation / epilogue).
    fwd16 = jax.jit(functools.partial(incres_forward_pallas,
                                      compute_dtype=jnp.bfloat16))
    out16 = jax.block_until_ready(fwd16(x, params, SCALE))
    err16 = float(jnp.max(jnp.abs(out16 - ref)))
    assert jnp.allclose(out16, ref, atol=6e-2, rtol=6e-2), \
        f"bf16 mismatch, max abs err = {err16}"

    print("KERNEL_OK")
</pallas_src>

<mosaic_0001>
module attributes {stable_mosaic.version = 11 : i64} {
  func.func @incres_fused_kernel(%arg0: i32, %arg1: memref<1x64x256xf32, #tpu.memory_space<vmem>>, %arg2: memref<9x256xf32, #tpu.memory_space<vmem>>, %arg3: memref<128x64xf32, #tpu.memory_space<vmem>>, %arg4: memref<128x1xf32, #tpu.memory_space<vmem>>, %arg5: memref<9x128x128xf32, #tpu.memory_space<vmem>>, %arg6: memref<128x1xf32, #tpu.memory_space<vmem>>, %arg7: memref<64x128xf32, #tpu.memory_space<vmem>>, %arg8: memref<64x1xf32, #tpu.memory_space<vmem>>, %arg9: memref<1x64x256xf32, #tpu.memory_space<vmem>>) attributes {dimension_semantics = [#tpu.dimension_semantics<parallel>], iteration_bounds = array<i64: 2>, scalar_prefetch = 0 : i64, scratch_operands = 0 : i64, tpu.core_type = #tpu.core_type<tc>, window_params = [{transform_indices = @transform_0, window_bounds = array<i64: 1, 64, 256>}, {pipeline_mode = #tpu.pipeline_mode<synchronous>, transform_indices = @transform_1, window_bounds = array<i64: 9, 256>}, {pipeline_mode = #tpu.pipeline_mode<synchronous>, transform_indices = @transform_2, window_bounds = array<i64: 128, 64>}, {pipeline_mode = #tpu.pipeline_mode<synchronous>, transform_indices = @transform_3, window_bounds = array<i64: 128, 1>}, {pipeline_mode = #tpu.pipeline_mode<synchronous>, transform_indices = @transform_4, window_bounds = array<i64: 9, 128, 128>}, {pipeline_mode = #tpu.pipeline_mode<synchronous>, transform_indices = @transform_5, window_bounds = array<i64: 128, 1>}, {pipeline_mode = #tpu.pipeline_mode<synchronous>, transform_indices = @transform_6, window_bounds = array<i64: 64, 128>}, {pipeline_mode = #tpu.pipeline_mode<synchronous>, transform_indices = @transform_7, window_bounds = array<i64: 64, 1>}, {transform_indices = @transform_8, window_bounds = array<i64: 1, 64, 256>}]} {
    %c0 = arith.constant 0 : index
    %c0_0 = arith.constant 0 : index
    %c0_1 = arith.constant 0 : index
    %0 = vector.load %arg1[%c0, %c0_0, %c0_1] : memref<1x64x256xf32, #tpu.memory_space<vmem>>, vector<1x64x256xf32>
    %1 = vector.shape_cast %0 : vector<1x64x256xf32> to vector<64x256xf32>
    %c0_2 = arith.constant 0 : index
    %c0_3 = arith.constant 0 : index
    %2 = vector.load %arg3[%c0_2, %c0_3] : memref<128x64xf32, #tpu.memory_space<vmem>>, vector<128x64xf32>
    %cst = arith.constant dense<0.000000e+00> : vector<128x256xf32>
    %3 = tpu.matmul %2, %1, %cst {dimension_numbers = #tpu.dot_dimension_numbers<[1], [0], [0], [1], [0, 0, 1, 1], [], []>} : vector<128x64xf32>, vector<64x256xf32>, vector<128x256xf32> -> vector<128x256xf32>
    %c0_4 = arith.constant 0 : index
    %c0_5 = arith.constant 0 : index
    %4 = vector.load %arg4[%c0_4, %c0_5] : memref<128x1xf32, #tpu.memory_space<vmem>>, vector<128x1xf32>
    %5 = vector.broadcast %4 : vector<128x1xf32> to vector<128x256xf32>
    %6 = arith.addf %3, %5 : vector<128x256xf32>
    %cst_6 = arith.constant 0.000000e+00 : f32
    %7 = vector.broadcast %cst_6 : f32 to vector<128x256xf32>
    %c17_i32 = arith.constant 17 : i32
    %8 = tpu.dynamic_rotate %6 by %c17_i32 dim 1 : vector<128x256xf32>, i32 -> vector<128x256xf32>
    %c0_7 = arith.constant 0 : index
    %c0_8 = arith.constant 0 : index
    %9 = vector.load %arg2[%c0_7, %c0_8] : memref<9x256xf32, #tpu.memory_space<vmem>>, vector<1x256xf32>
    %10 = vector.shape_cast %9 : vector<1x256xf32> to vector<256xf32>
    %11 = vector.shape_cast %10 : vector<256xf32> to vector<1x256xf32>
    %12 = vector.broadcast %11 : vector<1x256xf32> to vector<128x256xf32>
    %13 = arith.mulf %8, %12 : vector<128x256xf32>
    %c0_9 = arith.constant 0 : index
    %c0_10 = arith.constant 0 : index
    %c0_11 = arith.constant 0 : index
    %14 = vector.load %arg5[%c0_9, %c0_10, %c0_11] : memref<9x128x128xf32, #tpu.memory_space<vmem>>, vector<1x128x128xf32>
    %15 = vector.shape_cast %14 : vector<1x128x128xf32> to vector<128x128xf32>
    %cst_12 = arith.constant dense<0.000000e+00> : vector<128x256xf32>
    %16 = tpu.matmul %15, %13, %cst_12 {dimension_numbers = #tpu.dot_dimension_numbers<[1], [0], [0], [1], [0, 0, 1, 1], [], []>} : vector<128x128xf32>, vector<128x256xf32>, vector<128x256xf32> -> vector<128x256xf32>
    %17 = arith.addf %7, %16 : vector<128x256xf32>
    %c16_i32 = arith.constant 16 : i32
    %18 = tpu.dynamic_rotate %6 by %c16_i32 dim 1 : vector<128x256xf32>, i32 -> vector<128x256xf32>
    %c1 = arith.constant 1 : index
    %c0_13 = arith.constant 0 : index
    %19 = vector.load %arg2[%c1, %c0_13] : memref<9x256xf32, #tpu.memory_space<vmem>>, vector<1x256xf32>
    %20 = vector.shape_cast %19 : vector<1x256xf32> to vector<256xf32>
    %21 = vector.shape_cast %20 : vector<256xf32> to vector<1x256xf32>
    %22 = vector.broadcast %21 : vector<1x256xf32> to vector<128x256xf32>
    %23 = arith.mulf %18, %22 : vector<128x256xf32>
    %c1_14 = arith.constant 1 : index
    %c0_15 = arith.constant 0 : index
    %c0_16 = arith.constant 0 : index
    %24 = vector.load %arg5[%c1_14, %c0_15, %c0_16] : memref<9x128x128xf32, #tpu.memory_space<vmem>>, vector<1x128x128xf32>
    %25 = vector.shape_cast %24 : vector<1x128x128xf32> to vector<128x128xf32>
    %cst_17 = arith.constant dense<0.000000e+00> : vector<128x256xf32>
    %26 = tpu.matmul %25, %23, %cst_17 {dimension_numbers = #tpu.dot_dimension_numbers<[1], [0], [0], [1], [0, 0, 1, 1], [], []>} : vector<128x128xf32>, vector<128x256xf32>, vector<128x256xf32> -> vector<128x256xf32>
    %27 = arith.addf %17, %26 : vector<128x256xf32>
    %c15_i32 = arith.constant 15 : i32
    %28 = tpu.dynamic_rotate %6 by %c15_i32 dim 1 : vector<128x256xf32>, i32 -> vector<128x256xf32>
    %c2 = arith.constant 2 : index
    %c0_18 = arith.constant 0 : index
    %29 = vector.load %arg2[%c2, %c0_18] : memref<9x256xf32, #tpu.memory_space<vmem>>, vector<1x256xf32>
    %30 = vector.shape_cast %29 : vector<1x256xf32> to vector<256xf32>
    %31 = vector.shape_cast %30 : vector<256xf32> to vector<1x256xf32>
    %32 = vector.broadcast %31 : vector<1x256xf32> to vector<128x256xf32>
    %33 = arith.mulf %28, %32 : vector<128x256xf32>
    %c2_19 = arith.constant 2 : index
    %c0_20 = arith.constant 0 : index
    %c0_21 = arith.constant 0 : index
    %34 = vector.load %arg5[%c2_19, %c0_20, %c0_21] : memref<9x128x128xf32, #tpu.memory_space<vmem>>, vector<1x128x128xf32>
    %35 = vector.shape_cast %34 : vector<1x128x128xf32> to vector<128x128xf32>
    %cst_22 = arith.constant dense<0.000000e+00> : vector<128x256xf32>
    %36 = tpu.matmul %35, %33, %cst_22 {dimension_numbers = #tpu.dot_dimension_numbers<[1], [0], [0], [1], [0, 0, 1, 1], [], []>} : vector<128x128xf32>, vector<128x256xf32>, vector<128x256xf32> -> vector<128x256xf32>
    %37 = arith.addf %27, %36 : vector<128x256xf32>
    %c1_i32 = arith.constant 1 : i32
    %38 = tpu.dynamic_rotate %6 by %c1_i32 dim 1 : vector<128x256xf32>, i32 -> vector<128x256xf32>
    %c3 = arith.constant 3 : index
    %c0_23 = arith.constant 0 : index
    %39 = vector.load %arg2[%c3, %c0_23] : memref<9x256xf32, #tpu.memory_space<vmem>>, vector<1x256xf32>
    %40 = vector.shape_cast %39 : vector<1x256xf32> to vector<256xf32>
    %41 = vector.shape_cast %40 : vector<256xf32> to vector<1x256xf32>
    %42 = vector.broadcast %41 : vector<1x256xf32> to vector<128x256xf32>
    %43 = arith.mulf %38, %42 : vector<128x256xf32>
    %c3_24 = arith.constant 3 : index
    %c0_25 = arith.constant 0 : index
    %c0_26 = arith.constant 0 : index
    %44 = vector.load %arg5[%c3_24, %c0_25, %c0_26] : memref<9x128x128xf32, #tpu.memory_space<vmem>>, vector<1x128x128xf32>
    %45 = vector.shape_cast %44 : vector<1x128x128xf32> to vector<128x128xf32>
    %cst_27 = arith.constant dense<0.000000e+00> : vector<128x256xf32>
    %46 = tpu.matmul %45, %43, %cst_27 {dimension_numbers = #tpu.dot_dimension_numbers<[1], [0], [0], [1], [0, 0, 1, 1], [], []>} : vector<128x128xf32>, vector<128x256xf32>, vector<128x256xf32> -> vector<128x256xf32>
    %47 = arith.addf %37, %46 : vector<128x256xf32>
    %c4 = arith.constant 4 : index
    %c0_28 = arith.constant 0 : index
    %c0_29 = arith.constant 0 : index
    %48 = vector.load %arg5[%c4, %c0_28, %c0_29] : memref<9x128x128xf32, #tpu.memory_space<vmem>>, vector<1x128x128xf32>
    %49 = vector.shape_cast %48 : vector<1x128x128xf32> to vector<128x128xf32>
    %cst_30 = arith.constant dense<0.000000e+00> : vector<128x256xf32>
    %50 = tpu.matmul %49, %6, %cst_30 {dimension_numbers = #tpu.dot_dimension_numbers<[1], [0], [0], [1], [0, 0, 1, 1], [], []>} : vector<128x128xf32>, vector<128x256xf32>, vector<128x256xf32> -> vector<128x256xf32>
    %51 = arith.addf %47, %50 : vector<128x256xf32>
    %c255_i32 = arith.constant 255 : i32
    %52 = tpu.dynamic_rotate %6 by %c255_i32 dim 1 : vector<128x256xf32>, i32 -> vector<128x256xf32>
    %c5 = arith.constant 5 : index
    %c0_31 = arith.constant 0 : index
    %53 = vector.load %arg2[%c5, %c0_31] : memref<9x256xf32, #tpu.memory_space<vmem>>, vector<1x256xf32>
    %54 = vector.shape_cast %53 : vector<1x256xf32> to vector<256xf32>
    %55 = vector.shape_cast %54 : vector<256xf32> to vector<1x256xf32>
    %56 = vector.broadcast %55 : vector<1x256xf32> to vector<128x256xf32>
    %57 = arith.mulf %52, %56 : vector<128x256xf32>
    %c5_32 = arith.constant 5 : index
    %c0_33 = arith.constant 0 : index
    %c0_34 = arith.constant 0 : index
    %58 = vector.load %arg5[%c5_32, %c0_33, %c0_34] : memref<9x128x128xf32, #tpu.memory_space<vmem>>, vector<1x128x128xf32>
    %59 = vector.shape_cast %58 : vector<1x128x128xf32> to vector<128x128xf32>
    %cst_35 = arith.constant dense<0.000000e+00> : vector<128x256xf32>
    %60 = tpu.matmul %59, %57, %cst_35 {dimension_numbers = #tpu.dot_dimension_numbers<[1], [0], [0], [1], [0, 0, 1, 1], [], []>} : vector<128x128xf32>, vector<128x256xf32>, vector<128x256xf32> -> vector<128x256xf32>
    %61 = arith.addf %51, %60 : vector<128x256xf32>
    %c241_i32 = arith.constant 241 : i32
    %62 = tpu.dynamic_rotate %6 by %c241_i32 dim 1 : vector<128x256xf32>, i32 -> vector<128x256xf32>
    %c6 = arith.constant 6 : index
    %c0_36 = arith.constant 0 : index
    %63 = vector.load %arg2[%c6, %c0_36] : memref<9x256xf32, #tpu.memory_space<vmem>>, vector<1x256xf32>
    %64 = vector.shape_cast %63 : vector<1x256xf32> to vector<256xf32>
    %65 = vector.shape_cast %64 : vector<256xf32> to vector<1x256xf32>
    %66 = vector.broadcast %65 : vector<1x256xf32> to vector<128x256xf32>
    %67 = arith.mulf %62, %66 : vector<128x256xf32>
    %c6_37 = arith.constant 6 : index
    %c0_38 = arith.constant 0 : index
    %c0_39 = arith.constant 0 : index
    %68 = vector.load %arg5[%c6_37, %c0_38, %c0_39] : memref<9x128x128xf32, #tpu.memory_space<vmem>>, vector<1x128x128xf32>
    %69 = vector.shape_cast %68 : vector<1x128x128xf32> to vector<128x128xf32>
    %cst_40 = arith.constant dense<0.000000e+00> : vector<128x256xf32>
    %70 = tpu.matmul %69, %67, %cst_40 {dimension_numbers = #tpu.dot_dimension_numbers<[1], [0], [0], [1], [0, 0, 1, 1], [], []>} : vector<128x128xf32>, vector<128x256xf32>, vector<128x256xf32> -> vector<128x256xf32>
    %71 = arith.addf %61, %70 : vector<128x256xf32>
    %c240_i32 = arith.constant 240 : i32
    %72 = tpu.dynamic_rotate %6 by %c240_i32 dim 1 : vector<128x256xf32>, i32 -> vector<128x256xf32>
    %c7 = arith.constant 7 : index
    %c0_41 = arith.constant 0 : index
    %73 = vector.load %arg2[%c7, %c0_41] : memref<9x256xf32, #tpu.memory_space<vmem>>, vector<1x256xf32>
    %74 = vector.shape_cast %73 : vector<1x256xf32> to vector<256xf32>
    %75 = vector.shape_cast %74 : vector<256xf32> to vector<1x256xf32>
    %76 = vector.broadcast %75 : vector<1x256xf32> to vector<128x256xf32>
    %77 = arith.mulf %72, %76 : vector<128x256xf32>
    %c7_42 = arith.constant 7 : index
    %c0_43 = arith.constant 0 : index
    %c0_44 = arith.constant 0 : index
    %78 = vector.load %arg5[%c7_42, %c0_43, %c0_44] : memref<9x128x128xf32, #tpu.memory_space<vmem>>, vector<1x128x128xf32>
    %79 = vector.shape_cast %78 : vector<1x128x128xf32> to vector<128x128xf32>
    %cst_45 = arith.constant dense<0.000000e+00> : vector<128x256xf32>
    %80 = tpu.matmul %79, %77, %cst_45 {dimension_numbers = #tpu.dot_dimension_numbers<[1], [0], [0], [1], [0, 0, 1, 1], [], []>} : vector<128x128xf32>, vector<128x256xf32>, vector<128x256xf32> -> vector<128x256xf32>
    %81 = arith.addf %71, %80 : vector<128x256xf32>
    %c239_i32 = arith.constant 239 : i32
    %82 = tpu.dynamic_rotate %6 by %c239_i32 dim 1 : vector<128x256xf32>, i32 -> vector<128x256xf32>
    %c8 = arith.constant 8 : index
    %c0_46 = arith.constant 0 : index
    %83 = vector.load %arg2[%c8, %c0_46] : memref<9x256xf32, #tpu.memory_space<vmem>>, vector<1x256xf32>
    %84 = vector.shape_cast %83 : vector<1x256xf32> to vector<256xf32>
    %85 = vector.shape_cast %84 : vector<256xf32> to vector<1x256xf32>
    %86 = vector.broadcast %85 : vector<1x256xf32> to vector<128x256xf32>
    %87 = arith.mulf %82, %86 : vector<128x256xf32>
    %c8_47 = arith.constant 8 : index
    %c0_48 = arith.constant 0 : index
    %c0_49 = arith.constant 0 : index
    %88 = vector.load %arg5[%c8_47, %c0_48, %c0_49] : memref<9x128x128xf32, #tpu.memory_space<vmem>>, vector<1x128x128xf32>
    %89 = vector.shape_cast %88 : vector<1x128x128xf32> to vector<128x128xf32>
    %cst_50 = arith.constant dense<0.000000e+00> : vector<128x256xf32>
    %90 = tpu.matmul %89, %87, %cst_50 {dimension_numbers = #tpu.dot_dimension_numbers<[1], [0], [0], [1], [0, 0, 1, 1], [], []>} : vector<128x128xf32>, vector<128x256xf32>, vector<128x256xf32> -> vector<128x256xf32>
    %91 = arith.addf %81, %90 : vector<128x256xf32>
    %c0_51 = arith.constant 0 : index
    %c0_52 = arith.constant 0 : index
    %92 = vector.load %arg6[%c0_51, %c0_52] : memref<128x1xf32, #tpu.memory_space<vmem>>, vector<128x1xf32>
    %93 = vector.broadcast %92 : vector<128x1xf32> to vector<128x256xf32>
    %94 = arith.addf %91, %93 : vector<128x256xf32>
    %c0_53 = arith.constant 0 : index
    %c0_54 = arith.constant 0 : index
    %95 = vector.load %arg7[%c0_53, %c0_54] : memref<64x128xf32, #tpu.memory_space<vmem>>, vector<64x128xf32>
    %cst_55 = arith.constant dense<0.000000e+00> : vector<64x256xf32>
    %96 = tpu.matmul %95, %94, %cst_55 {dimension_numbers = #tpu.dot_dimension_numbers<[1], [0], [0], [1], [0, 0, 1, 1], [], []>} : vector<64x128xf32>, vector<128x256xf32>, vector<64x256xf32> -> vector<64x256xf32>
    %c0_56 = arith.constant 0 : index
    %c0_57 = arith.constant 0 : index
    %97 = vector.load %arg8[%c0_56, %c0_57] : memref<64x1xf32, #tpu.memory_space<vmem>>, vector<64x1xf32>
    %98 = vector.broadcast %97 : vector<64x1xf32> to vector<64x256xf32>
    %99 = arith.addf %96, %98 : vector<64x256xf32>
    %100 = arith.addf %99, %1 : vector<64x256xf32>
    %cst_58 = arith.constant 0.000000e+00 : f32
    %101 = vector.broadcast %cst_58 : f32 to vector<64x256xf32>
    %102 = arith.maximumf %100, %101 : vector<64x256xf32>
    %c0_59 = arith.constant 0 : index
    %c0_60 = arith.constant 0 : index
    %c0_61 = arith.constant 0 : index
    %103 = vector.load %arg9[%c0_59, %c0_60, %c0_61] : memref<1x64x256xf32, #tpu.memory_space<vmem>>, vector<1x64x256xf32>
    %104 = vector.shape_cast %103 : vector<1x64x256xf32> to vector<64x256xf32>
    %105 = vector.shape_cast %102 : vector<64x256xf32> to vector<1x64x256xf32>
    tpu.vector_store %arg9[%c0_59, %c0_60, %c0_61], %105 {strides = array<i32>} : memref<1x64x256xf32, #tpu.memory_space<vmem>>, vector<1x64x256xf32>,
    return
  }
  func.func @transform_0(%arg0: i32) -> (i32, i32, i32) {
    %c0_i32 = arith.constant 0 : i32
    %c0_i32_0 = arith.constant 0 : i32
    %c0_i32_1 = arith.constant 0 : i32
    return %arg0, %c0_i32, %c0_i32_0 : i32, i32, i32
  }
  func.func @transform_1(%arg0: i32) -> (i32, i32) {
    %c0_i32 = arith.constant 0 : i32
    %c0_i32_0 = arith.constant 0 : i32
    %c0_i32_1 = arith.constant 0 : i32
    return %c0_i32, %c0_i32_0 : i32, i32
  }
  func.func @transform_2(%arg0: i32) -> (i32, i32) {
    %c0_i32 = arith.constant 0 : i32
    %c0_i32_0 = arith.constant 0 : i32
    %c0_i32_1 = arith.constant 0 : i32
    return %c0_i32, %c0_i32_0 : i32, i32
  }
  func.func @transform_3(%arg0: i32) -> (i32, i32) {
    %c0_i32 = arith.constant 0 : i32
    %c0_i32_0 = arith.constant 0 : i32
    %c0_i32_1 = arith.constant 0 : i32
    return %c0_i32, %c0_i32_0 : i32, i32
  }
  func.func @transform_4(%arg0: i32) -> (i32, i32, i32) {
    %c0_i32 = arith.constant 0 : i32
    %c0_i32_0 = arith.constant 0 : i32
    %c0_i32_1 = arith.constant 0 : i32
    %c0_i32_2 = arith.constant 0 : i32
    return %c0_i32, %c0_i32_0, %c0_i32_1 : i32, i32, i32
  }
  func.func @transform_5(%arg0: i32) -> (i32, i32) {
    %c0_i32 = arith.constant 0 : i32
    %c0_i32_0 = arith.constant 0 : i32
    %c0_i32_1 = arith.constant 0 : i32
    return %c0_i32, %c0_i32_0 : i32, i32
  }
  func.func @transform_6(%arg0: i32) -> (i32, i32) {
    %c0_i32 = arith.constant 0 : i32
    %c0_i32_0 = arith.constant 0 : i32
    %c0_i32_1 = arith.constant 0 : i32
    return %c0_i32, %c0_i32_0 : i32, i32
  }
  func.func @transform_7(%arg0: i32) -> (i32, i32) {
    %c0_i32 = arith.constant 0 : i32
    %c0_i32_0 = arith.constant 0 : i32
    %c0_i32_1 = arith.constant 0 : i32
    return %c0_i32, %c0_i32_0 : i32, i32
  }
  func.func @transform_8(%arg0: i32) -> (i32, i32, i32) {
    %c0_i32 = arith.constant 0 : i32
    %c0_i32_0 = arith.constant 0 : i32
    %c0_i32_1 = arith.constant 0 : i32
    return %arg0, %c0_i32, %c0_i32_0 : i32, i32, i32
  }
}

</mosaic_0001>

<bundles_post_ra>
// kernel: incres_forward_pallas.1
= control target key start
LH: loop header
LB: loop body
LE: loop exit
PB: predicated region body
PF: predicated region fallthrough
CT: control target
= control target key end

     0   :  { %s4301_s27 = smov 0   ;;  %s8249_s0 = inlined_call_operand.vmem [shape: f32[2,64,256], index: 0, kind: input, shape index: {}]   ;;  %s8250_s1 = inlined_call_operand.vmem [shape: f32[9,256], index: 1, kind: input, shape index: {}]   ;;  %s8251_s2 = inlined_call_operand.vmem [shape: f32[128,64], index: 2, kind: input, shape index: {}]   ;;  %s8252_s3 = inlined_call_operand.vmem [shape: f32[128,1], index: 3, kind: input, shape index: {}]   ;;  %s8253_s4 = inlined_call_operand.vmem [shape: f32[9,128,128], index: 4, kind: input, shape index: {}]   ;;  %s8254_s5 = inlined_call_operand.vmem [shape: f32[128,1], index: 5, kind: input, shape index: {}]   ;;  %s8255_s6 = inlined_call_operand.vmem [shape: f32[64,128], index: 6, kind: input, shape index: {}]   ;;  %s8256_s7 = inlined_call_operand.vmem [shape: f32[64,1], index: 7, kind: input, shape index: {}]   ;;  %s8257_s8 = inlined_call_operand.vmem [shape: f32[2,64,256], index: 8, kind: output, shape index: {}]  }
   0x1 LB: > { %s4006_s28 = sadd.s32 4294967295, %s4244_s27   ;;  %p4010_p0 = scmp.ge.s32.totalorder %s4244_s27, 1  ;;  %s4244_s27 = sphi %s4301_s27, %s18_s27  }
   0x2   : > { %p262_p1 = scmp.lt.s32.totalorder %s4244_s27, 3 }
   0x4   : > { %p263_p2 = pnand %p4010_p0, %p262_p1 }
   0x6   : > { %266 = sbr.rel (%p263_p2) target bundleno = 1425 (0x591), region = 52 }
   0xb   : > { %p296_p3 = scmp.lt.s32.totalorder %s4006_s28, 1  ;;  %v8258_v0 = vmov 0.0   ;;  %v351_v1 = vld [vmem:[%s8252_s3 + $0x68] sm:$0xff]  ;;  %v4247_v2 = vmov 0   ;;  %v353_v3 = vld [vmem:[%s8252_s3 + $0x78] sm:$0xff]  ;;  %v350_v4 = vld [vmem:[%s8252_s3 + $0x60] sm:$0xff] }
   0xc   : > { %547 = vmatprep.mubr.f32.mxu0 %v8258_v0  ;;  %1026 = vmatprep.mubr.f32.mxu1 %v8258_v0  ;;  %v352_v5 = vld [vmem:[%s8252_s3 + $0x70] sm:$0xff]  ;;  %v349_v13 = vld [vmem:[%s8252_s3 + $0x58] sm:$0xff]  ;;  %v346_v17 = vld [vmem:[%s8252_s3 + $0x40] sm:$0xff]  ;;  %vm434_vm0 = vcmask 523264   ;;  %s4248_s21 = smov 16   ;;  %s4249_s22 = smov 17  }
   0xd   : > { %s8706_s28 = smov (!%p296_p3, %s4006_s28), 1  ;;  %4221 = vset.pattern.permute.xlu1 %v4247_v2  ;;  %4220 = vset.pattern.permute.xlu0 %v4247_v2  ;;  %v348_v11 = vld [vmem:[%s8252_s3 + $0x50] sm:$0xff]  ;;  %v347_v19 = vld [vmem:[%s8252_s3 + $0x48] sm:$0xff]  ;;  %v345_v25 = vld [vmem:[%s8252_s3 + $0x38] sm:$0xff]  ;;  %s4250_s23 = smov 15  }
   0xe   : > { %421 = vperm.xlu1 %4221, %v351_v1   ;;  %s4168_s11 = sshll.u32 %s8706_s28, 7  ;;  %431 = vperm.xlu0 %4220, %v353_v3   ;;  %v344_v23 = vld [vmem:[%s8252_s3 + $0x30] sm:$0xff]  ;;  %v322_v28 = vld [vmem:[%s8251_s2] sm:$0xff]  ;;  %v343_v30 = vld [vmem:[%s8252_s3 + $0x28] sm:$0xff]  ;;  %s4251_s24 = smov 1  }
   0xf   : > { %s4328_s16 = scalar_lea.vmem %s8249_s0, %s4168_s11  ;;  %v342_v29 = vld [vmem:[%s8252_s3 + $0x20] sm:$0xff]  ;;  %v323_v31 = vld [vmem:[%s8251_s2 + $0x8] sm:$0xff]  ;;  %v340_v32 = vld [vmem:[%s8252_s3 + $0x10] sm:$0xff]  ;;  %s4252_s25 = smov 127  }
  0x10   : > { %v321_v6 = vld [vmem:[%s4328_s16 + $0x78] sm:$0xff]  ;;  %v320_v7 = vld [vmem:[%s4328_s16 + $0x70] sm:$0xff]  ;;  %v319_v8 = vld [vmem:[%s4328_s16 + $0x68] sm:$0xff]  ;;  %s4253_s26 = smov 113   ;;  %s4255_s13 = smov 111  }
  0x11   : > { %499 = vmatprep.subr.mxu0 %v321_v6  ;;  %v318_v9 = vld [vmem:[%s4328_s16 + $0x60] sm:$0xff]  ;;  %v317_v10 = vld [vmem:[%s4328_s16 + $0x58] sm:$0xff]  ;;  %v316_v12 = vld [vmem:[%s4328_s16 + $0x50] sm:$0xff]  ;;  %s8208_s17 = scalar_lea.vmem %s8257_s8, %s4168_s11 }
  0x12   : > { %416 = vperm.xlu1 %4221, %v350_v4   ;;  %500 = vmatpush1.msra.mxu0 %v320_v7  ;;  %v315_v14 = vld [vmem:[%s4328_s16 + $0x48] sm:$0xff]  ;;  %v314_v15 = vld [vmem:[%s4328_s16 + $0x40] sm:$0xff]  ;;  %v313_v16 = vld [vmem:[%s4328_s16 + $0x38] sm:$0xff] }
  0x13   : > { %426 = vperm.xlu0 %4220, %v352_v5   ;;  %501 = vmatprep.subr.mxu0 %v319_v8  ;;  %v312_v18 = vld [vmem:[%s4328_s16 + $0x30] sm:$0xff]  ;;  %v311_v20 = vld [vmem:[%s4328_s16 + $0x28] sm:$0xff]  ;;  %v310_v21 = vld [vmem:[%s4328_s16 + $0x20] sm:$0xff] }
  0x14   : > { %502 = vmatpush1.msra.mxu0 %v318_v9  ;;  %v309_v22 = vld [vmem:[%s4328_s16 + $0x18] sm:$0xff]  ;;  %v308_v24 = vld [vmem:[%s4328_s16 + $0x10] sm:$0xff]  ;;  %v307_v26 = vld [vmem:[%s4328_s16 + $0x8] sm:$0xff] }
  0x15   : > { %503 = vmatprep.subr.mxu0 %v317_v10  ;;  %v306_v27 = vld [vmem:[%s4328_s16] sm:$0xff]  ;;  %v341_v33 = vld [vmem:[%s8252_s3 + $0x18] sm:$0xff]  ;;  %v324_v34 = vld [vmem:[%s8251_s2 + $0x10] sm:$0xff] }
  0x16   : > { %406 = vperm.xlu1 %4221, %v348_v11   ;;  %504 = vmatpush1.msra.mxu0 %v316_v12  ;;  %v338_v35 = vld [vmem:[%s8252_s3] sm:$0xff]  ;;  %v339_v36 = vld [vmem:[%s8252_s3 + $0x8] sm:$0xff]  ;;  %v325_v37 = vld [vmem:[%s8251_s2 + $0x18] sm:$0xff] }
  0x17   : > { %411 = vperm.xlu0 %4220, %v349_v13   ;;  %505 = vmatprep.subr.mxu0 %v315_v14  ;;  %v326_v38 = vld [vmem:[%s8251_s2 + $0x20] sm:$0xff]  ;;  %v327_v39 = vld [vmem:[%s8251_s2 + $0x28] sm:$0xff]  ;;  %v328_v40 = vld [vmem:[%s8251_s2 + $0x30] sm:$0xff] }
  0x18   : > { %506 = vmatpush1.msra.mxu0 %v314_v15  ;;  %v329_v41 = vld [vmem:[%s8251_s2 + $0x38] sm:$0xff]  ;;  %v330_v42 = vld [vmem:[%s8251_s2 + $0x40] sm:$0xff]  ;;  %v331_v43 = vld [vmem:[%s8251_s2 + $0x48] sm:$0xff] }
  0x19   : > { %507 = vmatprep.subr.mxu0 %v313_v16  ;;  %v332_v44 = vld [vmem:[%s8251_s2 + $0x50] sm:$0xff]  ;;  %v333_v45 = vld [vmem:[%s8251_s2 + $0x58] sm:$0xff]  ;;  %v334_v46 = vld [vmem:[%s8251_s2 + $0x60] sm:$0xff] }
  0x1a   : > { %396 = vperm.xlu1 %4221, %v346_v17   ;;  %508 = vmatpush1.msra.mxu0 %v312_v18  ;;  %v335_v47 = vld [vmem:[%s8251_s2 + $0x68] sm:$0xff]  ;;  %v336_v48 = vld [vmem:[%s8251_s2 + $0x70] sm:$0xff]  ;;  %v337_v49 = vld [vmem:[%s8251_s2 + $0x78] sm:$0xff] }
  0x1b   : > { %401 = vperm.xlu0 %4220, %v347_v19   ;;  %509 = vmatprep.subr.mxu0 %v311_v20 }
  0x1c   : > { %510 = vmatpush1.msra.mxu0 %v310_v21 }
  0x1d   : > { %511 = vmatprep.subr.mxu0 %v309_v22 }
  0x1e   : > { %386 = vperm.xlu1 %4221, %v344_v23   ;;  %512 = vmatpush1.msra.mxu0 %v308_v24 }
  0x1f   : > { %391 = vperm.xlu0 %4220, %v345_v25   ;;  %513 = vmatprep.subr.mxu0 %v307_v26 }
  0x20   : > { %514 = vmatpush1.msra.mxu0 %v306_v27 }
  0x21   : > { %4015 = vmatmul.mubr.msk.f32.vlgmr.msra.gmra.mxu0 %vm434_vm0, %v322_v28 }
  0x22   : > { %376 = vperm.xlu1 %4221, %v342_v29   ;;  %553 = vmatprep.mubr.f32.mxu0 %v8258_v0 }
  0x23   : > { %381 = vperm.xlu0 %4220, %v343_v30  }
  0x25   : > { %4016 = vmatmul.mubr.msk.f32.gmra.mxu0 %vm434_vm0, %v323_v31 }
  0x26   : > { %366 = vperm.xlu1 %4221, %v340_v32   ;;  %559 = vmatprep.mubr.f32.mxu0 %v8258_v0 }
  0x27   : > { %371 = vperm.xlu0 %4220, %v341_v33  }
  0x29   : > { %4017 = vmatmul.mubr.msk.f32.gmra.mxu0 %vm434_vm0, %v324_v34 }
  0x2a   : > { %356 = vperm.xlu1 %4221, %v338_v35   ;;  %565 = vmatprep.mubr.f32.mxu0 %v8258_v0 }
  0x2b   : > { %361 = vperm.xlu0 %4220, %v339_v36  }
  0x2d   : > { %4018 = vmatmul.mubr.msk.f32.gmra.mxu0 %vm434_vm0, %v325_v37 }
  0x2e   : > { %571 = vmatprep.mubr.f32.mxu0 %v8258_v0 }
  0x31   : > { %4019 = vmatmul.mubr.msk.f32.gmra.mxu0 %vm434_vm0, %v326_v38 }
  0x32   : > { %577 = vmatprep.mubr.f32.mxu0 %v8258_v0 }
  0x35   : > { %4020 = vmatmul.mubr.msk.f32.gmra.mxu0 %vm434_vm0, %v327_v39 }
  0x36   : > { %583 = vmatprep.mubr.f32.mxu0 %v8258_v0 }
  0x39   : > { %4021 = vmatmul.mubr.msk.f32.gmra.mxu0 %vm434_vm0, %v328_v40 }
  0x3a   : > { %589 = vmatprep.mubr.f32.mxu0 %v8258_v0 }
  0x3d   : > { %4022 = vmatmul.mubr.msk.f32.gmra.mxu0 %vm434_vm0, %v329_v41 }
  0x3e   : > { %595 = vmatprep.mubr.f32.mxu0 %v8258_v0 }
  0x41   : > { %4023 = vmatmul.mubr.msk.f32.gmra.mxu0 %vm434_vm0, %v330_v42 }
  0x42   : > { %601 = vmatprep.mubr.f32.mxu0 %v8258_v0 }
  0x45   : > { %4024 = vmatmul.mubr.msk.f32.gmra.mxu0 %vm434_vm0, %v331_v43 }
  0x46   : > { %607 = vmatprep.mubr.f32.mxu0 %v8258_v0 }
  0x49   : > { %4025 = vmatmul.mubr.msk.f32.gmra.mxu0 %vm434_vm0, %v332_v44 }
  0x4a   : > { %613 = vmatprep.mubr.f32.mxu0 %v8258_v0 }
  0x4d   : > { %4026 = vmatmul.mubr.msk.f32.gmra.mxu0 %vm434_vm0, %v333_v45 }
  0x4e   : > { %619 = vmatprep.mubr.f32.mxu0 %v8258_v0 }
  0x51   : > { %4027 = vmatmul.mubr.msk.f32.gmra.mxu0 %vm434_vm0, %v334_v46 }
  0x52   : > { %625 = vmatprep.mubr.f32.mxu0 %v8258_v0 }
  0x55   : > { %4028 = vmatmul.mubr.msk.f32.gmra.mxu0 %vm434_vm0, %v335_v47 }
  0x56   : > { %631 = vmatprep.mubr.f32.mxu0 %v8258_v0 }
  0x59   : > { %4029 = vmatmul.mubr.msk.f32.gmra.mxu0 %vm434_vm0, %v336_v48 }
  0x5a   : > { %637 = vmatprep.mubr.f32.mxu0 %v8258_v0 }
  0x5d   : > { %4030 = vmatmul.mubr.msk.f32.gmra.mxu0 %vm434_vm0, %v337_v49 }
  0x5e   : > { %1187 = vmatprep.mubr.f32.mxu0 %v8258_v0 }
  0x89   : > { %v4465_v50 = vpop.permute.xlu1 %421  ;;  %v4469_v52 = vpop.permute.xlu0 %431 }
  0x8d   : > { %v4467_v51 = vpop.permute.xlu1 %416 }
  0x8e   : > { %v4473_v54 = vpop.permute.xlu0 %426 }
  0x91   : > { %v4471_v53 = vpop.permute.xlu1 %406 }
  0x92   : > { %v4477_v56 = vpop.permute.xlu0 %411 }
  0x95   : > { %v4475_v55 = vpop.permute.xlu1 %396 }
  0x96   : > { %v4481_v58 = vpop.permute.xlu0 %401 }
  0x99   : > { %v4479_v57 = vpop.permute.xlu1 %386 }
  0x9a   : > { %v4483_v60 = vpop.permute.xlu0 %391 }
  0x9d   : > { %v377_v59 = vpop.permute.xlu1 %376 }
  0x9e   : > { %v382_v62 = vpop.permute.xlu0 %381 }
  0xa1   : > { %v367_v61 = vpop.permute.xlu1 %366 }
  0xa2   : > { %v372_v5 = vpop.permute.xlu0 %371 }
  0xa5   : > { %v357_v63 = vpop.permute.xlu1 %356 }
  0xa6   : > { %v362_v7 = vpop.permute.xlu0 %361 }
  0xe1   : > { %v549_v1 = vpop.f32.mrf.mxu0 }
  0xe2   : > { %v4485_v2 = vadd.f32 %v549_v1, %v357_v63 }
  0xe3   : > { %v551_v3 = vpop.f32.mrf.mxu0 }
  0xe4   : > { %8404 = vst [vmem:[#allocation2_spill] sm:$0xff] %v4485_v2  ;;  %v4487_v4 = vadd.f32 %v551_v3, %v357_v63  ;;  %803 = vrot.lane.b32.xlu0 %v4485_v2, %s4248_s21 }
  0xe5   : > { %v555_v6 = vpop.f32.mrf.mxu0 }
  0xe6   : > { %8405 = vst [vmem:[#allocation3_spill] sm:$0xff] %v4487_v4  ;;  %835 = vrot.lane.b32.xlu1 %v4487_v4, %s4248_s21  ;;  %v4499_v9 = vadd.f32 %v555_v6, %v362_v7 }
  0xe7   : > { %v557_v8 = vpop.f32.mrf.mxu0 }
  0xe8   : > { %644 = vrot.lane.b32.xlu0 %v4485_v2, %s4249_s22  ;;  %8406 = vst [vmem:[#allocation4_spill] sm:$0xff] %v4499_v9  ;;  %v4503_v10 = vadd.f32 %v557_v8, %v362_v7 }
  0xe9   : > { %v561_v11 = vpop.f32.mrf.mxu0 }
  0xea   : > { %676 = vrot.lane.b32.xlu1 %v4487_v4, %s4249_s22  ;;  %8407 = vst [vmem:[#allocation5_spill] sm:$0xff] %v4503_v10  ;;  %v4515_v13 = vadd.f32 %v561_v11, %v367_v61 }
  0xeb   : > { %v563_v12 = vpop.f32.mrf.mxu0 }
  0xec   : > { %1284 = vrot.lane.b32.xlu0 %v4485_v2, %s4250_s23  ;;  %v4519_v14 = vadd.f32 %v563_v12, %v367_v61 }
  0xed   : > { %v567_v15 = vpop.f32.mrf.mxu0 }
  0xee   : > { %1316 = vrot.lane.b32.xlu1 %v4487_v4, %s4250_s23  ;;  %v4531_v17 = vadd.f32 %v567_v15, %v372_v5 }
  0xef   : > { %v569_v16 = vpop.f32.mrf.mxu0 }
  0xf0   : > { %805 = vrot.lane.b32.xlu0 %v4499_v9, %s4248_s21  ;;  %v4535_v18 = vadd.f32 %v569_v16, %v372_v5 }
  0xf1   : > { %v573_v19 = vpop.f32.mrf.mxu0 }
  0xf2   : > { %837 = vrot.lane.b32.xlu1 %v4503_v10, %s4248_s21  ;;  %v4547_v21 = vadd.f32 %v573_v19, %v377_v59 }
  0xf3   : > { %v575_v20 = vpop.f32.mrf.mxu0 }
  0xf4   : > { %646 = vrot.lane.b32.xlu0 %v4499_v9, %s4249_s22  ;;  %v4551_v22 = vadd.f32 %v575_v20, %v377_v59 }
  0xf5   : > { %v579_v23 = vpop.f32.mrf.mxu0 }
  0xf6   : > { %678 = vrot.lane.b32.xlu1 %v4503_v10, %s4249_s22  ;;  %v4563_v25 = vadd.f32 %v579_v23, %v382_v62 }
  0xf7   : > { %v581_v24 = vpop.f32.mrf.mxu0 }
  0xf8   : > { %1286 = vrot.lane.b32.xlu0 %v4499_v9, %s4250_s23  ;;  %v4567_v26 = vadd.f32 %v581_v24, %v382_v62 }
  0xf9   : > { %v585_v27 = vpop.f32.mrf.mxu0 }
  0xfa   : > { %1318 = vrot.lane.b32.xlu1 %v4503_v10, %s4250_s23  ;;  %v4584_v29 = vadd.f32 %v585_v27, %v4479_v57 }
  0xfb   : > { %v587_v28 = vpop.f32.mrf.mxu0 }
  0xfc   : > { %807 = vrot.lane.b32.xlu0 %v4515_v13, %s4248_s21  ;;  %8408 = vst [vmem:[#allocation6_spill] sm:$0xff] %v4584_v29  ;;  %v4589_v30 = vadd.f32 %v587_v28, %v4479_v57 }
  0xfd   : > { %v591_v31 = vpop.f32.mrf.mxu0 }
  0xfe   : > { %839 = vrot.lane.b32.xlu1 %v4519_v14, %s4248_s21  ;;  %v4606_v33 = vadd.f32 %v591_v31, %v4483_v60 }
  0xff   : > { %v593_v32 = vpop.f32.mrf.mxu0 }
 0x100   : > { %648 = vrot.lane.b32.xlu0 %v4515_v13, %s4249_s22  ;;  %8409 = vst [vmem:[#allocation7_spill] sm:$0xff] %v4606_v33  ;;  %v4611_v34 = vadd.f32 %v593_v32, %v4483_v60 }
 0x101   : > { %v597_v35 = vpop.f32.mrf.mxu0 }
 0x102   : > { %680 = vrot.lane.b32.xlu1 %v4519_v14, %s4249_s22  ;;  %8410 = vst [vmem:[#allocation8_spill] sm:$0xff] %v4611_v34  ;;  %v4628_v37 = vadd.f32 %v597_v35, %v4475_v55 }
 0x103   : > { %v599_v36 = vpop.f32.mrf.mxu0 }
 0x104   : > { %1288 = vrot.lane.b32.xlu0 %v4515_v13, %s4250_s23  ;;  %8411 = vst [vmem:[#allocation9_spill] sm:$0xff] %v4628_v37  ;;  %v4633_v38 = vadd.f32 %v599_v36, %v4475_v55 }
 0x105   : > { %v603_v41 = vpop.f32.mrf.mxu0 }
 0x106   : > { %1320 = vrot.lane.b32.xlu1 %v4519_v14, %s4250_s23  ;;  %8412 = vst [vmem:[#allocation10_spill] sm:$0xff] %v4633_v38  ;;  %v4658_v45 = vadd.f32 %v603_v41, %v4481_v58 }
 0x107   : > { %v605_v44 = vpop.f32.mrf.mxu0 }
 0x108   : > { %809 = vrot.lane.b32.xlu0 %v4531_v17, %s4248_s21  ;;  %8415 = vst [vmem:[#allocation13_spill] sm:$0xff] %v4658_v45  ;;  %v4665_v47 = vadd.f32 %v605_v44, %v4481_v58 }
 0x109   : > { %v609_v59 = vpop.f32.mrf.mxu0 }
 0x10a   : > { %841 = vrot.lane.b32.xlu1 %v4535_v18, %s4248_s21  ;;  %8417 = vst [vmem:[#allocation15_spill] sm:$0xff] %v4665_v47  ;;  %v4696_v63 = vadd.f32 %v609_v59, %v4471_v53 }
 0x10b   : > { %v611_v62 = vpop.f32.mrf.mxu0 }
 0x10c   : > { %650 = vrot.lane.b32.xlu0 %v4531_v17, %s4249_s22  ;;  %8423 = vst [vmem:[#allocation21_spill] sm:$0xff] %v4696_v63  ;;  %v4703_v3 = vadd.f32 %v611_v62, %v4471_v53 }
 0x10d   : > { %v615_v11 = vpop.f32.mrf.mxu0 }
 0x10e   : > { %682 = vrot.lane.b32.xlu1 %v4535_v18, %s4249_s22  ;;  %8424 = vst [vmem:[#allocation22_spill] sm:$0xff] %v4703_v3  ;;  %v4734_v19 = vadd.f32 %v615_v11, %v4477_v56 }
 0x10f   : > { %v617_v16 = vpop.f32.mrf.mxu0 }
 0x110   : > { %1290 = vrot.lane.b32.xlu0 %v4531_v17, %s4250_s23  ;;  %8429 = vst [vmem:[#allocation27_spill] sm:$0xff] %v4734_v19  ;;  %v4741_v23 = vadd.f32 %v617_v16, %v4477_v56 }
 0x111   : > { %v621_v32 = vpop.f32.mrf.mxu0 }
 0x112   : > { %1322 = vrot.lane.b32.xlu1 %v4535_v18, %s4250_s23  ;;  %8431 = vst [vmem:[#allocation29_spill] sm:$0xff] %v4741_v23  ;;  %v4772_v44 = vadd.f32 %v621_v32, %v4467_v51 }
 0x113   : > { %v623_v41 = vpop.f32.mrf.mxu0 }
 0x114   : > { %811 = vrot.lane.b32.xlu0 %v4547_v21, %s4248_s21  ;;  %8437 = vst [vmem:[#allocation35_spill] sm:$0xff] %v4772_v44  ;;  %v4779_v62 = vadd.f32 %v623_v41, %v4467_v51 }
 0x115   : > { %v627_v0 = vpop.f32.mrf.mxu0 }
 0x116   : > { %843 = vrot.lane.b32.xlu1 %v4551_v22, %s4248_s21  ;;  %8439 = vst [vmem:[#allocation37_spill] sm:$0xff] %v4779_v62 }
 0x118   : > { %652 = vrot.lane.b32.xlu0 %v4547_v21, %s4249_s22 }
 0x11a   : > { %684 = vrot.lane.b32.xlu1 %v4551_v22, %s4249_s22 }
 0x11c   : > { %1292 = vrot.lane.b32.xlu0 %v4547_v21, %s4250_s23 }
 0x11e   : > { %1324 = vrot.lane.b32.xlu1 %v4551_v22, %s4250_s23 }
 0x120   : > { %813 = vrot.lane.b32.xlu0 %v4563_v25, %s4248_s21 }
 0x122   : > { %845 = vrot.lane.b32.xlu1 %v4567_v26, %s4248_s21 }
 0x124   : > { %654 = vrot.lane.b32.xlu0 %v4563_v25, %s4249_s22 }
 0x126   : > { %686 = vrot.lane.b32.xlu1 %v4567_v26, %s4249_s22 }
 0x128   : > { %1294 = vrot.lane.b32.xlu0 %v4563_v25, %s4250_s23 }
 0x12a   : > { %1326 = vrot.lane.b32.xlu1 %v4567_v26, %s4250_s23 }
 0x12c   : > { %1646 = vrot.lane.b32.xlu0 %v4563_v25, %s4251_s24 }
 0x12e   : > { %1678 = vrot.lane.b32.xlu1 %v4567_v26, %s4251_s24 }
 0x130   : > { %815 = vrot.lane.b32.xlu0 %v4584_v29, %s4248_s21 }
 0x132   : > { %847 = vrot.lane.b32.xlu1 %v4589_v30, %s4248_s21 }
 0x134   : > { %656 = vrot.lane.b32.xlu0 %v4584_v29, %s4249_s22 }
 0x136   : > { %688 = vrot.lane.b32.xlu1 %v4589_v30, %s4249_s22 }
 0x138   : > { %1296 = vrot.lane.b32.xlu0 %v4584_v29, %s4250_s23 }
 0x13a   : > { %1328 = vrot.lane.b32.xlu1 %v4589_v30, %s4250_s23 }
 0x13c   : > { %1648 = vrot.lane.b32.xlu0 %v4584_v29, %s4251_s24 }
 0x13e   : > { %1680 = vrot.lane.b32.xlu1 %v4589_v30, %s4251_s24 }
 0x140   : > { %817 = vrot.lane.b32.xlu0 %v4606_v33, %s4248_s21 }
 0x142   : > { %849 = vrot.lane.b32.xlu1 %v4611_v34, %s4248_s21 }
 0x144   : > { %658 = vrot.lane.b32.xlu0 %v4606_v33, %s4249_s22 }
 0x146   : > { %690 = vrot.lane.b32.xlu1 %v4611_v34, %s4249_s22 }
 0x148   : > { %1298 = vrot.lane.b32.xlu0 %v4606_v33, %s4250_s23 }
 0x14a   : > { %1330 = vrot.lane.b32.xlu1 %v4611_v34, %s4250_s23 }
 0x14c   : > { %1650 = vrot.lane.b32.xlu0 %v4606_v33, %s4251_s24 }
 0x14e   : > { %1682 = vrot.lane.b32.xlu1 %v4611_v34, %s4251_s24 }
 0x150   : > { %819 = vrot.lane.b32.xlu0 %v4628_v37, %s4248_s21 }
 0x152   : > { %851 = vrot.lane.b32.xlu1 %v4633_v38, %s4248_s21 }
 0x154   : > { %660 = vrot.lane.b32.xlu0 %v4628_v37, %s4249_s22 }
 0x156   : > { %692 = vrot.lane.b32.xlu1 %v4633_v38, %s4249_s22  ;;  %v4643_v39 = vpop.permute.xlu0 %803 }
 0x158   : > { %v4645_v40 = vpop.permute.xlu1 %835  ;;  %1300 = vrot.lane.b32.xlu0 %v4628_v37, %s4250_s23 }
 0x15a   : > { %1332 = vrot.lane.b32.xlu1 %v4633_v38, %s4250_s23  ;;  %v4651_v42 = vpop.permute.xlu0 %644 }
 0x15b   : > { %8413 = vst [vmem:[#allocation11_spill] sm:$0xff] %v4651_v42 }
 0x15c   : > { %v4653_v43 = vpop.permute.xlu1 %676  ;;  %1652 = vrot.lane.b32.xlu0 %v4628_v37, %s4251_s24 }
 0x15d   : > { %8414 = vst [vmem:[#allocation12_spill] sm:$0xff] %v4653_v43 }
 0x15e   : > { %1684 = vrot.lane.b32.xlu1 %v4633_v38, %s4251_s24  ;;  %v4662_v46 = vpop.permute.xlu0 %1284 }
 0x15f   : > { %8416 = vst [vmem:[#allocation14_spill] sm:$0xff] %v4662_v46 }
 0x160   : > { %v4667_v48 = vpop.permute.xlu1 %1316  ;;  %821 = vrot.lane.b32.xlu0 %v4658_v45, %s4248_s21 }
 0x161   : > { %8418 = vst [vmem:[#allocation16_spill] sm:$0xff] %v4667_v48 }
 0x162   : > { %853 = vrot.lane.b32.xlu1 %v4665_v47, %s4248_s21  ;;  %v4673_v49 = vpop.permute.xlu0 %805 }
 0x164   : > { %v4675_v55 = vpop.permute.xlu1 %837  ;;  %662 = vrot.lane.b32.xlu0 %v4658_v45, %s4249_s22 }
 0x166   : > { %694 = vrot.lane.b32.xlu1 %v4665_v47, %s4249_s22  ;;  %v4681_v57 = vpop.permute.xlu0 %646 }
 0x167   : > { %8419 = vst [vmem:[#allocation17_spill] sm:$0xff] %v4681_v57 }
 0x168   : > { %v4683_v58 = vpop.permute.xlu1 %678  ;;  %1302 = vrot.lane.b32.xlu0 %v4658_v45, %s4250_s23 }
 0x169   : > { %8420 = vst [vmem:[#allocation18_spill] sm:$0xff] %v4683_v58 }
 0x16a   : > { %1334 = vrot.lane.b32.xlu1 %v4665_v47, %s4250_s23  ;;  %v4689_v60 = vpop.permute.xlu0 %1286 }
 0x16b   : > { %8421 = vst [vmem:[#allocation19_spill] sm:$0xff] %v4689_v60  ;;  %v629_v60 = vpop.f32.mrf.mxu0 }
 0x16c   : > { %v4691_v61 = vpop.permute.xlu1 %1318  ;;  %1654 = vrot.lane.b32.xlu0 %v4658_v45, %s4251_s24 }
 0x16d   : > { %8422 = vst [vmem:[#allocation20_spill] sm:$0xff] %v4691_v61  ;;  %v4810_v61 = vadd.f32 %v627_v0, %v4465_v50 }
 0x16e   : > { %1686 = vrot.lane.b32.xlu1 %v4665_v47, %s4251_s24  ;;  %v4700_v1 = vpop.permute.xlu0 %807 }
 0x16f   : > { %8445 = vst [vmem:[#allocation43_spill] sm:$0xff] %v4810_v61 }
 0x170   : > { %v4705_v5 = vpop.permute.xlu1 %839  ;;  %823 = vrot.lane.b32.xlu0 %v4696_v63, %s4248_s21 }
 0x172   : > { %855 = vrot.lane.b32.xlu1 %v4703_v3, %s4248_s21  ;;  %v4711_v6 = vpop.permute.xlu0 %648 }
 0x173   : > { %8425 = vst [vmem:[#allocation23_spill] sm:$0xff] %v4711_v6 }
 0x174   : > { %v4713_v7 = vpop.permute.xlu1 %680  ;;  %664 = vrot.lane.b32.xlu0 %v4696_v63, %s4249_s22 }
 0x175   : > { %8426 = vst [vmem:[#allocation24_spill] sm:$0xff] %v4713_v7 }
 0x176   : > { %696 = vrot.lane.b32.xlu1 %v4703_v3, %s4249_s22  ;;  %v4719_v53 = vpop.permute.xlu0 %1288 }
 0x177   : > { %8427 = vst [vmem:[#allocation25_spill] sm:$0xff] %v4719_v53 }
 0x178   : > { %v4721_v8 = vpop.permute.xlu1 %1320  ;;  %1304 = vrot.lane.b32.xlu0 %v4696_v63, %s4250_s23 }
 0x179   : > { %8428 = vst [vmem:[#allocation26_spill] sm:$0xff] %v4721_v8  ;;  %v4817_v8 = vadd.f32 %v629_v60, %v4465_v50 }
 0x17a   : > { %1336 = vrot.lane.b32.xlu1 %v4703_v3, %s4250_s23  ;;  %v4727_v12 = vpop.permute.xlu0 %809 }
 0x17b   : > { %8447 = vst [vmem:[#allocation45_spill] sm:$0xff] %v4817_v8 }
 0x17c   : > { %v4729_v15 = vpop.permute.xlu1 %841  ;;  %1656 = vrot.lane.b32.xlu0 %v4696_v63, %s4251_s24 }
 0x17e   : > { %1688 = vrot.lane.b32.xlu1 %v4703_v3, %s4251_s24  ;;  %v4738_v20 = vpop.permute.xlu0 %650 }
 0x17f   : > { %8430 = vst [vmem:[#allocation28_spill] sm:$0xff] %v4738_v20 }
 0x180   : > { %v4743_v24 = vpop.permute.xlu1 %682  ;;  %825 = vrot.lane.b32.xlu0 %v4734_v19, %s4248_s21 }
 0x181   : > { %8432 = vst [vmem:[#allocation30_spill] sm:$0xff] %v4743_v24 }
 0x182   : > { %857 = vrot.lane.b32.xlu1 %v4741_v23, %s4248_s21  ;;  %v4749_v27 = vpop.permute.xlu0 %1290 }
 0x183   : > { %8433 = vst [vmem:[#allocation31_spill] sm:$0xff] %v4749_v27 }
 0x184   : > { %v4751_v28 = vpop.permute.xlu1 %1322  ;;  %666 = vrot.lane.b32.xlu0 %v4734_v19, %s4249_s22 }
 0x185   : > { %8434 = vst [vmem:[#allocation32_spill] sm:$0xff] %v4751_v28 }
 0x186   : > { %698 = vrot.lane.b32.xlu1 %v4741_v23, %s4249_s22  ;;  %v4757_v56 = vpop.permute.xlu0 %811 }
 0x188   : > { %v4759_v31 = vpop.permute.xlu1 %843  ;;  %1306 = vrot.lane.b32.xlu0 %v4734_v19, %s4250_s23 }
 0x18a   : > { %1338 = vrot.lane.b32.xlu1 %v4741_v23, %s4250_s23  ;;  %v4765_v35 = vpop.permute.xlu0 %652 }
 0x18b   : > { %8435 = vst [vmem:[#allocation33_spill] sm:$0xff] %v4765_v35 }
 0x18c   : > { %v4767_v36 = vpop.permute.xlu1 %684  ;;  %1658 = vrot.lane.b32.xlu0 %v4734_v19, %s4251_s24 }
 0x18d   : > { %8436 = vst [vmem:[#allocation34_spill] sm:$0xff] %v4767_v36 }
 0x18e   : > { %1690 = vrot.lane.b32.xlu1 %v4741_v23, %s4251_s24  ;;  %v4776_v59 = vpop.permute.xlu0 %1292 }
 0x18f   : > { %8438 = vst [vmem:[#allocation36_spill] sm:$0xff] %v4776_v59 }
 0x190   : > { %v4781_v11 = vpop.permute.xlu1 %1324  ;;  %827 = vrot.lane.b32.xlu0 %v4772_v44, %s4248_s21 }
 0x191   : > { %8440 = vst [vmem:[#allocation38_spill] sm:$0xff] %v4781_v11 }
 0x192   : > { %859 = vrot.lane.b32.xlu1 %v4779_v62, %s4248_s21  ;;  %v4787_v16 = vpop.permute.xlu0 %813 }
 0x194   : > { %v4789_v32 = vpop.permute.xlu1 %845  ;;  %668 = vrot.lane.b32.xlu0 %v4772_v44, %s4249_s22 }
 0x196   : > { %700 = vrot.lane.b32.xlu1 %v4779_v62, %s4249_s22  ;;  %v4795_v51 = vpop.permute.xlu0 %654 }
 0x197   : > { %8441 = vst [vmem:[#allocation39_spill] sm:$0xff] %v4795_v51 }
 0x198   : > { %v4797_v41 = vpop.permute.xlu1 %686  ;;  %1308 = vrot.lane.b32.xlu0 %v4772_v44, %s4250_s23 }
 0x199   : > { %8442 = vst [vmem:[#allocation40_spill] sm:$0xff] %v4797_v41 }
 0x19a   : > { %1340 = vrot.lane.b32.xlu1 %v4779_v62, %s4250_s23  ;;  %v4803_v46 = vpop.permute.xlu0 %1294 }
 0x19b   : > { %8443 = vst [vmem:[#allocation41_spill] sm:$0xff] %v4803_v46 }
 0x19c   : > { %v4805_v48 = vpop.permute.xlu1 %1326  ;;  %1660 = vrot.lane.b32.xlu0 %v4772_v44, %s4251_s24 }
 0x19d   : > { %8444 = vst [vmem:[#allocation42_spill] sm:$0xff] %v4805_v48 }
 0x19e   : > { %1692 = vrot.lane.b32.xlu1 %v4779_v62, %s4251_s24  ;;  %v4814_v53 = vpop.permute.xlu0 %1646 }
 0x19f   : > { %8446 = vst [vmem:[#allocation44_spill] sm:$0xff] %v4814_v53  ;;  %v633_v53 = vpop.f32.mrf.mxu0 }
 0x1a0   : > { %v4819_v27 = vpop.permute.xlu1 %1678  ;;  %829 = vrot.lane.b32.xlu0 %v4810_v61, %s4248_s21  ;;  %v4848_v46 = vadd.f32 %v633_v53, %v4473_v54 }
 0x1a1   : > { %8448 = vst [vmem:[#allocation46_spill] sm:$0xff] %v4819_v27  ;;  %v635_v11 = vpop.f32.mrf.mxu0 }
 0x1a2   : > { %861 = vrot.lane.b32.xlu1 %v4817_v8, %s4248_s21  ;;  %v4825_v28 = vpop.permute.xlu0 %815  ;;  %8453 = vst [vmem:[#allocation51_spill] sm:$0xff] %v4848_v46  ;;  %v4855_v42 = vadd.f32 %v635_v11, %v4473_v54 }
 0x1a4   : > { %v4827_v0 = vpop.permute.xlu1 %847  ;;  %670 = vrot.lane.b32.xlu0 %v4810_v61, %s4249_s22  ;;  %8455 = vst [vmem:[#allocation53_spill] sm:$0xff] %v4855_v42 }
 0x1a6   : > { %702 = vrot.lane.b32.xlu1 %v4817_v8, %s4249_s22  ;;  %v4833_v50 = vpop.permute.xlu0 %656 }
 0x1a7   : > { %8449 = vst [vmem:[#allocation47_spill] sm:$0xff] %v4833_v50 }
 0x1a8   : > { %v4835_v60 = vpop.permute.xlu1 %688  ;;  %1310 = vrot.lane.b32.xlu0 %v4810_v61, %s4250_s23 }
 0x1a9   : > { %8450 = vst [vmem:[#allocation48_spill] sm:$0xff] %v4835_v60 }
 0x1aa   : > { %1342 = vrot.lane.b32.xlu1 %v4817_v8, %s4250_s23  ;;  %v4841_v27 = vpop.permute.xlu0 %1296 }
 0x1ab   : > { %8451 = vst [vmem:[#allocation49_spill] sm:$0xff] %v4841_v27 }
 0x1ac   : > { %v4843_v59 = vpop.permute.xlu1 %1328  ;;  %1662 = vrot.lane.b32.xlu0 %v4810_v61, %s4251_s24 }
 0x1ad   : > { %8452 = vst [vmem:[#allocation50_spill] sm:$0xff] %v4843_v59 }
 0x1ae   : > { %1694 = vrot.lane.b32.xlu1 %v4817_v8, %s4251_s24  ;;  %v4852_v48 = vpop.permute.xlu0 %1648 }
 0x1af   : > { %8454 = vst [vmem:[#allocation52_spill] sm:$0xff] %v4852_v48  ;;  %v639_v48 = vpop.f32.mrf.mxu0 }
 0x1b0   : > { %v4857_v43 = vpop.permute.xlu1 %1680  ;;  %831 = vrot.lane.b32.xlu0 %v4848_v46, %s4248_s21  ;;  %v4886_v58 = vadd.f32 %v639_v48, %v4469_v52 }
 0x1b1   : > { %8456 = vst [vmem:[#allocation54_spill] sm:$0xff] %v4857_v43  ;;  %v641_v57 = vpop.f32.mrf.mxu0 }
 0x1b2   : > { %863 = vrot.lane.b32.xlu1 %v4855_v42, %s4248_s21  ;;  %v4863_v27 = vpop.permute.xlu0 %817  ;;  %8461 = vst [vmem:[#allocation59_spill] sm:$0xff] %v4886_v58  ;;  %v4893_v7 = vadd.f32 %v641_v57, %v4469_v52 }
 0x1b4   : > { %v4865_v53 = vpop.permute.xlu1 %849  ;;  %672 = vrot.lane.b32.xlu0 %v4848_v46, %s4249_s22  ;;  %8463 = vst [vmem:[#allocation61_spill] sm:$0xff] %v4893_v7 }
 0x1b6   : > { %704 = vrot.lane.b32.xlu1 %v4855_v42, %s4249_s22  ;;  %v4871_v54 = vpop.permute.xlu0 %658 }
 0x1b7   : > { %8457 = vst [vmem:[#allocation55_spill] sm:$0xff] %v4871_v54 }
 0x1b8   : > { %v4873_v11 = vpop.permute.xlu1 %690  ;;  %1312 = vrot.lane.b32.xlu0 %v4848_v46, %s4250_s23 }
 0x1b9   : > { %8458 = vst [vmem:[#allocation56_spill] sm:$0xff] %v4873_v11 }
 0x1ba   : > { %1344 = vrot.lane.b32.xlu1 %v4855_v42, %s4250_s23  ;;  %v4879_v43 = vpop.permute.xlu0 %1298 }
 0x1bb   : > { %8459 = vst [vmem:[#allocation57_spill] sm:$0xff] %v4879_v43 }
 0x1bc   : > { %v4881_v59 = vpop.permute.xlu1 %1330  ;;  %1664 = vrot.lane.b32.xlu0 %v4848_v46, %s4251_s24 }
 0x1bd   : > { %8460 = vst [vmem:[#allocation58_spill] sm:$0xff] %v4881_v59 }
 0x1be   : > { %1696 = vrot.lane.b32.xlu1 %v4855_v42, %s4251_s24  ;;  %v4890_v6 = vpop.permute.xlu0 %1650 }
 0x1bf   : > { %8462 = vst [vmem:[#allocation60_spill] sm:$0xff] %v4890_v6 }
 0x1c0   : > { %v4895_v20 = vpop.permute.xlu1 %1682  ;;  %833 = vrot.lane.b32.xlu0 %v4886_v58, %s4248_s21 }
 0x1c1   : > { %8464 = vst [vmem:[#allocation62_spill] sm:$0xff] %v4895_v20 }
 0x1c2   : > { %865 = vrot.lane.b32.xlu1 %v4893_v7, %s4248_s21  ;;  %v4901_v43 = vpop.permute.xlu0 %819 }
 0x1c4   : > { %v4903_v48 = vpop.permute.xlu1 %851  ;;  %1644 = vrot.lane.b32.xlu0 %v4547_v21, %s4251_s24 }
 0x1c6   : > { %1676 = vrot.lane.b32.xlu1 %v4551_v22, %s4251_s24  ;;  %v4909_v52 = vpop.permute.xlu0 %660 }
 0x1c7   : > { %8465 = vst [vmem:[#allocation63_spill] sm:$0xff] %v4909_v52 }
 0x1c8   : > { %v4911_v57 = vpop.permute.xlu1 %692  ;;  %674 = vrot.lane.b32.xlu0 %v4886_v58, %s4249_s22 }
 0x1c9   : > { %8466 = vst [vmem:[#allocation64_spill] sm:$0xff] %v4911_v57 }
 0x1ca   : > { %1674 = vrot.lane.b32.xlu1 %v4535_v18, %s4251_s24  ;;  %v4917_v6 = vpop.permute.xlu0 %1300 }
 0x1cb   : > { %8467 = vst [vmem:[#allocation65_spill] sm:$0xff] %v4917_v6 }
 0x1cc   : > { %v4919_v20 = vpop.permute.xlu1 %1332  ;;  %1314 = vrot.lane.b32.xlu0 %v4886_v58, %s4250_s23 }
 0x1cd   : > { %8468 = vst [vmem:[#allocation66_spill] sm:$0xff] %v4919_v20 }
 0x1ce   : > { %1672 = vrot.lane.b32.xlu1 %v4519_v14, %s4251_s24  ;;  %v4925_v59 = vpop.permute.xlu0 %1652 }
 0x1cf   : > { %8469 = vst [vmem:[#allocation67_spill] sm:$0xff] %v4925_v59 }
 0x1d0   : > { %v4927_v24 = vpop.permute.xlu1 %1684  ;;  %1666 = vrot.lane.b32.xlu0 %v4886_v58, %s4251_s24 }
 0x1d1   : > { %8470 = vst [vmem:[#allocation68_spill] sm:$0xff] %v4927_v24 }
 0x1d2   : > { %1670 = vrot.lane.b32.xlu1 %v4503_v10, %s4251_s24  ;;  %v4933_v35 = vpop.permute.xlu0 %821 }
 0x1d4   : > { %v4935_v6 = vpop.permute.xlu1 %853  ;;  %1642 = vrot.lane.b32.xlu0 %v4531_v17, %s4251_s24 }
 0x1d6   : > { %706 = vrot.lane.b32.xlu1 %v4893_v7, %s4249_s22  ;;  %v4941_v20 = vpop.permute.xlu0 %662 }
 0x1d7   : > { %8471 = vst [vmem:[#allocation69_spill] sm:$0xff] %v4941_v20 }
 0x1d8   : > { %v4943_v59 = vpop.permute.xlu1 %694  ;;  %1640 = vrot.lane.b32.xlu0 %v4515_v13, %s4251_s24 }
 0x1d9   : > { %8472 = vst [vmem:[#allocation70_spill] sm:$0xff] %v4943_v59 }
 0x1da   : > { %1346 = vrot.lane.b32.xlu1 %v4893_v7, %s4250_s23  ;;  %v4949_v24 = vpop.permute.xlu0 %1302  ;;  %s4254_s23 = smov 112  }
 0x1db   : > { %8473 = vst [vmem:[#allocation71_spill] sm:$0xff] %v4949_v24 }
 0x1dc   : > { %v4951_v36 = vpop.permute.xlu1 %1334  ;;  %1638 = vrot.lane.b32.xlu0 %v4499_v9, %s4251_s24 }
 0x1dd   : > { %8474 = vst [vmem:[#allocation72_spill] sm:$0xff] %v4951_v36 }
 0x1de   : > { %1698 = vrot.lane.b32.xlu1 %v4893_v7, %s4251_s24  ;;  %v4957_v51 = vpop.permute.xlu0 %1654 }
 0x1df   : > { %8475 = vst [vmem:[#allocation73_spill] sm:$0xff] %v4957_v51 }
 0x1e0   : > { %v4959_v41 = vpop.permute.xlu1 %1686  ;;  %1636 = vrot.lane.b32.xlu0 %v4485_v2, %s4251_s24 }
 0x1e1   : > { %8476 = vst [vmem:[#allocation74_spill] sm:$0xff] %v4959_v41 }
 0x1e2   : > { %1668 = vrot.lane.b32.xlu1 %v4487_v4, %s4251_s24  ;;  %v4965_v50 = vpop.permute.xlu0 %823 }
 0x1e4   : > { %v4967_v24 = vpop.permute.xlu1 %855  ;;  %2228 = vrot.lane.b32.xlu0 %v4886_v58, %s4252_s25 }
 0x1e6   : > { %2260 = vrot.lane.b32.xlu1 %v4893_v7, %s4252_s25  ;;  %v4973_v51 = vpop.permute.xlu0 %664 }
 0x1e7   : > { %8477 = vst [vmem:[#allocation75_spill] sm:$0xff] %v4973_v51 }
 0x1e8   : > { %v4975_v41 = vpop.permute.xlu1 %696  ;;  %2226 = vrot.lane.b32.xlu0 %v4848_v46, %s4252_s25 }
 0x1e9   : > { %8478 = vst [vmem:[#allocation76_spill] sm:$0xff] %v4975_v41 }
 0x1ea   : > { %2258 = vrot.lane.b32.xlu1 %v4855_v42, %s4252_s25  ;;  %v4981_v36 = vpop.permute.xlu0 %1304 }
 0x1eb   : > { %8479 = vst [vmem:[#allocation77_spill] sm:$0xff] %v4981_v36 }
 0x1ec   : > { %v4983_v60 = vpop.permute.xlu1 %1336  ;;  %2580 = vrot.lane.b32.xlu0 %v4886_v58, %s4253_s26 }
 0x1ed   : > { %8480 = vst [vmem:[#allocation78_spill] sm:$0xff] %v4983_v60 }
 0x1ee   : > { %2612 = vrot.lane.b32.xlu1 %v4893_v7, %s4253_s26  ;;  %v4989_v4 = vpop.permute.xlu0 %1656 }
 0x1ef   : > { %8481 = vst [vmem:[#allocation79_spill] sm:$0xff] %v4989_v4 }
 0x1f0   : > { %v4991_v54 = vpop.permute.xlu1 %1688  ;;  %2224 = vrot.lane.b32.xlu0 %v4810_v61, %s4252_s25 }
 0x1f1   : > { %8482 = vst [vmem:[#allocation80_spill] sm:$0xff] %v4991_v54 }
 0x1f2   : > { %2256 = vrot.lane.b32.xlu1 %v4817_v8, %s4252_s25  ;;  %v4997_v36 = vpop.permute.xlu0 %825 }
 0x1f4   : > { %v4999_v60 = vpop.permute.xlu1 %857  ;;  %2578 = vrot.lane.b32.xlu0 %v4848_v46, %s4253_s26 }
 0x1f6   : > { %2610 = vrot.lane.b32.xlu1 %v4855_v42, %s4253_s26  ;;  %v5005_v7 = vpop.permute.xlu0 %666 }
 0x1f7   : > { %8483 = vst [vmem:[#allocation81_spill] sm:$0xff] %v5005_v7 }
 0x1f8   : > { %v5007_v4 = vpop.permute.xlu1 %698  ;;  %2222 = vrot.lane.b32.xlu0 %v4772_v44, %s4252_s25 }
 0x1fa   : > { %2254 = vrot.lane.b32.xlu1 %v4779_v62, %s4252_s25  ;;  %v5013_v54 = vpop.permute.xlu0 %1306 }
 0x1fb   : > { %8484 = vst [vmem:[#allocation82_spill] sm:$0xff] %v5013_v54 }
 0x1fc   : > { %v5015_v58 = vpop.permute.xlu1 %1338  ;;  %2576 = vrot.lane.b32.xlu0 %v4810_v61, %s4253_s26 }
 0x1fd   : > { %8485 = vst [vmem:[#allocation83_spill] sm:$0xff] %v5015_v58 }
 0x1fe   : > { %2608 = vrot.lane.b32.xlu1 %v4817_v8, %s4253_s26  ;;  %v5021_v42 = vpop.permute.xlu0 %1658 }
 0x1ff   : > { %8486 = vst [vmem:[#allocation84_spill] sm:$0xff] %v5021_v42 }
 0x200   : > { %v5023_v46 = vpop.permute.xlu1 %1690  ;;  %2220 = vrot.lane.b32.xlu0 %v4734_v19, %s4252_s25 }
 0x201   : > { %8487 = vst [vmem:[#allocation85_spill] sm:$0xff] %v5023_v46 }
 0x202   : > { %2252 = vrot.lane.b32.xlu1 %v4741_v23, %s4252_s25  ;;  %v5029_v11 = vpop.permute.xlu0 %827 }
 0x204   : > { %v5031_v54 = vpop.permute.xlu1 %859  ;;  %2574 = vrot.lane.b32.xlu0 %v4772_v44, %s4253_s26 }
 0x206   : > { %2606 = vrot.lane.b32.xlu1 %v4779_v62, %s4253_s26  ;;  %v5037_v8 = vpop.permute.xlu0 %668 }
 0x208   : > { %v5039_v42 = vpop.permute.xlu1 %700  ;;  %2218 = vrot.lane.b32.xlu0 %v4696_v63, %s4252_s25 }
 0x20a   : > { %2250 = vrot.lane.b32.xlu1 %v4703_v3, %s4252_s25  ;;  %v5045_v46 = vpop.permute.xlu0 %1308 }
 0x20b   : > { %8488 = vst [vmem:[#allocation86_spill] sm:$0xff] %v5045_v46 }
 0x20c   : > { %v5047_v61 = vpop.permute.xlu1 %1340  ;;  %2572 = vrot.lane.b32.xlu0 %v4734_v19, %s4253_s26 }
 0x20d   : > { %8489 = vst [vmem:[#allocation87_spill] sm:$0xff] %v5047_v61 }
 0x20e   : > { %2604 = vrot.lane.b32.xlu1 %v4741_v23, %s4253_s26  ;;  %v5053_v62 = vpop.permute.xlu0 %1660 }
 0x20f   : > { %8490 = vst [vmem:[#allocation88_spill] sm:$0xff] %v5053_v62 }
 0x210   : > { %v5055_v44 = vpop.permute.xlu1 %1692  ;;  %2216 = vrot.lane.b32.xlu0 %v4658_v45, %s4252_s25 }
 0x211   : > { %8491 = vst [vmem:[#allocation89_spill] sm:$0xff] %v5055_v44 }
 0x212   : > { %2248 = vrot.lane.b32.xlu1 %v4665_v47, %s4252_s25  ;;  %v830_v58 = vpop.permute.xlu0 %829 }
 0x214   : > { %v862_v46 = vpop.permute.xlu1 %861  ;;  %2570 = vrot.lane.b32.xlu0 %v4696_v63, %s4253_s26 }
 0x216   : > { %2602 = vrot.lane.b32.xlu1 %v4703_v3, %s4253_s26  ;;  %v5065_v19 = vpop.permute.xlu0 %670 }
 0x218   : > { %v5067_v23 = vpop.permute.xlu1 %702  ;;  %2214 = vrot.lane.b32.xlu0 %v4628_v37, %s4252_s25 }
 0x21a   : > { %2246 = vrot.lane.b32.xlu1 %v4633_v38, %s4252_s25  ;;  %v5073_v62 = vpop.permute.xlu0 %1310 }
 0x21b   : > { %8492 = vst [vmem:[#allocation90_spill] sm:$0xff] %v5073_v62 }
 0x21c   : > { %v5075_v44 = vpop.permute.xlu1 %1342  ;;  %2568 = vrot.lane.b32.xlu0 %v4658_v45, %s4253_s26 }
 0x21d   : > { %8493 = vst [vmem:[#allocation91_spill] sm:$0xff] %v5075_v44 }
 0x21e   : > { %2600 = vrot.lane.b32.xlu1 %v4665_v47, %s4253_s26  ;;  %v5081_v3 = vpop.permute.xlu0 %1662  ;;  %v708_v47 = vlaneseq }
 0x21f   : > { %8494 = vst [vmem:[#allocation92_spill] sm:$0xff] %v5081_v3 }
 0x220   : > { %v5083_v63 = vpop.permute.xlu1 %1694  ;;  %2212 = vrot.lane.b32.xlu0 %v4606_v33, %s4252_s25  ;;  %v746_v44 = vshrl.u32 %v708_v47, 7 }
 0x221   : > { %8495 = vst [vmem:[#allocation93_spill] sm:$0xff] %v5083_v63 }
 0x222   : > { %2244 = vrot.lane.b32.xlu1 %v4611_v34, %s4252_s25  ;;  %v832_v61 = vpop.permute.xlu0 %831  ;;  %v5113_v52 = vsub.s32 0, %v746_v44 }
 0x224   : > { %v864_v62 = vpop.permute.xlu1 %863  ;;  %2566 = vrot.lane.b32.xlu0 %v4628_v37, %s4253_s26  ;;  %v5111_v37 = vand.u32 127, %v708_v47 }
 0x226   : > { %2598 = vrot.lane.b32.xlu1 %v4633_v38, %s4253_s26  ;;  %v5093_v45 = vpop.permute.xlu0 %672  ;;  %vm867_vm1 = vcmp.lt.s32.totalorder %v5111_v37, 16  ;;  %vm710_vm2 = vcmp.lt.s32.totalorder %v5111_v37, 17  ;;  %vm1348_vm3 = vcmp.lt.s32.totalorder %v5111_v37, 15  ;;  %vm1700_vm4 = vcmp.lt.s32.totalorder %v5111_v37, 1 }
 0x227   : > { %v898_v59 = vsel %vm867_vm1, %v864_v62, %v832_v61  ;;  %v881_v41 = vsel %vm867_vm1, %v830_v58, %v862_v46  ;;  %v897_v10 = vsel %vm867_vm1, %v862_v46, %v830_v58  ;;  %v896_v46 = vsel %vm867_vm1, %v5031_v54, %v5029_v11 }
 0x228   : > { %v5095_v3 = vpop.permute.xlu1 %704  ;;  %2210 = vrot.lane.b32.xlu0 %v4584_v29, %s4252_s25  ;;  %vm2262_vm5 = vcmp.lt.s32.totalorder %v5111_v37, 127  ;;  %vm2614_vm6 = vcmp.lt.s32.totalorder %v5111_v37, 113  ;;  %vm3318_vm7 = vcmp.lt.s32.totalorder %v5111_v37, 111  ;;  %vm2966_vm8 = vcmp.lt.s32.totalorder %v5111_v37, 112 }
 0x22a   : > { %2242 = vrot.lane.b32.xlu1 %v4589_v30, %s4252_s25  ;;  %v5101_v63 = vpop.permute.xlu0 %1312 }
 0x22b   : > { %8496 = vst [vmem:[#allocation94_spill] sm:$0xff] %v5101_v63  ;;  %v5119_v63 = vsub.s32 1, %v746_v44 }
 0x22c   : > { %v5103_v2 = vpop.permute.xlu1 %1344  ;;  %2564 = vrot.lane.b32.xlu0 %v4606_v33, %s4253_s26  ;;  %v4031_v33 = vld [vmem:[%s8250_s1 + $0x1] ss:$8 sm:$0x3] }
 0x22d   : > { %8497 = vst [vmem:[#allocation95_spill] sm:$0xff] %v5103_v2  ;;  %v5133_v44 = vrot.slane %v4031_v33, %v5113_v52 }
 0x22e   : > { %2596 = vrot.lane.b32.xlu1 %v4611_v34, %s4253_s26  ;;  %v5109_v38 = vpop.permute.xlu0 %1664 }
 0x22f   : > { %8498 = vst [vmem:[#allocation96_spill] sm:$0xff] %v5109_v38  ;;  %v5130_v38 = vrot.slane %v4031_v33, %v5119_v63 }
 0x230   : > { %v5115_v57 = vpop.permute.xlu1 %1696  ;;  %2208 = vrot.lane.b32.xlu0 %v4563_v25, %s4252_s25 }
 0x231   : > { %8499 = vst [vmem:[#allocation97_spill] sm:$0xff] %v5115_v57  ;;  %v882_v57 = vsel %vm867_vm1, %v832_v61, %v864_v62  ;;  %v941_v61 = vmul.f32 %v5133_v44, %v898_v59  ;;  %v879_v62 = vsel %vm867_vm1, %v4997_v36, %v4999_v60  ;;  %v939_v59 = vmul.f32 %v5133_v44, %v897_v10 }
 0x232   : > { %2240 = vrot.lane.b32.xlu1 %v4567_v26, %s4252_s25  ;;  %v834_v34 = vpop.permute.xlu0 %833  ;;  %v937_v10 = vmul.f32 %v5133_v44, %v896_v46 }
 0x234   : > { %v866_v47 = vpop.permute.xlu1 %865  ;;  %2562 = vrot.lane.b32.xlu0 %v4584_v29, %s4253_s26 }
 0x235   : > { %v883_v2 = vsel %vm867_vm1, %v834_v34, %v866_v47  ;;  %v899_v20 = vsel %vm867_vm1, %v866_v47, %v834_v34  ;;  %v942_v34 = vmul.f32 %v5130_v38, %v882_v57  ;;  %v936_v57 = vmul.f32 %v5130_v38, %v879_v62 }
 0x236   : > { %2594 = vrot.lane.b32.xlu1 %v4589_v30, %s4253_s26  ;;  %v5145_v29 = vpop.permute.xlu0 %1644  ;;  %v944_v33 = vmul.f32 %v5130_v38, %v883_v2  ;;  %v943_v51 = vmul.f32 %v5133_v44, %v899_v20  ;;  %v880_v2 = vsel %vm867_vm1, %v5029_v11, %v5031_v54  ;;  %v940_v20 = vmul.f32 %v5130_v38, %v881_v41 }
 0x237   : > { %v938_v41 = vmul.f32 %v5130_v38, %v880_v2  ;;  %v878_v11 = vsel %vm867_vm1, %v4965_v50, %v4967_v24  ;;  %v877_v47 = vsel %vm867_vm1, %v4933_v35, %v4935_v6  ;;  %v876_v2 = vsel %vm867_vm1, %v4901_v43, %v4903_v48 }
 0x238   : > { %v5153_v7 = vpop.permute.xlu1 %1676  ;;  %2206 = vrot.lane.b32.xlu0 %v4547_v21, %s4252_s25  ;;  %962 = vmatprep.subr.mxu1 %v944_v33  ;;  %v932_v46 = vmul.f32 %v5130_v38, %v877_v47 }
 0x239   : > { %963 = vmatpush1.msra.mxu1 %v943_v51  ;;  %v895_v51 = vsel %vm867_vm1, %v4999_v60, %v4997_v36  ;;  %v894_v36 = vsel %vm867_vm1, %v4967_v24, %v4965_v50  ;;  %v893_v24 = vsel %vm867_vm1, %v4935_v6, %v4933_v35  ;;  %v892_v6 = vsel %vm867_vm1, %v4903_v48, %v4901_v43  ;;  %v743_v43 = vld [vmem:[%s8250_s1] ss:$8 sm:$0x3] }
 0x23a   : > { %2238 = vrot.lane.b32.xlu1 %v4551_v22, %s4252_s25  ;;  %964 = vmatprep.subr.mxu1 %v942_v34  ;;  %v5169_v58 = vpop.permute.xlu0 %674  ;;  %v935_v33 = vmul.f32 %v5133_v44, %v895_v51  ;;  %v934_v34 = vmul.f32 %v5130_v38, %v878_v11  ;;  %v931_v62 = vmul.f32 %v5133_v44, %v893_v24 }
 0x23b   : > { %965 = vmatpush1.msra.mxu1 %v941_v61  ;;  %v933_v61 = vmul.f32 %v5133_v44, %v894_v36  ;;  %v891_v48 = vsel %vm867_vm1, %v4865_v53, %v4863_v27  ;;  %v930_v51 = vmul.f32 %v5130_v38, %v876_v2  ;;  %v929_v11 = vmul.f32 %v5133_v44, %v892_v6 }
 0x23c   : > { %v5181_v54 = vpop.permute.xlu1 %1674  ;;  %2560 = vrot.lane.b32.xlu0 %v4563_v25, %s4253_s26  ;;  %966 = vmatprep.subr.mxu1 %v940_v20  ;;  %v875_v20 = vsel %vm867_vm1, %v4863_v27, %v4865_v53  ;;  %v873_v27 = vsel %vm867_vm1, %v4787_v16, %v4789_v32  ;;  %v890_v53 = vsel %vm867_vm1, %v4827_v0, %v4825_v28 }
 0x23d   : > { %967 = vmatpush1.msra.mxu1 %v939_v59  ;;  %v928_v36 = vmul.f32 %v5130_v38, %v875_v20  ;;  %v5270_v47 = vrot.slane %v743_v43, %v5113_v52  ;;  %v889_v24 = vsel %vm867_vm1, %v4789_v32, %v4787_v16  ;;  %v924_v16 = vmul.f32 %v5130_v38, %v873_v27 }
 0x23e   : > { %2592 = vrot.lane.b32.xlu1 %v4567_v26, %s4253_s26  ;;  %968 = vmatprep.subr.mxu1 %v938_v41  ;;  %v5197_v60 = vpop.permute.xlu0 %1314  ;;  %v874_v41 = vsel %vm867_vm1, %v4825_v28, %v4827_v0  ;;  %v927_v28 = vmul.f32 %v5133_v44, %v891_v48  ;;  %v5274_v0 = vrot.slane %v743_v43, %v5119_v63 }
 0x23f   : > { %969 = vmatpush1.msra.mxu1 %v937_v10  ;;  %v926_v2 = vmul.f32 %v5130_v38, %v874_v41  ;;  %v725_v32 = vsel %vm710_vm2, %v5093_v45, %v5095_v3  ;;  %v5310_v43 = vsel %vm867_vm1, %v4645_v40, %v4643_v39  ;;  %v888_v48 = vsel %vm867_vm1, %v4759_v31, %v4757_v56 }
 0x240   : > { %v5209_v50 = vpop.permute.xlu1 %1672  ;;  %2204 = vrot.lane.b32.xlu0 %v4531_v17, %s4252_s25  ;;  %970 = vmatprep.subr.mxu1 %v936_v57  ;;  %v5267_v57 = vsel %vm867_vm1, %v4643_v39, %v4645_v40  ;;  %v923_v41 = vmul.f32 %v5133_v44, %v889_v24  ;;  %v871_v39 = vsel %vm867_vm1, %v4727_v12, %v4729_v15  ;;  %v4048_v24 = vld [vmem:[%s8250_s1 + $0x2] ss:$8 sm:$0x3] }
 0x241   : > { %971 = vmatpush1.msra.mxu1 %v935_v33  ;;  %v872_v33 = vsel %vm867_vm1, %v4757_v56, %v4759_v31  ;;  %v887_v40 = vsel %vm867_vm1, %v4729_v15, %v4727_v12  ;;  %v784_v31 = vmul.f32 %v5274_v0, %v725_v32  ;;  %v740_v12 = vsel %vm710_vm2, %v5067_v23, %v5065_v19  ;;  %v8501_v32 = vld [vmem:[#allocation5_spill] sm:$0xff] }
 0x242   : > { %2236 = vrot.lane.b32.xlu1 %v4535_v18, %s4252_s25  ;;  %972 = vmatprep.subr.mxu1 %v934_v34  ;;  %v5225_v35 = vpop.permute.xlu0 %1666 }
 0x243   : > { %973 = vmatpush1.msra.mxu1 %v933_v61 }
 0x244   : > { %v5240_v59 = vpop.permute.xlu1 %1670  ;;  %2558 = vrot.lane.b32.xlu0 %v4547_v21, %s4253_s26  ;;  %974 = vmatprep.subr.mxu1 %v932_v46  ;;  %v925_v46 = vmul.f32 %v5133_v44, %v890_v53  ;;  %v921_v53 = vmul.f32 %v5133_v44, %v888_v48  ;;  %v8503_v48 = vld [vmem:[#allocation75_spill] sm:$0xff] }
 0x245   : > { %975 = vmatpush1.msra.mxu1 %v931_v62 }
 0x246   : > { %2590 = vrot.lane.b32.xlu1 %v4551_v22, %s4253_s26  ;;  %976 = vmatprep.subr.mxu1 %v930_v51  ;;  %v5260_v10 = vpop.permute.xlu0 %1642  ;;  %v741_v51 = vsel %vm710_vm2, %v5095_v3, %v5093_v45  ;;  %v724_v45 = vsel %vm710_vm2, %v5065_v19, %v5067_v23  ;;  %v922_v3 = vmul.f32 %v5130_v38, %v872_v33 }
 0x247   : > { %977 = vmatpush1.msra.mxu1 %v929_v11  ;;  %v870_v11 = vsel %vm867_vm1, %v4700_v1, %v4705_v5  ;;  %v783_v15 = vmul.f32 %v5270_v47, %v741_v51  ;;  %v723_v19 = vsel %vm710_vm2, %v5037_v8, %v5039_v42  ;;  %v920_v23 = vmul.f32 %v5130_v38, %v871_v39 }
 0x248   : > { %v707_v34 = vpop.permute.xlu1 %706  ;;  %2202 = vrot.lane.b32.xlu0 %v4515_v13, %s4252_s25  ;;  %978 = vmatprep.subr.mxu1 %v928_v36  ;;  %v886_v36 = vsel %vm867_vm1, %v4705_v5, %v4700_v1  ;;  %v782_v1 = vmul.f32 %v5274_v0, %v724_v45  ;;  %v919_v5 = vmul.f32 %v5133_v44, %v887_v40 }
 0x249   : > { %v726_v61 = vsel %vm710_vm2, %v5169_v58, %v707_v34  ;;  %v742_v6 = vsel %vm710_vm2, %v707_v34, %v5169_v58  ;;  %979 = vmatpush1.msra.mxu1 %v927_v28  ;;  %v739_v28 = vsel %vm710_vm2, %v5039_v42, %v5037_v8  ;;  %v869_v34 = vsel %vm867_vm1, %v4673_v49, %v4675_v55 }
 0x24a   : > { %v785_v20 = vmul.f32 %v5270_v47, %v742_v6  ;;  %2234 = vrot.lane.b32.xlu1 %v4519_v14, %s4252_s25  ;;  %980 = vmatprep.subr.mxu1 %v926_v2  ;;  %v5303_v62 = vpop.permute.xlu0 %1640  ;;  %v786_v58 = vmul.f32 %v5274_v0, %v726_v61  ;;  %v885_v42 = vsel %vm867_vm1, %v4675_v55, %v4673_v49  ;;  %v8500_v2 = vld [vmem:[#allocation81_spill] sm:$0xff] }
 0x24b   : > { %981 = vmatpush1.msra.mxu1 %v925_v46  ;;  %v781_v8 = vmul.f32 %v5270_v47, %v740_v12  ;;  %v722_v61 = vsel %vm710_vm2, %v8500_v2, %v5007_v4  ;;  %v918_v6 = vmul.f32 %v5130_v38, %v870_v11  ;;  %v780_v46 = vmul.f32 %v5274_v0, %v723_v19 }
 0x24c   : > { %v5333_v56 = vpop.permute.xlu1 %1346  ;;  %2556 = vrot.lane.b32.xlu0 %v4531_v17, %s4253_s26  ;;  %982 = vmatprep.subr.mxu1 %v924_v16  ;;  %v738_v49 = vsel %vm710_vm2, %v5007_v4, %v8500_v2  ;;  %v779_v55 = vmul.f32 %v5270_v47, %v739_v28  ;;  %v916_v11 = vmul.f32 %v5130_v38, %v869_v34  ;;  %v8506_v34 = vld [vmem:[#allocation64_spill] sm:$0xff]  ;;  %v8509_v2 = vld [vmem:[#allocation94_spill] sm:$0xff] }
 0x24d   : > { %1123 = vmatprep.subr.mxu0 %v786_v58  ;;  %983 = vmatpush1.msra.mxu1 %v923_v41  ;;  %v8502_v58 = vld [vmem:[#allocation76_spill] sm:$0xff]  ;;  %v5408_v4 = vrot.slane %v4048_v24, %v5119_v63  ;;  %v778_v40 = vmul.f32 %v5274_v0, %v722_v61  ;;  %v915_v45 = vmul.f32 %v5133_v44, %v885_v42  ;;  %v8507_v42 = vld [vmem:[#allocation63_spill] sm:$0xff] }
 0x24e   : > { %1124 = vmatpush1.msra.mxu0 %v785_v20  ;;  %2588 = vrot.lane.b32.xlu1 %v4535_v18, %s4253_s26  ;;  %v5350_v27 = vpop.permute.xlu0 %1638  ;;  %v917_v20 = vmul.f32 %v5133_v44, %v886_v36  ;;  %v721_v51 = vsel %vm710_vm2, %v8503_v48, %v8502_v58  ;;  %v737_v39 = vsel %vm710_vm2, %v8502_v58, %v8503_v48  ;;  %v8505_v36 = vld [vmem:[#allocation69_spill] sm:$0xff]  ;;  %v8510_v58 = vld [vmem:[#allocation2_spill] sm:$0xff]  ;;  %v8511_v48 = vld [vmem:[#allocation56_spill] sm:$0xff] }
 0x24f   : > { %984 = vmatprep.subr.mxu1 %v922_v3  ;;  %1125 = vmatprep.subr.mxu0 %v784_v31  ;;  %v777_v3 = vmul.f32 %v5270_v47, %v738_v49  ;;  %v914_v31 = vmul.f32 %v5130_v38, %v5267_v57  ;;  %v776_v28 = vmul.f32 %v5274_v0, %v721_v51  ;;  %v8512_v51 = vld [vmem:[#allocation55_spill] sm:$0xff] }
 0x250   : > { %985 = vmatpush1.msra.mxu1 %v921_v53  ;;  %1126 = vmatpush1.msra.mxu0 %v783_v15  ;;  %v5366_v33 = vpop.permute.xlu1 %1698  ;;  %v913_v15 = vmul.f32 %v5133_v44, %v5310_v43  ;;  %v8504_v53 = vld [vmem:[#allocation70_spill] sm:$0xff]  ;;  %v775_v44 = vmul.f32 %v5270_v47, %v737_v39  ;;  %v1380_v57 = vsel %vm1348_vm3, %v5333_v56, %v5197_v60 }
 0x251   : > { %2200 = vrot.lane.b32.xlu0 %v4499_v9, %s4252_s25  ;;  %986 = vmatprep.subr.mxu1 %v920_v23  ;;  %v720_v19 = vsel %vm710_vm2, %v8505_v36, %v8504_v53  ;;  %v1364_v23 = vsel %vm1348_vm3, %v5197_v60, %v5333_v56  ;;  %v736_v38 = vsel %vm710_vm2, %v8504_v53, %v8505_v36  ;;  %v8508_v56 = vld [vmem:[#allocation95_spill] sm:$0xff] }
 0x252   : > { %1127 = vmatprep.subr.mxu0 %v782_v1  ;;  %987 = vmatpush1.msra.mxu1 %v919_v5  ;;  %v5390_v16 = vpop.permute.xlu0 %1636  ;;  %v4032_v1 = vld [vmem:[%s8253_s4 + $0x80] sm:$0xff]  ;;  %v5452_v5 = vrot.slane %v4048_v24, %v5113_v52  ;;  %v735_v60 = vsel %vm710_vm2, %v8506_v34, %v8507_v42  ;;  %v1363_v61 = vsel %vm1348_vm3, %v8509_v2, %v8508_v56 }
 0x253   : > { %1128 = vmatpush1.msra.mxu0 %v781_v8  ;;  %2232 = vrot.lane.b32.xlu1 %v8501_v32, %s4252_s25  ;;  %v719_v8 = vsel %vm710_vm2, %v8507_v42, %v8506_v34  ;;  %v774_v24 = vmul.f32 %v5274_v0, %v720_v19  ;;  %v773_v49 = vmul.f32 %v5270_v47, %v736_v38  ;;  %v4033_v38 = vld [vmem:[%s8253_s4 + $0x88] sm:$0xff] }
 0x254   : > { %988 = vmatprep.subr.mxu1 %v918_v6  ;;  %1129 = vmatprep.subr.mxu0 %v780_v46  ;;  %v5404_v41 = vpop.permute.xlu1 %1668  ;;  %v1425_v6 = vmul.f32 %v5408_v4, %v1364_v23  ;;  %v772_v39 = vmul.f32 %v5274_v0, %v719_v8  ;;  %v1423_v53 = vmul.f32 %v5408_v4, %v1363_v61  ;;  %v8519_v8 = vmov 0.0  }
 0x255   : > { %989 = vmatpush1.msra.mxu1 %v917_v20  ;;  %1130 = vmatpush1.msra.mxu0 %v779_v55  ;;  %v1379_v55 = vsel %vm1348_vm3, %v8508_v56, %v8509_v2  ;;  %v1424_v20 = vmul.f32 %v5452_v5, %v1380_v57  ;;  %v771_v36 = vmul.f32 %v5270_v47, %v735_v60  ;;  %v8517_v57 = vld [vmem:[#allocation48_spill] sm:$0xff]  ;;  %v8520_v60 = vld [vmem:[#allocation87_spill] sm:$0xff]  ;;  %v8521_v56 = vld [vmem:[#allocation86_spill] sm:$0xff] }
 0x256   : > { %2554 = vrot.lane.b32.xlu0 %v4515_v13, %s4253_s26  ;;  %990 = vmatprep.subr.mxu1 %v916_v11  ;;  %v5422_v12 = vpop.permute.xlu0 %2228  ;;  %v718_v11 = vsel %vm710_vm2, %v8512_v51, %v8511_v48  ;;  %v1422_v23 = vmul.f32 %v5452_v5, %v1379_v55  ;;  %v1361_v2 = vsel %vm1348_vm3, %v8521_v56, %v8520_v60 }
 0x257   : > { %1131 = vmatprep.subr.mxu0 %v778_v40  ;;  %991 = vmatpush1.msra.mxu1 %v915_v45  ;;  %v734_v45 = vsel %vm710_vm2, %v8511_v48, %v8512_v51  ;;  %v770_v61 = vmul.f32 %v5274_v0, %v718_v11  ;;  %v1377_v55 = vsel %vm1348_vm3, %v8520_v60, %v8521_v56  ;;  %v8523_v48 = vld [vmem:[#allocation40_spill] sm:$0xff]  ;;  %v8524_v51 = vld [vmem:[#allocation39_spill] sm:$0xff]  ;;  %v8528_v60 = vld [vmem:[#allocation33_spill] sm:$0xff] }
 0x258   : > { %1132 = vmatpush1.msra.mxu0 %v777_v3  ;;  %2586 = vrot.lane.b32.xlu1 %v4519_v14, %s4253_s26  ;;  %v5446_v43 = vpop.permute.xlu1 %2260  ;;  %v8513_v3 = vld [vmem:[#allocation91_spill] sm:$0xff]  ;;  %v716_v11 = vsel %vm710_vm2, %v8524_v51, %v8523_v48 }
 0x259   : > { %992 = vmatprep.subr.mxu1 %v914_v31  ;;  %1133 = vmatprep.subr.mxu0 %v776_v28  ;;  %v8514_v31 = vld [vmem:[#allocation90_spill] sm:$0xff]  ;;  %v8515_v28 = vld [vmem:[#allocation3_spill] sm:$0xff] }
 0x25a   : > { %993 = vmatpush1.msra.mxu1 %v913_v15  ;;  %1134 = vmatpush1.msra.mxu0 %v775_v44  ;;  %v5468_v46 = vpop.permute.xlu0 %2226  ;;  %v1362_v15 = vsel %vm1348_vm3, %v8514_v31, %v8513_v3  ;;  %v1378_v19 = vsel %vm1348_vm3, %v8513_v3, %v8514_v31  ;;  %v732_v3 = vsel %vm710_vm2, %v8523_v48, %v8524_v51  ;;  %v8525_v31 = vld [vmem:[#allocation83_spill] sm:$0xff] }
 0x25b   : > { %2198 = vrot.lane.b32.xlu0 %v8510_v58, %s4252_s25  ;;  %1027 = vmatmul.mubr.f32.vlgmr.msra.gmra.mxu1 %v4032_v1  ;;  %v8518_v1 = vld [vmem:[#allocation47_spill] sm:$0xff]  ;;  %v765_v48 = vmul.f32 %v5270_v47, %v732_v3 }
 0x25c   : > { %1135 = vmatprep.subr.mxu0 %v774_v24  ;;  %1443 = vmatprep.subr.mxu1 %v1425_v6  ;;  %v5483_v40 = vpop.permute.xlu1 %2258  ;;  %v717_v34 = vsel %vm710_vm2, %v8518_v1, %v8517_v57  ;;  %v733_v42 = vsel %vm710_vm2, %v8517_v57, %v8518_v1  ;;  %v1421_v24 = vmul.f32 %v5408_v4, %v1362_v15  ;;  %v8526_v15 = vld [vmem:[#allocation82_spill] sm:$0xff]  ;;  %v4034_v57 = vld [vmem:[%s8253_s4 + $0x90] sm:$0xff] }
 0x25d   : > { %1136 = vmatpush1.msra.mxu0 %v773_v49  ;;  %1444 = vmatpush1.msra.mxu1 %v1424_v20  ;;  %v769_v49 = vmul.f32 %v5270_v47, %v734_v45  ;;  %v1420_v20 = vmul.f32 %v5452_v5, %v1378_v19  ;;  %v767_v19 = vmul.f32 %v5270_v47, %v733_v42 }
 0x25e   : > { %2230 = vrot.lane.b32.xlu1 %v8515_v28, %s4252_s25  ;;  %1137 = vmatprep.subr.mxu0 %v772_v39  ;;  %v5505_v44 = vpop.permute.xlu0 %2580  ;;  %v768_v39 = vmul.f32 %v5274_v0, %v717_v34  ;;  %v8527_v34 = vld [vmem:[#allocation34_spill] sm:$0xff] }
 0x25f   : > { %8516 = vst [vmem:[#allocation81_spill] sm:$0xff] %v5505_v44  ;;  %1445 = vmatprep.subr.mxu1 %v1423_v53  ;;  %1032 = vmatprep.mubr.f32.mxu1 %v8519_v8  ;;  %v1360_v53 = vsel %vm1348_vm3, %v8526_v15, %v8525_v31  ;;  %v715_v42 = vsel %vm710_vm2, %v8528_v60, %v8527_v34 }
 0x260   : > { %1138 = vmatpush1.msra.mxu0 %v771_v36  ;;  %1446 = vmatpush1.msra.mxu1 %v1422_v23  ;;  %v5522_v6 = vpop.permute.xlu1 %2612  ;;  %v1419_v36 = vmul.f32 %v5408_v4, %v1361_v2  ;;  %v1376_v23 = vsel %vm1348_vm3, %v8525_v31, %v8526_v15  ;;  %v731_v56 = vsel %vm710_vm2, %v8527_v34, %v8528_v60  ;;  %v8529_v2 = vld [vmem:[#allocation78_spill] sm:$0xff]  ;;  %v8533_v15 = vld [vmem:[#allocation28_spill] sm:$0xff] }
 0x261   : > { %8522 = vst [vmem:[#allocation76_spill] sm:$0xff] %v5522_v6  ;;  %2552 = vrot.lane.b32.xlu0 %v4499_v9, %s4253_s26  ;;  %1033 = vmatmul.mubr.f32.gmra.mxu1 %v4033_v38  ;;  %v1418_v38 = vmul.f32 %v5452_v5, %v1377_v55  ;;  %v1417_v55 = vmul.f32 %v5408_v4, %v1360_v53  ;;  %v8532_v31 = vld [vmem:[#allocation30_spill] sm:$0xff]  ;;  %v8572_v6 = vld [vmem:[#allocation43_spill] sm:$0xff] }
 0x262   : > { %1139 = vmatprep.subr.mxu0 %v770_v61  ;;  %1447 = vmatprep.subr.mxu1 %v1421_v24  ;;  %v5537_v45 = vpop.permute.xlu0 %2224  ;;  %v8530_v61 = vld [vmem:[#allocation77_spill] sm:$0xff]  ;;  %v764_v3 = vmul.f32 %v5274_v0, %v715_v42  ;;  %v763_v34 = vmul.f32 %v5270_v47, %v731_v56 }
 0x263   : > { %1140 = vmatpush1.msra.mxu0 %v769_v49  ;;  %1448 = vmatpush1.msra.mxu1 %v1420_v20  ;;  %v1359_v24 = vsel %vm1348_vm3, %v8530_v61, %v8529_v2  ;;  %v766_v49 = vmul.f32 %v5274_v0, %v716_v11  ;;  %v1375_v51 = vsel %vm1348_vm3, %v8529_v2, %v8530_v61  ;;  %v4035_v2 = vld [vmem:[%s8253_s4 + $0x98] sm:$0xff] }
 0x264   : > { %2584 = vrot.lane.b32.xlu1 %v8501_v32, %s4253_s26  ;;  %1141 = vmatprep.subr.mxu0 %v768_v39  ;;  %v5559_v1 = vpop.permute.xlu1 %2256  ;;  %v1416_v39 = vmul.f32 %v5452_v5, %v1376_v23  ;;  %v714_v11 = vsel %vm710_vm2, %v8533_v15, %v8532_v31  ;;  %v8536_v23 = vld [vmem:[#allocation71_spill] sm:$0xff]  ;;  %v1414_v42 = vmul.f32 %v5452_v5, %v1375_v51  ;;  %v8540_v51 = vld [vmem:[#allocation65_spill] sm:$0xff] }
 0x265   : > { %1449 = vmatprep.subr.mxu1 %v1419_v36  ;;  %1038 = vmatprep.mubr.f32.mxu1 %v8519_v8  ;;  %v730_v36 = vsel %vm710_vm2, %v8532_v31, %v8533_v15  ;;  %v762_v31 = vmul.f32 %v5274_v0, %v714_v11  ;;  %v8543_v11 = vld [vmem:[#allocation17_spill] sm:$0xff] }
 0x266   : > { %1142 = vmatpush1.msra.mxu0 %v767_v19  ;;  %1450 = vmatpush1.msra.mxu1 %v1418_v38  ;;  %v5576_v20 = vpop.permute.xlu0 %2578  ;;  %v8535_v19 = vld [vmem:[#allocation72_spill] sm:$0xff] }
 0x267   : > { %8531 = vst [vmem:[#allocation75_spill] sm:$0xff] %v5576_v20  ;;  %2550 = vrot.lane.b32.xlu0 %v8510_v58, %s4253_s26  ;;  %1039 = vmatmul.mubr.f32.gmra.mxu1 %v4034_v57  ;;  %v1358_v38 = vsel %vm1348_vm3, %v8536_v23, %v8535_v19  ;;  %v1415_v57 = vmul.f32 %v5408_v4, %v1359_v24  ;;  %v8537_v24 = vld [vmem:[#allocation24_spill] sm:$0xff] }
 0x268   : > { %1143 = vmatprep.subr.mxu0 %v766_v49  ;;  %1451 = vmatprep.subr.mxu1 %v1417_v55  ;;  %v5591_v53 = vpop.permute.xlu1 %2610  ;;  %v1374_v60 = vsel %vm1348_vm3, %v8535_v19, %v8536_v23  ;;  %v8538_v49 = vld [vmem:[#allocation23_spill] sm:$0xff]  ;;  %v1413_v15 = vmul.f32 %v5408_v4, %v1358_v38  ;;  %v761_v19 = vmul.f32 %v5270_v47, %v730_v36 }
 0x269   : > { %8534 = vst [vmem:[#allocation70_spill] sm:$0xff] %v5591_v53  ;;  %1144 = vmatpush1.msra.mxu0 %v765_v48  ;;  %1452 = vmatpush1.msra.mxu1 %v1416_v39  ;;  %v713_v56 = vsel %vm710_vm2, %v8538_v49, %v8537_v24  ;;  %v729_v55 = vsel %vm710_vm2, %v8537_v24, %v8538_v49  ;;  %v8539_v48 = vld [vmem:[#allocation66_spill] sm:$0xff]  ;;  %v8541_v24 = vld [vmem:[#allocation59_spill] sm:$0xff] }
 0x26a   : > { %2582 = vrot.lane.b32.xlu1 %v8515_v28, %s4253_s26  ;;  %1145 = vmatprep.subr.mxu0 %v764_v3  ;;  %v5613_v61 = vpop.permute.xlu0 %2222  ;;  %v1357_v39 = vsel %vm1348_vm3, %v8540_v51, %v8539_v48  ;;  %v1373_v23 = vsel %vm1348_vm3, %v8539_v48, %v8540_v51  ;;  %v760_v36 = vmul.f32 %v5274_v0, %v713_v56  ;;  %v8545_v49 = vld [vmem:[#allocation58_spill] sm:$0xff]  ;;  %v8546_v48 = vld [vmem:[#allocation57_spill] sm:$0xff] }
 0x26b   : > { %1453 = vmatprep.subr.mxu1 %v1415_v57  ;;  %1044 = vmatprep.mubr.f32.mxu1 %v8519_v8  ;;  %v1412_v57 = vmul.f32 %v5452_v5, %v1374_v60  ;;  %v1411_v51 = vmul.f32 %v5408_v4, %v1357_v39  ;;  %v1372_v56 = vsel %vm1348_vm3, %v8545_v49, %v8546_v48  ;;  %v8549_v39 = vld [vmem:[#allocation12_spill] sm:$0xff] }
 0x26c   : > { %1146 = vmatpush1.msra.mxu0 %v763_v34  ;;  %1454 = vmatpush1.msra.mxu1 %v1414_v42  ;;  %v5630_v3 = vpop.permute.xlu1 %2254  ;;  %v8542_v34 = vld [vmem:[#allocation18_spill] sm:$0xff] }
 0x26d   : > { %2932 = vrot.lane.b32.xlu0 %v8541_v24, %s4254_s23  ;;  %1045 = vmatmul.mubr.f32.gmra.mxu1 %v4035_v2  ;;  %v712_v38 = vsel %vm710_vm2, %v8543_v11, %v8542_v34  ;;  %v728_v60 = vsel %vm710_vm2, %v8542_v34, %v8543_v11  ;;  %v1356_v2 = vsel %vm1348_vm3, %v8546_v48, %v8545_v49  ;;  %v8547_v34 = vld [vmem:[#allocation61_spill] sm:$0xff]  ;;  %v8550_v11 = vld [vmem:[#allocation11_spill] sm:$0xff] }
 0x26e   : > { %1147 = vmatprep.subr.mxu0 %v762_v31  ;;  %1455 = vmatprep.subr.mxu1 %v1413_v15  ;;  %v5645_v42 = vpop.permute.xlu0 %2576  ;;  %v759_v31 = vmul.f32 %v5270_v47, %v729_v55  ;;  %v1410_v15 = vmul.f32 %v5452_v5, %v1373_v23  ;;  %v711_v55 = vsel %vm710_vm2, %v8550_v11, %v8549_v39  ;;  %v8552_v49 = vld [vmem:[#allocation49_spill] sm:$0xff] }
 0x26f   : > { %8544 = vst [vmem:[#allocation69_spill] sm:$0xff] %v5645_v42  ;;  %1148 = vmatpush1.msra.mxu0 %v761_v19  ;;  %1456 = vmatpush1.msra.mxu1 %v1412_v57  ;;  %v4036_v19 = vld [vmem:[%s8253_s4 + $0xa0] sm:$0xff]  ;;  %v727_v23 = vsel %vm710_vm2, %v8549_v39, %v8550_v11  ;;  %v1409_v42 = vmul.f32 %v5408_v4, %v1356_v2  ;;  %v8553_v11 = vld [vmem:[#allocation51_spill] sm:$0xff] }
 0x270   : > { %2964 = vrot.lane.b32.xlu1 %v8547_v34, %s4254_s23  ;;  %1149 = vmatprep.subr.mxu0 %v760_v36  ;;  %v5667_v57 = vpop.permute.xlu1 %2608  ;;  %v8551_v36 = vld [vmem:[#allocation50_spill] sm:$0xff]  ;;  %v757_v20 = vmul.f32 %v5270_v47, %v728_v60  ;;  %v1408_v39 = vmul.f32 %v5452_v5, %v1372_v56  ;;  %v756_v2 = vmul.f32 %v5274_v0, %v711_v55 }
 0x271   : > { %8548 = vst [vmem:[#allocation64_spill] sm:$0xff] %v5667_v57  ;;  %1457 = vmatprep.subr.mxu1 %v1411_v51  ;;  %1050 = vmatprep.mubr.f32.mxu1 %v8519_v8  ;;  %v1355_v48 = vsel %vm1348_vm3, %v8552_v49, %v8551_v36  ;;  %v758_v57 = vmul.f32 %v5274_v0, %v712_v38  ;;  %v4065_v38 = vld [vmem:[%s8250_s1 + $0x3] ss:$8 sm:$0x3] }
 0x272   : > { %1150 = vmatpush1.msra.mxu0 %v759_v31  ;;  %1458 = vmatpush1.msra.mxu1 %v1410_v15  ;;  %v5684_v53 = vpop.permute.xlu0 %2220  ;;  %v1371_v51 = vsel %vm1348_vm3, %v8551_v36, %v8552_v49  ;;  %v755_v31 = vmul.f32 %v5270_v47, %v727_v23  ;;  %v8554_v15 = vld [vmem:[#allocation42_spill] sm:$0xff]  ;;  %v8555_v36 = vld [vmem:[#allocation41_spill] sm:$0xff]  ;;  %v1716_v47 = vsel %vm1700_vm4, %v5225_v35, %v5366_v33 }
 0x273   : > { %2930 = vrot.lane.b32.xlu0 %v8553_v11, %s4254_s23  ;;  %1051 = vmatmul.mubr.f32.gmra.mxu1 %v4036_v19  ;;  %v1354_v56 = vsel %vm1348_vm3, %v8555_v36, %v8554_v15  ;;  %v1407_v19 = vmul.f32 %v5408_v4, %v1355_v48  ;;  %v1370_v0 = vsel %vm1348_vm3, %v8554_v15, %v8555_v36  ;;  %v787_v48 = vld [vmem:[%s8253_s4] sm:$0xff]  ;;  %v8560_v36 = vld [vmem:[#allocation97_spill] sm:$0xff] }
 0x274   : > { %1151 = vmatprep.subr.mxu0 %v758_v57  ;;  %1459 = vmatprep.subr.mxu1 %v1409_v42  ;;  %v5698_v60 = vpop.permute.xlu1 %2252  ;;  %v1406_v42 = vmul.f32 %v5452_v5, %v1371_v51  ;;  %v8556_v57 = vld [vmem:[#allocation53_spill] sm:$0xff]  ;;  %v5724_v23 = vrot.slane %v4065_v38, %v5113_v52  ;;  %v1732_v49 = vsel %vm1700_vm4, %v5366_v33, %v5225_v35 }
 0x275   : > { %1152 = vmatpush1.msra.mxu0 %v757_v20  ;;  %1460 = vmatpush1.msra.mxu1 %v1408_v39  ;;  %v4037_v20 = vld [vmem:[%s8253_s4 + $0xa8] sm:$0xff]  ;;  %v5735_v51 = vrot.slane %v4065_v38, %v5119_v63  ;;  %v8558_v39 = vld [vmem:[#allocation38_spill] sm:$0xff]  ;;  %v1405_v33 = vmul.f32 %v5408_v4, %v1354_v56  ;;  %v1404_v58 = vmul.f32 %v5452_v5, %v1370_v0 }
 0x276   : > { %2962 = vrot.lane.b32.xlu1 %v8556_v57, %s4254_s23  ;;  %1153 = vmatprep.subr.mxu0 %v756_v2  ;;  %v5721_v55 = vpop.permute.xlu0 %2574  ;;  %v8559_v2 = vld [vmem:[#allocation36_spill] sm:$0xff]  ;;  %v1776_v56 = vmul.f32 %v5724_v23, %v1732_v49 }
 0x277   : > { %8557 = vst [vmem:[#allocation63_spill] sm:$0xff] %v5721_v55  ;;  %1461 = vmatprep.subr.mxu1 %v1407_v19  ;;  %1056 = vmatprep.mubr.f32.mxu1 %v8519_v8  ;;  %v1353_v15 = vsel %vm1348_vm3, %v8559_v2, %v8558_v39  ;;  %v8561_v55 = vld [vmem:[#allocation96_spill] sm:$0xff]  ;;  %v1777_v38 = vmul.f32 %v5735_v51, %v1716_v47 }
 0x278   : > { %v1715_v35 = vsel %vm1700_vm4, %v8561_v55, %v8560_v36  ;;  %1154 = vmatpush1.msra.mxu0 %v755_v31  ;;  %1462 = vmatpush1.msra.mxu1 %v1406_v42  ;;  %v5746_v19 = vpop.permute.xlu1 %2606  ;;  %v1369_v28 = vsel %vm1348_vm3, %v8558_v39, %v8559_v2  ;;  %v1731_v31 = vsel %vm1700_vm4, %v8560_v36, %v8561_v55  ;;  %v8566_v2 = vld [vmem:[#allocation92_spill] sm:$0xff] }
 0x279   : > { %8562 = vst [vmem:[#allocation95_spill] sm:$0xff] %v5746_v19  ;;  %3284 = vrot.lane.b32.xlu0 %v8541_v24, %s4255_s13  ;;  %1057 = vmatmul.mubr.f32.gmra.mxu1 %v4037_v20  ;;  %v1403_v42 = vmul.f32 %v5408_v4, %v1353_v15  ;;  %v1775_v47 = vmul.f32 %v5735_v51, %v1715_v35  ;;  %v8563_v20 = vld [vmem:[#allocation32_spill] sm:$0xff]  ;;  %v8564_v19 = vld [vmem:[#allocation31_spill] sm:$0xff] }
 0x27a   : > { %1188 = vmatmul.mubr.f32.vlgmr.msra.gmra.mxu0 %v787_v48  ;;  %1463 = vmatprep.subr.mxu1 %v1405_v33  ;;  %v5761_v0 = vpop.permute.xlu0 %2218  ;;  %v1352_v39 = vsel %vm1348_vm3, %v8564_v19, %v8563_v20  ;;  %v1368_v55 = vsel %vm1348_vm3, %v8563_v20, %v8564_v19  ;;  %v8565_v48 = vld [vmem:[#allocation93_spill] sm:$0xff]  ;;  %v1774_v36 = vmul.f32 %v5724_v23, %v1731_v31  ;;  %v4038_v35 = vld [vmem:[%s8253_s4 + $0xb0] sm:$0xff] }
 0x27b   : > { %1795 = vmatprep.subr.mxu0 %v1777_v38  ;;  %1464 = vmatpush1.msra.mxu1 %v1404_v58  ;;  %v1402_v58 = vmul.f32 %v5452_v5, %v1369_v28  ;;  %v1714_v15 = vsel %vm1700_vm4, %v8566_v2, %v8565_v48  ;;  %v1730_v33 = vsel %vm1700_vm4, %v8565_v48, %v8566_v2  ;;  %v788_v28 = vld [vmem:[%s8253_s4 + $0x8] sm:$0xff]  ;;  %v8568_v38 = vld [vmem:[#allocation26_spill] sm:$0xff]  ;;  %v8569_v31 = vld [vmem:[#allocation25_spill] sm:$0xff] }
 0x27c   : > { %1796 = vmatpush1.msra.mxu0 %v1776_v56  ;;  %3316 = vrot.lane.b32.xlu1 %v8547_v34, %s4255_s13  ;;  %v5775_v49 = vpop.permute.xlu1 %2250  ;;  %v1351_v56 = vsel %vm1348_vm3, %v8569_v31, %v8568_v38  ;;  %v1401_v48 = vmul.f32 %v5408_v4, %v1352_v39  ;;  %v1400_v2 = vmul.f32 %v5452_v5, %v1368_v55 }
 0x27d   : > { %1465 = vmatprep.subr.mxu1 %v1403_v42  ;;  %1797 = vmatprep.subr.mxu0 %v1775_v47  ;;  %v8570_v42 = vld [vmem:[#allocation89_spill] sm:$0xff]  ;;  %v8571_v47 = vld [vmem:[#allocation88_spill] sm:$0xff]  ;;  %v1367_v9 = vsel %vm1348_vm3, %v8568_v38, %v8569_v31  ;;  %v1772_v55 = vmul.f32 %v5724_v23, %v1730_v33 }
 0x27e   : > { %1062 = vmatprep.mubr.f32.mxu1 %v8519_v8  ;;  %1193 = vmatprep.mubr.f32.mxu0 %v8519_v8  ;;  %v5795_v19 = vpop.permute.xlu0 %2572  ;;  %v1713_v20 = vsel %vm1700_vm4, %v8571_v47, %v8570_v42  ;;  %v1729_v39 = vsel %vm1700_vm4, %v8570_v42, %v8571_v47  ;;  %v8578_v31 = vld [vmem:[#allocation85_spill] sm:$0xff] }
 0x27f   : > { %8567 = vst [vmem:[#allocation94_spill] sm:$0xff] %v5795_v19  ;;  %1466 = vmatpush1.msra.mxu1 %v1402_v58  ;;  %1798 = vmatpush1.msra.mxu0 %v1774_v36  ;;  %v1773_v19 = vmul.f32 %v5735_v51, %v1714_v15  ;;  %v1399_v58 = vmul.f32 %v5408_v4, %v1351_v56  ;;  %v8579_v56 = vld [vmem:[#allocation84_spill] sm:$0xff] }
 0x280   : > { %2928 = vrot.lane.b32.xlu0 %v8572_v6, %s4254_s23  ;;  %1063 = vmatmul.mubr.f32.gmra.mxu1 %v4038_v35  ;;  %v5810_v44 = vpop.permute.xlu1 %2604  ;;  %v1771_v15 = vmul.f32 %v5735_v51, %v1713_v20  ;;  %v8575_v35 = vld [vmem:[#allocation20_spill] sm:$0xff]  ;;  %v1712_v42 = vsel %vm1700_vm4, %v8579_v56, %v8578_v31  ;;  %v1770_v47 = vmul.f32 %v5724_v23, %v1729_v39  ;;  %v4039_v20 = vld [vmem:[%s8253_s4 + $0xb8] sm:$0xff]  ;;  %v8582_v39 = vld [vmem:[#allocation14_spill] sm:$0xff] }
 0x281   : > { %8573 = vst [vmem:[#allocation56_spill] sm:$0xff] %v5810_v44  ;;  %1194 = vmatmul.mubr.f32.gmra.mxu0 %v788_v28  ;;  %1467 = vmatprep.subr.mxu1 %v1401_v48  ;;  %v8576_v44 = vld [vmem:[#allocation19_spill] sm:$0xff]  ;;  %v8577_v28 = vld [vmem:[#allocation45_spill] sm:$0xff]  ;;  %v789_v48 = vld [vmem:[%s8253_s4 + $0x10] sm:$0xff] }
 0x282   : > { %1799 = vmatprep.subr.mxu0 %v1773_v19  ;;  %1468 = vmatpush1.msra.mxu1 %v1400_v2  ;;  %v5823_v36 = vpop.permute.xlu0 %2216  ;;  %v1350_v38 = vsel %vm1348_vm3, %v8576_v44, %v8575_v35  ;;  %v1366_v33 = vsel %vm1348_vm3, %v8575_v35, %v8576_v44  ;;  %v1398_v19 = vmul.f32 %v5452_v5, %v1367_v9  ;;  %v8581_v2 = vld [vmem:[#allocation16_spill] sm:$0xff] }
 0x283   : > { %8574 = vst [vmem:[#allocation55_spill] sm:$0xff] %v5823_v36  ;;  %1800 = vmatpush1.msra.mxu0 %v1772_v55  ;;  %2960 = vrot.lane.b32.xlu1 %v8577_v28, %s4254_s23  ;;  %v1728_v9 = vsel %vm1700_vm4, %v8578_v31, %v8579_v56  ;;  %v1349_v55 = vsel %vm1348_vm3, %v8582_v39, %v8581_v2 }
 0x284   : > { %1469 = vmatprep.subr.mxu1 %v1399_v58  ;;  %1801 = vmatprep.subr.mxu0 %v1771_v15  ;;  %v5844_v44 = vpop.permute.xlu1 %2248  ;;  %v8583_v58 = vld [vmem:[#allocation80_spill] sm:$0xff]  ;;  %v8584_v15 = vld [vmem:[#allocation79_spill] sm:$0xff]  ;;  %v1397_v31 = vmul.f32 %v5408_v4, %v1350_v38  ;;  %v1769_v36 = vmul.f32 %v5735_v51, %v1712_v42  ;;  %v1365_v32 = vsel %vm1348_vm3, %v8581_v2, %v8582_v39 }
 0x285   : > { %8580 = vst [vmem:[#allocation91_spill] sm:$0xff] %v5844_v44  ;;  %1068 = vmatprep.mubr.f32.mxu1 %v8519_v8  ;;  %1199 = vmatprep.mubr.f32.mxu0 %v8519_v8  ;;  %v1711_v35 = vsel %vm1700_vm4, %v8584_v15, %v8583_v58  ;;  %v1396_v44 = vmul.f32 %v5452_v5, %v1366_v33  ;;  %v8588_v39 = vld [vmem:[#allocation68_spill] sm:$0xff] }
 0x286   : > { %1470 = vmatpush1.msra.mxu1 %v1398_v19  ;;  %1802 = vmatpush1.msra.mxu0 %v1770_v47  ;;  %v5864_v56 = vpop.permute.xlu0 %2570  ;;  %v1727_v38 = vsel %vm1700_vm4, %v8583_v58, %v8584_v15  ;;  %v1768_v19 = vmul.f32 %v5724_v23, %v1728_v9  ;;  %v1395_v42 = vmul.f32 %v5408_v4, %v1349_v55  ;;  %v8589_v55 = vld [vmem:[#allocation67_spill] sm:$0xff] }
 0x287   : > { %8585 = vst [vmem:[#allocation90_spill] sm:$0xff] %v5864_v56  ;;  %3282 = vrot.lane.b32.xlu0 %v8553_v11, %s4255_s13  ;;  %1069 = vmatmul.mubr.f32.gmra.mxu1 %v4039_v20  ;;  %v1767_v47 = vmul.f32 %v5735_v51, %v1711_v35  ;;  %v8586_v20 = vld [vmem:[#allocation74_spill] sm:$0xff]  ;;  %v8587_v56 = vld [vmem:[#allocation73_spill] sm:$0xff]  ;;  %v1709_v58 = vsel %vm1700_vm4, %v8589_v55, %v8588_v39 }
 0x288   : > { %1200 = vmatmul.mubr.f32.gmra.mxu0 %v789_v48  ;;  %1471 = vmatprep.subr.mxu1 %v1397_v31  ;;  %v5879_v33 = vpop.permute.xlu1 %2602  ;;  %v1710_v2 = vsel %vm1700_vm4, %v8587_v56, %v8586_v20  ;;  %v1394_v48 = vmul.f32 %v5452_v5, %v1365_v32  ;;  %v1726_v4 = vsel %vm1700_vm4, %v8586_v20, %v8587_v56  ;;  %v790_v32 = vld [vmem:[%s8253_s4 + $0x18] sm:$0xff]  ;;  %v8590_v56 = vld [vmem:[#allocation35_spill] sm:$0xff] }
 0x289   : > { %1803 = vmatprep.subr.mxu0 %v1769_v36  ;;  %1472 = vmatpush1.msra.mxu1 %v1396_v44  ;;  %v1766_v36 = vmul.f32 %v5724_v23, %v1727_v38  ;;  %v4040_v44 = vld [vmem:[%s8253_s4 + $0xc0] sm:$0xff]  ;;  %v1765_v15 = vmul.f32 %v5735_v51, %v1710_v2  ;;  %v1725_v35 = vsel %vm1700_vm4, %v8588_v39, %v8589_v55  ;;  %v8596_v55 = vld [vmem:[#allocation52_spill] sm:$0xff] }
 0x28a   : > { %1804 = vmatpush1.msra.mxu0 %v1768_v19  ;;  %3314 = vrot.lane.b32.xlu1 %v8556_v57, %s4255_s13  ;;  %v5889_v9 = vpop.permute.xlu0 %2214  ;;  %v1764_v31 = vmul.f32 %v5724_v23, %v1726_v4  ;;  %v1763_v19 = vmul.f32 %v5735_v51, %v1709_v58  ;;  %v1762_v4 = vmul.f32 %v5724_v23, %v1725_v35  ;;  %v8595_v39 = vld [vmem:[#allocation54_spill] sm:$0xff] }
 0x28b   : > { %1473 = vmatprep.subr.mxu1 %v1395_v42  ;;  %1805 = vmatprep.subr.mxu0 %v1767_v47  ;;  %v8591_v42 = vld [vmem:[#allocation62_spill] sm:$0xff]  ;;  %v8592_v47 = vld [vmem:[#allocation60_spill] sm:$0xff]  ;;  %v1707_v58 = vsel %vm1700_vm4, %v8596_v55, %v8595_v39 }
 0x28c   : > { %1074 = vmatprep.mubr.f32.mxu1 %v8519_v8  ;;  %1205 = vmatprep.mubr.f32.mxu0 %v8519_v8  ;;  %v5909_v5 = vpop.permute.xlu1 %2246  ;;  %v1708_v20 = vsel %vm1700_vm4, %v8592_v47, %v8591_v42 }
 0x28d   : > { %1474 = vmatpush1.msra.mxu1 %v1394_v48  ;;  %1806 = vmatpush1.msra.mxu0 %v1766_v36  ;;  %v1724_v48 = vsel %vm1700_vm4, %v8591_v42, %v8592_v47  ;;  %v8594_v36 = vld [vmem:[#allocation37_spill] sm:$0xff]  ;;  %v1761_v35 = vmul.f32 %v5735_v51, %v1708_v20  ;;  %v8597_v42 = vld [vmem:[#allocation46_spill] sm:$0xff]  ;;  %v8598_v47 = vld [vmem:[#allocation44_spill] sm:$0xff] }
 0x28e   : > { %2926 = vrot.lane.b32.xlu0 %v8590_v56, %s4254_s23  ;;  %1075 = vmatmul.mubr.f32.gmra.mxu1 %v4040_v44  ;;  %v5919_v38 = vpop.permute.xlu0 %2568  ;;  %v4041_v44 = vld [vmem:[%s8253_s4 + $0xc8] sm:$0xff]  ;;  %v1722_v20 = vsel %vm1700_vm4, %v8597_v42, %v8598_v47 }
 0x28f   : > { %1206 = vmatmul.mubr.f32.gmra.mxu0 %v790_v32  ;;  %1807 = vmatprep.subr.mxu0 %v1765_v15  ;;  %v1723_v15 = vsel %vm1700_vm4, %v8595_v39, %v8596_v55  ;;  %v1705_v55 = vsel %vm1700_vm4, %v5145_v29, %v5153_v7 }
 0x290   : > { %2005 = vmatprep.subr.mxu1 %v8547_v34  ;;  %1808 = vmatpush1.msra.mxu0 %v1764_v31  ;;  %v5927_v2 = vpop.permute.xlu1 %2600  ;;  %v791_v34 = vld [vmem:[%s8253_s4 + $0x20] sm:$0xff]  ;;  %v1760_v31 = vmul.f32 %v5724_v23, %v1724_v48  ;;  %v1758_v48 = vmul.f32 %v5724_v23, %v1723_v15  ;;  %v8599_v15 = vld [vmem:[#allocation27_spill] sm:$0xff] }
 0x291   : > { %8593 = vst [vmem:[#allocation48_spill] sm:$0xff] %v5927_v2  ;;  %2958 = vrot.lane.b32.xlu1 %v8594_v36, %s4254_s23  ;;  %1809 = vmatprep.subr.mxu0 %v1763_v19  ;;  %v1706_v2 = vsel %vm1700_vm4, %v8598_v47, %v8597_v42  ;;  %v1756_v42 = vmul.f32 %v5724_v23, %v1722_v20 }
 0x292   : > { %1080 = vmatprep.mubr.f32.mxu1 %v8519_v8  ;;  %1211 = vmatprep.mubr.f32.mxu0 %v8519_v8  ;;  %v5948_v32 = vpop.permute.xlu0 %2212  ;;  %v1704_v47 = vsel %vm1700_vm4, %v5260_v10, %v5181_v54 }
 0x293   : > { %1810 = vmatpush1.msra.mxu0 %v1762_v4  ;;  %3280 = vrot.lane.b32.xlu0 %v8572_v6, %s4255_s13  ;;  %v1759_v4 = vmul.f32 %v5735_v51, %v1707_v58  ;;  %v1721_v58 = vsel %vm1700_vm4, %v5153_v7, %v5145_v29  ;;  %v8600_v29 = vld [vmem:[#allocation29_spill] sm:$0xff]  ;;  %v1755_v7 = vmul.f32 %v5735_v51, %v1705_v55 }
 0x294   : > { %1081 = vmatmul.mubr.f32.gmra.mxu1 %v4041_v44  ;;  %1212 = vmatmul.mubr.f32.gmra.mxu0 %v791_v34  ;;  %v5958_v19 = vpop.permute.xlu1 %2244  ;;  %v4042_v44 = vld [vmem:[%s8253_s4 + $0xd0] sm:$0xff]  ;;  %v792_v34 = vld [vmem:[%s8253_s4 + $0x28] sm:$0xff]  ;;  %v1754_v20 = vmul.f32 %v5724_v23, %v1721_v58 }
 0x295   : > { %1811 = vmatprep.subr.mxu0 %v1761_v35  ;;  %3312 = vrot.lane.b32.xlu1 %v8577_v28, %s4255_s13  ;;  %v1757_v35 = vmul.f32 %v5735_v51, %v1706_v2  ;;  %v4043_v2 = vld [vmem:[%s8253_s4 + $0xd8] sm:$0xff] }
 0x296   : > { %1812 = vmatpush1.msra.mxu0 %v1760_v31  ;;  %1086 = vmatprep.mubr.f32.mxu1 %v8519_v8  ;;  %v5979_v39 = vpop.permute.xlu0 %2566 }
 0x297   : > { %1813 = vmatprep.subr.mxu0 %v1759_v4  ;;  %1217 = vmatprep.mubr.f32.mxu0 %v8519_v8 }
 0x298   : > { %1814 = vmatpush1.msra.mxu0 %v1758_v48  ;;  %2924 = vrot.lane.b32.xlu0 %v8599_v15, %s4254_s23  ;;  %v5993_v31 = vpop.permute.xlu1 %2598  ;;  %v1720_v48 = vsel %vm1700_vm4, %v5181_v54, %v5260_v10  ;;  %v1719_v54 = vsel %vm1700_vm4, %v5209_v50, %v5303_v62  ;;  %v1753_v10 = vmul.f32 %v5735_v51, %v1704_v47 }
 0x299   : > { %1087 = vmatmul.mubr.f32.gmra.mxu1 %v4042_v44  ;;  %1218 = vmatmul.mubr.f32.gmra.mxu0 %v792_v34  ;;  %v793_v44 = vld [vmem:[%s8253_s4 + $0x30] sm:$0xff]  ;;  %v1703_v34 = vsel %vm1700_vm4, %v5303_v62, %v5209_v50  ;;  %v1752_v58 = vmul.f32 %v5724_v23, %v1720_v48  ;;  %v4044_v62 = vld [vmem:[%s8253_s4 + $0xe0] sm:$0xff]  ;;  %v1750_v47 = vmul.f32 %v5724_v23, %v1719_v54 }
 0x29a   : > { %1815 = vmatprep.subr.mxu0 %v1757_v35  ;;  %2956 = vrot.lane.b32.xlu1 %v8600_v29, %s4254_s23  ;;  %v6006_v4 = vpop.permute.xlu0 %2210  ;;  %v1751_v50 = vmul.f32 %v5735_v51, %v1703_v34 }
 0x29b   : > { %1816 = vmatpush1.msra.mxu0 %v1756_v42  ;;  %1092 = vmatprep.mubr.f32.mxu1 %v8519_v8  ;;  %v1702_v42 = vsel %vm1700_vm4, %v5350_v27, %v5240_v59 }
 0x29c   : > { %1817 = vmatprep.subr.mxu0 %v1755_v7  ;;  %1223 = vmatprep.mubr.f32.mxu0 %v8519_v8  ;;  %v6022_v55 = vpop.permute.xlu1 %2242  ;;  %v1718_v7 = vsel %vm1700_vm4, %v5240_v59, %v5350_v27  ;;  %v1701_v59 = vsel %vm1700_vm4, %v5390_v16, %v5404_v41  ;;  %v1717_v27 = vsel %vm1700_vm4, %v5404_v41, %v5390_v16  ;;  %v8602_v41 = vld [vmem:[#allocation22_spill] sm:$0xff] }
 0x29d   : > { %1818 = vmatpush1.msra.mxu0 %v1754_v20  ;;  %1093 = vmatmul.mubr.f32.gmra.mxu1 %v4043_v2  ;;  %v6052_v2 = vld [vmem:[%s8250_s1 + $0x5] ss:$8 sm:$0x3]  ;;  %v794_v20 = vld [vmem:[%s8253_s4 + $0x38] sm:$0xff]  ;;  %v1748_v54 = vmul.f32 %v5724_v23, %v1718_v7  ;;  %v2294_v16 = vsel %vm2262_vm5, %v5446_v43, %v5422_v12 }
 0x29e   : > { %3278 = vrot.lane.b32.xlu0 %v8590_v56, %s4255_s13  ;;  %1224 = vmatmul.mubr.f32.gmra.mxu0 %v793_v44  ;;  %v6032_v35 = vpop.permute.xlu0 %2564  ;;  %v1749_v44 = vmul.f32 %v5735_v51, %v1702_v42  ;;  %v1747_v42 = vmul.f32 %v5735_v51, %v1701_v59  ;;  %v795_v7 = vld [vmem:[%s8253_s4 + $0x40] sm:$0xff] }
 0x29f   : > { %1819 = vmatprep.subr.mxu0 %v1753_v10  ;;  %3310 = vrot.lane.b32.xlu1 %v8594_v36, %s4255_s13  ;;  %v8601_v10 = vld [vmem:[#allocation21_spill] sm:$0xff] }
 0x2a0   : > { %1820 = vmatpush1.msra.mxu0 %v1752_v58  ;;  %1098 = vmatprep.mubr.f32.mxu1 %v8519_v8  ;;  %v6058_v48 = vpop.permute.xlu1 %2596  ;;  %v6078_v58 = vrot.slane %v6052_v2, %v5119_v63 }
 0x2a1   : > { %1821 = vmatprep.subr.mxu0 %v1751_v50  ;;  %1229 = vmatprep.mubr.f32.mxu0 %v8519_v8  ;;  %v4045_v50 = vld [vmem:[%s8253_s4 + $0xe8] sm:$0xff] }
 0x2a2   : > { %1822 = vmatpush1.msra.mxu0 %v1750_v47  ;;  %1099 = vmatmul.mubr.f32.gmra.mxu1 %v4044_v62  ;;  %v6071_v34 = vpop.permute.xlu0 %2208  ;;  %v1746_v47 = vmul.f32 %v5724_v23, %v1717_v27  ;;  %v2339_v51 = vmul.f32 %v6078_v58, %v2294_v16  ;;  %v4046_v23 = vld [vmem:[%s8253_s4 + $0xf0] sm:$0xff]  ;;  %v796_v27 = vld [vmem:[%s8253_s4 + $0x48] sm:$0xff]  ;;  %v4047_v16 = vld [vmem:[%s8253_s4 + $0xf8] sm:$0xff] }
 0x2a3   : > { %2922 = vrot.lane.b32.xlu0 %v8601_v10, %s4254_s23  ;;  %1230 = vmatmul.mubr.f32.gmra.mxu0 %v794_v20 }
 0x2a4   : > { %1823 = vmatprep.subr.mxu0 %v1749_v44  ;;  %2954 = vrot.lane.b32.xlu1 %v8602_v41, %s4254_s23  ;;  %v6090_v62 = vpop.permute.xlu1 %2240 }
 0x2a5   : > { %1824 = vmatpush1.msra.mxu0 %v1748_v54  ;;  %1104 = vmatprep.mubr.f32.mxu1 %v8519_v8  ;;  %v8604_v54 = vld [vmem:[#allocation13_spill] sm:$0xff] }
 0x2a6   : > { %1825 = vmatprep.subr.mxu0 %v1747_v42  ;;  %1235 = vmatprep.mubr.f32.mxu0 %v8519_v8  ;;  %v6098_v20 = vpop.permute.xlu0 %2562 }
 0x2a7   : > { %1826 = vmatpush1.msra.mxu0 %v1746_v47  ;;  %1105 = vmatmul.mubr.f32.gmra.mxu1 %v4045_v50  ;;  %v8605_v50 = vld [vmem:[#allocation15_spill] sm:$0xff]  ;;  %v797_v47 = vld [vmem:[%s8253_s4 + $0x50] sm:$0xff] }
 0x2a8   : > { %1236 = vmatmul.mubr.f32.gmra.mxu0 %v795_v7  ;;  %3276 = vrot.lane.b32.xlu0 %v8599_v15, %s4255_s13  ;;  %v6106_v59 = vpop.permute.xlu1 %2594 }
 0x2a9   : > { %8603 = vst [vmem:[#allocation47_spill] sm:$0xff] %v6106_v59  ;;  %2357 = vmatprep.subr.mxu0 %v2339_v51  ;;  %3308 = vrot.lane.b32.xlu1 %v8600_v29, %s4255_s13  ;;  %v4049_v51 = vld [vmem:[%s8253_s4 + $0x100] sm:$0xff] }
 0x2aa   : > { %1110 = vmatprep.mubr.f32.mxu1 %v8519_v8  ;;  %1241 = vmatprep.mubr.f32.mxu0 %v8519_v8  ;;  %v6115_v44 = vpop.permute.xlu0 %2206  ;;  %v8609_v59 = vld [vmem:[#allocation10_spill] sm:$0xff] }
 0x2ab   : > { %1111 = vmatmul.mubr.f32.gmra.mxu1 %v4046_v23 }
 0x2ac   : > { %1242 = vmatmul.mubr.f32.gmra.mxu0 %v796_v27  ;;  %2920 = vrot.lane.b32.xlu0 %v8604_v54, %s4254_s23  ;;  %v6122_v42 = vpop.permute.xlu1 %2238  ;;  %v798_v27 = vld [vmem:[%s8253_s4 + $0x58] sm:$0xff] }
 0x2ad   : > { %2952 = vrot.lane.b32.xlu1 %v8605_v50, %s4254_s23  ;;  %1116 = vmatprep.mubr.f32.mxu1 %v8519_v8 }
 0x2ae   : > { %1247 = vmatprep.mubr.f32.mxu0 %v8519_v8  ;;  %v6131_v7 = vpop.permute.xlu0 %2560 }
 0x2af   : > { %8606 = vst [vmem:[#allocation87_spill] sm:$0xff] %v6131_v7  ;;  %1117 = vmatmul.mubr.f32.gmra.mxu1 %v4047_v16  ;;  %v799_v7 = vld [vmem:[%s8253_s4 + $0x60] sm:$0xff] }
 0x2b0   : > { %1248 = vmatmul.mubr.f32.gmra.mxu0 %v797_v47  ;;  %3274 = vrot.lane.b32.xlu0 %v8601_v10, %s4255_s13  ;;  %v6138_v23 = vpop.permute.xlu1 %2592 }
 0x2b1   : > { %8607 = vst [vmem:[#allocation86_spill] sm:$0xff] %v6138_v23  ;;  %3306 = vrot.lane.b32.xlu1 %v8602_v41, %s4255_s13  ;;  %1253 = vmatprep.mubr.f32.mxu0 %v8519_v8  ;;  %v8608_v23 = vld [vmem:[#allocation9_spill] sm:$0xff] }
 0x2b2   : > { %1507 = vmatprep.mubr.f32.mxu1 %v8519_v8  ;;  %v6147_v16 = vpop.permute.xlu0 %2204 }
 0x2b3   : > { %1508 = vmatmul.mubr.f32.vlgmr.msra.gmra.mxu1 %v4049_v51 }
 0x2b4   : > { %1254 = vmatmul.mubr.f32.gmra.mxu0 %v798_v27  ;;  %2006 = vmatpush1.msra.mxu1 %v8541_v24  ;;  %v6150_v47 = vpop.permute.xlu1 %2236  ;;  %v4050_v24 = vld [vmem:[%s8253_s4 + $0x108] sm:$0xff] }
 0x2b5   : > { %2918 = vrot.lane.b32.xlu0 %v8608_v23, %s4254_s23  ;;  %2007 = vmatprep.subr.mxu1 %v8556_v57 }
 0x2b6   : > { %2950 = vrot.lane.b32.xlu1 %v8609_v59, %s4254_s23  ;;  %2008 = vmatpush1.msra.mxu1 %v8553_v11  ;;  %v6164_v51 = vpop.permute.xlu0 %2558  ;;  %v800_v11 = vld [vmem:[%s8253_s4 + $0x68] sm:$0xff] }
 0x2b7   : > { %1259 = vmatprep.mubr.f32.mxu0 %v8519_v8  ;;  %1513 = vmatprep.mubr.f32.mxu1 %v8519_v8 }
 0x2b8   : > { %2009 = vmatprep.subr.mxu1 %v8577_v28  ;;  %1260 = vmatmul.mubr.f32.gmra.mxu0 %v799_v7  ;;  %v6169_v57 = vpop.permute.xlu1 %2590  ;;  %v4051_v28 = vld [vmem:[%s8253_s4 + $0x110] sm:$0xff]  ;;  %v8610_v7 = vld [vmem:[#allocation7_spill] sm:$0xff] }
 0x2b9   : > { %1514 = vmatmul.mubr.f32.gmra.mxu1 %v4050_v24  ;;  %3272 = vrot.lane.b32.xlu0 %v8604_v54, %s4255_s13  ;;  %v8611_v24 = vld [vmem:[#allocation8_spill] sm:$0xff] }
 0x2ba   : > { %2010 = vmatpush1.msra.mxu1 %v8572_v6  ;;  %3304 = vrot.lane.b32.xlu1 %v8605_v50, %s4255_s13  ;;  %v6179_v27 = vpop.permute.xlu0 %2202 }
 0x2bb   : > { %2011 = vmatprep.subr.mxu1 %v8594_v36  ;;  %1265 = vmatprep.mubr.f32.mxu0 %v8519_v8 }
 0x2bc   : > { %2012 = vmatpush1.msra.mxu1 %v8590_v56  ;;  %1519 = vmatprep.mubr.f32.mxu1 %v8519_v8  ;;  %v6188_v6 = vpop.permute.xlu1 %2234  ;;  %v801_v56 = vld [vmem:[%s8253_s4 + $0x70] sm:$0xff] }
 0x2bd   : > { %2013 = vmatprep.subr.mxu1 %v8600_v29  ;;  %1266 = vmatmul.mubr.f32.gmra.mxu0 %v800_v11  ;;  %v4052_v29 = vld [vmem:[%s8253_s4 + $0x118] sm:$0xff] }
 0x2be   : > { %1520 = vmatmul.mubr.f32.gmra.mxu1 %v4051_v28  ;;  %2916 = vrot.lane.b32.xlu0 %v8610_v7, %s4254_s23  ;;  %v6193_v36 = vpop.permute.xlu0 %2556  ;;  %v2278_v28 = vsel %vm2262_vm5, %v5422_v12, %v5446_v43  ;;  %v4066_v12 = vld [vmem:[%s8253_s4 + $0x180] sm:$0xff] }
 0x2bf   : > { %2014 = vmatpush1.msra.mxu1 %v8599_v15  ;;  %2948 = vrot.lane.b32.xlu1 %v8611_v24, %s4254_s23  ;;  %v802_v15 = vld [vmem:[%s8253_s4 + $0x78] sm:$0xff] }
 0x2c0   : > { %2015 = vmatprep.subr.mxu1 %v8602_v41  ;;  %1271 = vmatprep.mubr.f32.mxu0 %v8519_v8  ;;  %v6206_v11 = vpop.permute.xlu1 %2588 }
 0x2c1   : > { %2016 = vmatpush1.msra.mxu1 %v8601_v10  ;;  %1525 = vmatprep.mubr.f32.mxu1 %v8519_v8  ;;  %v4053_v10 = vld [vmem:[%s8253_s4 + $0x120] sm:$0xff] }
 0x2c2   : > { %2017 = vmatprep.subr.mxu1 %v8605_v50  ;;  %1272 = vmatmul.mubr.f32.gmra.mxu0 %v801_v56 }
 0x2c3   : > { %1526 = vmatmul.mubr.f32.gmra.mxu1 %v4052_v29  ;;  %3270 = vrot.lane.b32.xlu0 %v8608_v23, %s4255_s13  ;;  %v6219_v41 = vpop.permute.xlu0 %2200 }
 0x2c4   : > { %2018 = vmatpush1.msra.mxu1 %v8604_v54  ;;  %3302 = vrot.lane.b32.xlu1 %v8609_v59, %s4255_s13  ;;  %v6233_v54 = vrot.slane %v6052_v2, %v5113_v52  ;;  %v2293_v2 = vsel %vm2262_vm5, %v5483_v40, %v5468_v46 }
 0x2c5   : > { %2019 = vmatprep.subr.mxu1 %v8609_v59  ;;  %1277 = vmatprep.mubr.f32.mxu0 %v8519_v8  ;;  %v6226_v50 = vpop.permute.xlu1 %2232  ;;  %v8612_v59 = vld [vmem:[#allocation6_spill] sm:$0xff] }
 0x2c6   : > { %2020 = vmatpush1.msra.mxu1 %v8608_v23  ;;  %1531 = vmatprep.mubr.f32.mxu1 %v8519_v8  ;;  %v4054_v23 = vld [vmem:[%s8253_s4 + $0x128] sm:$0xff]  ;;  %v2338_v29 = vmul.f32 %v6233_v54, %v2278_v28 }
 0x2c7   : > { %2021 = vmatprep.subr.mxu1 %v8611_v24  ;;  %1278 = vmatmul.mubr.f32.gmra.mxu0 %v802_v15  ;;  %v2277_v15 = vsel %vm2262_vm5, %v5468_v46, %v5483_v40  ;;  %v2276_v46 = vsel %vm2262_vm5, %v5537_v45, %v5559_v1  ;;  %v4055_v40 = vld [vmem:[%s8253_s4 + $0x130] sm:$0xff] }
 0x2c8   : > { %1532 = vmatmul.mubr.f32.gmra.mxu1 %v4053_v10  ;;  %2914 = vrot.lane.b32.xlu0 %v8612_v59, %s4254_s23  ;;  %v6256_v43 = vpop.permute.xlu0 %2554  ;;  %v2337_v10 = vmul.f32 %v6078_v58, %v2293_v2  ;;  %v2336_v28 = vmul.f32 %v6233_v54, %v2277_v15  ;;  %v2291_v2 = vsel %vm2262_vm5, %v5630_v3, %v5613_v61 }
 0x2c9   : > { %2022 = vmatpush1.msra.mxu1 %v8610_v7  ;;  %2946 = vrot.lane.b32.xlu1 %v4589_v30, %s4254_s23  ;;  %8613 = vst [vmem:[#allocation40_spill] sm:$0xff] %v6256_v43  ;;  %v8624_v43 = vld [vmem:[#allocation2_spill] sm:$0xff] }
 0x2ca   : > { %2023 = vmatprep.subr.mxu1 %v4589_v30  ;;  %1537 = vmatprep.mubr.f32.mxu1 %v8519_v8  ;;  %v6258_v56 = vpop.permute.xlu1 %2586 }
 0x2cb   : > { %8614 = vst [vmem:[#allocation39_spill] sm:$0xff] %v6258_v56  ;;  %2024 = vmatpush1.msra.mxu1 %v8612_v59  ;;  %1859 = vmatprep.mubr.f32.mxu0 %v8519_v8  ;;  %v2292_v56 = vsel %vm2262_vm5, %v5559_v1, %v5537_v45  ;;  %v4067_v1 = vld [vmem:[%s8253_s4 + $0x188] sm:$0xff] }
 0x2cc   : > { %2025 = vmatprep.subr.mxu1 %v4567_v26  ;;  %1538 = vmatmul.mubr.f32.gmra.mxu1 %v4054_v23  ;;  %v2335_v45 = vmul.f32 %v6078_v58, %v2292_v56  ;;  %v2333_v56 = vmul.f32 %v6078_v58, %v2291_v2  ;;  %v8617_v2 = vld [vmem:[#allocation5_spill] sm:$0xff] }
 0x2cd   : > { %1860 = vmatmul.mubr.f32.vlgmr.msra.gmra.mxu0 %v4066_v12  ;;  %2026 = vmatpush1.msra.mxu1 %v4563_v25  ;;  %v2275_v12 = vsel %vm2262_vm5, %v5613_v61, %v5630_v3 }
 0x2ce   : > { %2358 = vmatpush1.msra.mxu0 %v2338_v29  ;;  %3268 = vrot.lane.b32.xlu0 %v8610_v7, %s4255_s13  ;;  %v6288_v7 = vpop.permute.xlu0 %2198  ;;  %v2290_v29 = vsel %vm2262_vm5, %v5698_v60, %v5684_v53  ;;  %v2332_v15 = vmul.f32 %v6233_v54, %v2275_v12  ;;  %v8619_v12 = vld [vmem:[#allocation91_spill] sm:$0xff] }
 0x2cf   : > { %2027 = vmatprep.subr.mxu1 %v4551_v22  ;;  %2359 = vmatprep.subr.mxu0 %v2337_v10  ;;  %v2274_v10 = vsel %vm2262_vm5, %v5684_v53, %v5698_v60  ;;  %v2331_v53 = vmul.f32 %v6078_v58, %v2290_v29  ;;  %v4068_v60 = vld [vmem:[%s8253_s4 + $0x190] sm:$0xff] }
 0x2d0   : > { %3300 = vrot.lane.b32.xlu1 %v8611_v24, %s4255_s13  ;;  %2028 = vmatpush1.msra.mxu1 %v4547_v21  ;;  %v6290_v23 = vpop.permute.xlu1 %2230  ;;  %v2334_v24 = vmul.f32 %v6233_v54, %v2276_v46  ;;  %v6335_v46 = vld [vmem:[%s8250_s1 + $0x6] ss:$8 sm:$0x3]  ;;  %v8620_v29 = vld [vmem:[#allocation4_spill] sm:$0xff] }
 0x2d1   : > { %2360 = vmatpush1.msra.mxu0 %v2336_v28  ;;  %1543 = vmatprep.mubr.f32.mxu1 %v8519_v8  ;;  %v4056_v28 = vld [vmem:[%s8253_s4 + $0x138] sm:$0xff] }
 0x2d2   : > { %1865 = vmatprep.mubr.f32.mxu0 %v8519_v8  ;;  %2029 = vmatprep.subr.mxu1 %v4535_v18 }
 0x2d3   : > { %2361 = vmatprep.subr.mxu0 %v2335_v45  ;;  %1544 = vmatmul.mubr.f32.gmra.mxu1 %v4055_v40  ;;  %v6318_v61 = vpop.permute.xlu0 %2552  ;;  %v2289_v40 = vsel %vm2262_vm5, %v5775_v49, %v5761_v0  ;;  %v2330_v45 = vmul.f32 %v6233_v54, %v2274_v10  ;;  %v6362_v10 = vrot.slane %v6335_v46, %v5119_v63 }
 0x2d4   : > { %1866 = vmatmul.mubr.f32.gmra.mxu0 %v4067_v1  ;;  %2030 = vmatpush1.msra.mxu1 %v4531_v17  ;;  %8615 = vst [vmem:[#allocation83_spill] sm:$0xff] %v6318_v61  ;;  %v2273_v1 = vsel %vm2262_vm5, %v5761_v0, %v5775_v49  ;;  %v8622_v61 = vld [vmem:[#allocation76_spill] sm:$0xff] }
 0x2d5   : > { %2912 = vrot.lane.b32.xlu0 %v4563_v25, %s4254_s23  ;;  %2362 = vmatpush1.msra.mxu0 %v2334_v24  ;;  %v8618_v24 = vld [vmem:[#allocation55_spill] sm:$0xff] }
 0x2d6   : > { %2031 = vmatprep.subr.mxu1 %v4519_v14  ;;  %2363 = vmatprep.subr.mxu0 %v2333_v56  ;;  %v6320_v3 = vpop.permute.xlu1 %2584  ;;  %v2288_v56 = vsel %vm2262_vm5, %v8619_v12, %v8618_v24 }
 0x2d7   : > { %8616 = vst [vmem:[#allocation82_spill] sm:$0xff] %v6320_v3  ;;  %2944 = vrot.lane.b32.xlu1 %v4567_v26, %s4254_s23  ;;  %2032 = vmatpush1.msra.mxu1 %v4515_v13  ;;  %v8621_v3 = vld [vmem:[#allocation81_spill] sm:$0xff] }
 0x2d8   : > { %2364 = vmatpush1.msra.mxu0 %v2332_v15  ;;  %1549 = vmatprep.mubr.f32.mxu1 %v8519_v8  ;;  %v2329_v15 = vmul.f32 %v6078_v58, %v2289_v40  ;;  %v2646_v0 = vsel %vm2614_vm6, %v8622_v61, %v8621_v3  ;;  %v8623_v40 = vld [vmem:[#allocation3_spill] sm:$0xff] }
 0x2d9   : > { %1871 = vmatprep.mubr.f32.mxu0 %v8519_v8  ;;  %2033 = vmatprep.subr.mxu1 %v8617_v2  ;;  %v6370_v49 = vpop.permute.xlu0 %2550 }
 0x2da   : > { %2365 = vmatprep.subr.mxu0 %v2331_v53  ;;  %1550 = vmatmul.mubr.f32.gmra.mxu1 %v4056_v28  ;;  %v2328_v53 = vmul.f32 %v6233_v54, %v2273_v1  ;;  %v2287_v1 = vsel %vm2262_vm5, %v5909_v5, %v5889_v9 }
 0x2db   : > { %1872 = vmatmul.mubr.f32.gmra.mxu0 %v4068_v60  ;;  %2034 = vmatpush1.msra.mxu1 %v8620_v29  ;;  %v2272_v60 = vsel %vm2262_vm5, %v8618_v24, %v8619_v12  ;;  %v2691_v24 = vmul.f32 %v6362_v10, %v2646_v0  ;;  %v2271_v12 = vsel %vm2262_vm5, %v5889_v9, %v5909_v5 }
 0x2dc   : > { %3266 = vrot.lane.b32.xlu0 %v8612_v59, %s4255_s13  ;;  %2366 = vmatpush1.msra.mxu0 %v2330_v45  ;;  %v6372_v28 = vpop.permute.xlu1 %2582  ;;  %v2327_v59 = vmul.f32 %v6078_v58, %v2288_v56  ;;  %v4057_v45 = vld [vmem:[%s8253_s4 + $0x140] sm:$0xff]  ;;  %v2326_v56 = vmul.f32 %v6233_v54, %v2272_v60  ;;  %v2325_v0 = vmul.f32 %v6078_v58, %v2287_v1 }
 0x2dd   : > { %2035 = vmatprep.subr.mxu1 %v8623_v40  ;;  %2367 = vmatprep.subr.mxu0 %v2329_v15  ;;  %v2286_v15 = vsel %vm2262_vm5, %v5958_v19, %v5948_v32  ;;  %v2324_v5 = vmul.f32 %v6233_v54, %v2271_v12  ;;  %v2270_v60 = vsel %vm2262_vm5, %v5948_v32, %v5958_v19  ;;  %v4070_v32 = vld [vmem:[%s8253_s4 + $0x1a0] sm:$0xff] }
 0x2de   : > { %3298 = vrot.lane.b32.xlu1 %v4589_v30, %s4255_s13  ;;  %2036 = vmatpush1.msra.mxu1 %v8624_v43  ;;  %v4069_v30 = vld [vmem:[%s8253_s4 + $0x198] sm:$0xff]  ;;  %v2323_v1 = vmul.f32 %v6078_v58, %v2286_v15  ;;  %v2269_v19 = vsel %vm2262_vm5, %v6006_v4, %v6022_v55 }
 0x2df   : > { %2368 = vmatpush1.msra.mxu0 %v2328_v53  ;;  %1555 = vmatprep.mubr.f32.mxu1 %v8519_v8  ;;  %v6409_v53 = vpop.permute.xlu0 %2932 }
 0x2e0   : > { %1877 = vmatprep.mubr.f32.mxu0 %v8519_v8  ;;  %2369 = vmatprep.subr.mxu0 %v2327_v59  ;;  %v4058_v59 = vld [vmem:[%s8253_s4 + $0x148] sm:$0xff] }
 0x2e1   : > { %2709 = vmatprep.subr.mxu1 %v2691_v24  ;;  %1556 = vmatmul.mubr.f32.gmra.mxu1 %v4057_v45  ;;  %v2285_v45 = vsel %vm2262_vm5, %v6022_v55, %v6006_v4  ;;  %v2322_v24 = vmul.f32 %v6233_v54, %v2270_v60  ;;  %v2320_v4 = vmul.f32 %v6233_v54, %v2269_v19 }
 0x2e2   : > { %1878 = vmatmul.mubr.f32.gmra.mxu0 %v4069_v30  ;;  %2910 = vrot.lane.b32.xlu0 %v4547_v21, %s4254_s23  ;;  %v6411_v9 = vpop.permute.xlu1 %2964  ;;  %v2284_v30 = vsel %vm2262_vm5, %v6090_v62, %v6071_v34  ;;  %v2321_v12 = vmul.f32 %v6078_v58, %v2285_v45  ;;  %v2268_v55 = vsel %vm2262_vm5, %v6071_v34, %v6090_v62  ;;  %v4060_v45 = vld [vmem:[%s8253_s4 + $0x158] sm:$0xff] }
 0x2e3   : > { %2370 = vmatpush1.msra.mxu0 %v2326_v56  ;;  %2942 = vrot.lane.b32.xlu1 %v4551_v22, %s4254_s23  ;;  %v4059_v56 = vld [vmem:[%s8253_s4 + $0x150] sm:$0xff]  ;;  %v2319_v34 = vmul.f32 %v6078_v58, %v2284_v30  ;;  %v2267_v62 = vsel %vm2262_vm5, %v6115_v44, %v6122_v42  ;;  %v2282_v60 = vsel %vm2262_vm5, %v6150_v47, %v6147_v16 }
 0x2e4   : > { %2371 = vmatprep.subr.mxu0 %v2325_v0  ;;  %1561 = vmatprep.mubr.f32.mxu1 %v8519_v8  ;;  %v2283_v0 = vsel %vm2262_vm5, %v6122_v42, %v6115_v44  ;;  %v2316_v42 = vmul.f32 %v6233_v54, %v2267_v62  ;;  %v2280_v30 = vsel %vm2262_vm5, %v6226_v50, %v6219_v41  ;;  %v4074_v62 = vld [vmem:[%s8253_s4 + $0x1c0] sm:$0xff] }
 0x2e5   : > { %2372 = vmatpush1.msra.mxu0 %v2324_v5  ;;  %1883 = vmatprep.mubr.f32.mxu0 %v8519_v8  ;;  %v6455_v15 = vpop.permute.xlu0 %2930  ;;  %v2318_v5 = vmul.f32 %v6233_v54, %v2268_v55  ;;  %v2317_v44 = vmul.f32 %v6078_v58, %v2283_v0  ;;  %v4061_v0 = vld [vmem:[%s8253_s4 + $0x160] sm:$0xff] }
 0x2e6   : > { %2373 = vmatprep.subr.mxu0 %v2323_v1  ;;  %1562 = vmatmul.mubr.f32.gmra.mxu1 %v4058_v59  ;;  %v2266_v59 = vsel %vm2262_vm5, %v6147_v16, %v6150_v47  ;;  %v2281_v1 = vsel %vm2262_vm5, %v6188_v6, %v6179_v27  ;;  %v4072_v16 = vld [vmem:[%s8253_s4 + $0x1b0] sm:$0xff] }
 0x2e7   : > { %1884 = vmatmul.mubr.f32.gmra.mxu0 %v4070_v32  ;;  %3264 = vrot.lane.b32.xlu0 %v4563_v25, %s4255_s13  ;;  %v2315_v32 = vmul.f32 %v6078_v58, %v2282_v60  ;;  %v2263_v60 = vsel %vm2262_vm5, %v6288_v7, %v6290_v23 }
 0x2e8   : > { %2374 = vmatpush1.msra.mxu0 %v2322_v24  ;;  %3296 = vrot.lane.b32.xlu1 %v4567_v26, %s4255_s13  ;;  %v6457_v25 = vpop.permute.xlu1 %2962  ;;  %v4071_v26 = vld [vmem:[%s8253_s4 + $0x1a8] sm:$0xff]  ;;  %v2265_v24 = vsel %vm2262_vm5, %v6179_v27, %v6188_v6  ;;  %v2264_v27 = vsel %vm2262_vm5, %v6219_v41, %v6226_v50  ;;  %v2313_v6 = vmul.f32 %v6078_v58, %v2281_v1  ;;  %v4073_v41 = vld [vmem:[%s8253_s4 + $0x1b8] sm:$0xff] }
 0x2e9   : > { %2375 = vmatprep.subr.mxu0 %v2321_v12  ;;  %1567 = vmatprep.mubr.f32.mxu1 %v8519_v8  ;;  %v2312_v55 = vmul.f32 %v6233_v54, %v2265_v24  ;;  %v6615_v24 = vrot.slane %v6335_v46, %v5113_v52  ;;  %v4077_v46 = vld [vmem:[%s8253_s4 + $0x1d8] sm:$0xff] }
 0x2ea   : > { %2376 = vmatpush1.msra.mxu0 %v2320_v4  ;;  %1889 = vmatprep.mubr.f32.mxu0 %v8519_v8  ;;  %v2314_v4 = vmul.f32 %v6233_v54, %v2266_v59  ;;  %v2998_v59 = vsel %vm2966_vm8, %v6411_v9, %v6409_v53 }
 0x2eb   : > { %2377 = vmatprep.subr.mxu0 %v2319_v34  ;;  %1568 = vmatmul.mubr.f32.gmra.mxu1 %v4059_v56  ;;  %v6501_v47 = vpop.permute.xlu0 %3284  ;;  %v2311_v56 = vmul.f32 %v6078_v58, %v2280_v30  ;;  %v6550_v34 = vld [vmem:[%s8250_s1 + $0x7] ss:$8 sm:$0x3] }
 0x2ec   : > { %1890 = vmatmul.mubr.f32.gmra.mxu0 %v4071_v26  ;;  %2908 = vrot.lane.b32.xlu0 %v4531_v17, %s4254_s23  ;;  %v4062_v26 = vld [vmem:[%s8253_s4 + $0x168] sm:$0xff] }
 0x2ed   : > { %2378 = vmatpush1.msra.mxu0 %v2318_v5  ;;  %2940 = vrot.lane.b32.xlu1 %v4535_v18, %s4254_s23 }
 0x2ee   : > { %2379 = vmatprep.subr.mxu0 %v2317_v44  ;;  %1573 = vmatprep.mubr.f32.mxu1 %v8519_v8  ;;  %v6503_v19 = vpop.permute.xlu1 %3316 }
 0x2ef   : > { %2380 = vmatpush1.msra.mxu0 %v2316_v42  ;;  %1895 = vmatprep.mubr.f32.mxu0 %v8519_v8  ;;  %v6518_v12 = vsel %vm3318_vm7, %v6501_v47, %v6503_v19  ;;  %v6574_v42 = vrot.slane %v6550_v34, %v5119_v63 }
 0x2f0   : > { %2381 = vmatprep.subr.mxu0 %v2315_v32  ;;  %1574 = vmatmul.mubr.f32.gmra.mxu1 %v4060_v45  ;;  %v2308_v45 = vmul.f32 %v6233_v54, %v2263_v60  ;;  %v8629_v60 = vld [vmem:[#allocation63_spill] sm:$0xff] }
 0x2f1   : > { %1896 = vmatmul.mubr.f32.gmra.mxu0 %v4072_v16  ;;  %3262 = vrot.lane.b32.xlu0 %v4547_v21, %s4255_s13  ;;  %v2310_v21 = vmul.f32 %v6233_v54, %v2264_v27  ;;  %v3043_v54 = vmul.f32 %v6574_v42, %v2998_v59  ;;  %v4076_v16 = vld [vmem:[%s8253_s4 + $0x1d0] sm:$0xff]  ;;  %v8625_v27 = vld [vmem:[#allocation75_spill] sm:$0xff] }
 0x2f2   : > { %2382 = vmatpush1.msra.mxu0 %v2314_v4  ;;  %3294 = vrot.lane.b32.xlu1 %v4551_v22, %s4255_s13  ;;  %v6541_v50 = vpop.permute.xlu0 %2928  ;;  %v2279_v22 = vsel %vm2262_vm5, %v6290_v23, %v6288_v7  ;;  %v4075_v7 = vld [vmem:[%s8253_s4 + $0x1c8] sm:$0xff]  ;;  %v2630_v4 = vsel %vm2614_vm6, %v8621_v3, %v8622_v61  ;;  %v4082_v61 = vld [vmem:[%s8253_s4 + $0x200] sm:$0xff] }
 0x2f3   : > { %2383 = vmatprep.subr.mxu0 %v2313_v6  ;;  %1579 = vmatprep.mubr.f32.mxu1 %v8519_v8  ;;  %v2309_v44 = vmul.f32 %v6078_v58, %v2279_v22  ;;  %v4063_v58 = vld [vmem:[%s8253_s4 + $0x170] sm:$0xff]  ;;  %v8626_v6 = vld [vmem:[#allocation70_spill] sm:$0xff] }
 0x2f4   : > { %2384 = vmatpush1.msra.mxu0 %v2312_v55  ;;  %1901 = vmatprep.mubr.f32.mxu0 %v8519_v8  ;;  %v2645_v55 = vsel %vm2614_vm6, %v8626_v6, %v8625_v27  ;;  %v2629_v3 = vsel %vm2614_vm6, %v8625_v27, %v8626_v6 }
 0x2f5   : > { %1580 = vmatmul.mubr.f32.gmra.mxu1 %v4061_v0  ;;  %1902 = vmatmul.mubr.f32.gmra.mxu0 %v4073_v41  ;;  %v6561_v5 = vpop.permute.xlu1 %2960  ;;  %v8627_v0 = vld [vmem:[#allocation69_spill] sm:$0xff]  ;;  %v8628_v41 = vld [vmem:[#allocation64_spill] sm:$0xff]  ;;  %v2689_v22 = vmul.f32 %v6362_v10, %v2645_v55 }
 0x2f6   : > { %2906 = vrot.lane.b32.xlu0 %v4515_v13, %s4254_s23  ;;  %2385 = vmatprep.subr.mxu0 %v2311_v56  ;;  %v2690_v56 = vmul.f32 %v6615_v24, %v2630_v4 }
 0x2f7   : > { %2386 = vmatpush1.msra.mxu0 %v2310_v21  ;;  %2938 = vrot.lane.b32.xlu1 %v4519_v14, %s4254_s23  ;;  %v2644_v21 = vsel %vm2614_vm6, %v8628_v41, %v8627_v0 }
 0x2f8   : > { %1585 = vmatprep.mubr.f32.mxu1 %v8519_v8  ;;  %1907 = vmatprep.mubr.f32.mxu0 %v8519_v8 }
 0x2f9   : > { %1586 = vmatmul.mubr.f32.gmra.mxu1 %v4062_v26  ;;  %1908 = vmatmul.mubr.f32.gmra.mxu0 %v4074_v62  ;;  %v3283_v23 = vpop.permute.xlu0 %3282  ;;  %v2688_v62 = vmul.f32 %v6615_v24, %v2629_v3 }
 0x2fa   : > { %3260 = vrot.lane.b32.xlu0 %v4531_v17, %s4255_s13  ;;  %1591 = vmatprep.mubr.f32.mxu1 %v8519_v8 }
 0x2fb   : > { %3292 = vrot.lane.b32.xlu1 %v4535_v18, %s4255_s13  ;;  %1913 = vmatprep.mubr.f32.mxu0 %v8519_v8  ;;  %v4064_v18 = vld [vmem:[%s8253_s4 + $0x178] sm:$0xff] }
 0x2fc   : > { %2387 = vmatprep.subr.mxu0 %v2309_v44  ;;  %v3315_v17 = vpop.permute.xlu1 %3314  ;;  %v8630_v44 = vld [vmem:[#allocation95_spill] sm:$0xff] }
 0x2fd   : > { %1592 = vmatmul.mubr.f32.gmra.mxu1 %v4063_v58  ;;  %1914 = vmatmul.mubr.f32.gmra.mxu0 %v4075_v7  ;;  %v6596_v1 = vsel %vm3318_vm7, %v3283_v23, %v3315_v17  ;;  %v6600_v32 = vsel %vm3318_vm7, %v3315_v17, %v3283_v23  ;;  %v2643_v59 = vsel %vm2614_vm6, %v8630_v44, %v8629_v60  ;;  %v4078_v58 = vld [vmem:[%s8253_s4 + $0x1e0] sm:$0xff]  ;;  %v4083_v7 = vld [vmem:[%s8253_s4 + $0x208] sm:$0xff] }
 0x2fe   : > { %2904 = vrot.lane.b32.xlu0 %v8620_v29, %s4254_s23  ;;  %2388 = vmatpush1.msra.mxu0 %v2308_v45  ;;  %v2687_v45 = vmul.f32 %v6362_v10, %v2644_v21  ;;  %v2685_v27 = vmul.f32 %v6362_v10, %v2643_v59  ;;  %v2639_v59 = vsel %vm2614_vm6, %v5993_v31, %v5979_v39 }
 0x2ff   : > { %2936 = vrot.lane.b32.xlu1 %v8617_v2, %s4254_s23  ;;  %1597 = vmatprep.mubr.f32.mxu1 %v8519_v8 }
 0x300   : > { %1919 = vmatprep.mubr.f32.mxu0 %v8519_v8  ;;  %3061 = vmatprep.subr.mxu0 %v3043_v54  ;;  %v6618_v30 = vpop.permute.xlu0 %2926  ;;  %v2627_v54 = vsel %vm2614_vm6, %v8629_v60, %v8630_v44 }
 0x301   : > { %1598 = vmatmul.mubr.f32.gmra.mxu1 %v4064_v18  ;;  %1920 = vmatmul.mubr.f32.gmra.mxu0 %v4076_v16  ;;  %v8631_v18 = vld [vmem:[#allocation94_spill] sm:$0xff]  ;;  %v8632_v16 = vld [vmem:[#allocation56_spill] sm:$0xff]  ;;  %v2684_v55 = vmul.f32 %v6615_v24, %v2627_v54 }
 0x302   : > { %3258 = vrot.lane.b32.xlu0 %v4515_v13, %s4255_s13  ;;  %1925 = vmatprep.mubr.f32.mxu0 %v8519_v8  ;;  %v2642_v4 = vsel %vm2614_vm6, %v8632_v16, %v8631_v18 }
 0x303   : > { %3290 = vrot.lane.b32.xlu1 %v4519_v14, %s4255_s13  ;;  %2069 = vmatprep.mubr.f32.mxu1 %v8519_v8  ;;  %v6644_v13 = vpop.permute.xlu1 %2958  ;;  %v2628_v14 = vsel %vm2614_vm6, %v8627_v0, %v8628_v41  ;;  %v4079_v0 = vld [vmem:[%s8253_s4 + $0x1e8] sm:$0xff]  ;;  %v4084_v41 = vld [vmem:[%s8253_s4 + $0x210] sm:$0xff] }
 0x304   : > { %v2686_v17 = vmul.f32 %v6615_v24, %v2628_v14 }
 0x305   : > { %1926 = vmatmul.mubr.f32.gmra.mxu0 %v4077_v46  ;;  %2070 = vmatmul.mubr.f32.vlgmr.msra.gmra.mxu1 %v4082_v61  ;;  %v6652_v26 = vpop.permute.xlu0 %3280  ;;  %v2626_v46 = vsel %vm2614_vm6, %v8631_v18, %v8632_v16  ;;  %v8633_v61 = vld [vmem:[#allocation90_spill] sm:$0xff]  ;;  %v2622_v16 = vsel %vm2614_vm6, %v6032_v35, %v6058_v48 }
 0x306   : > { %2710 = vmatpush1.msra.mxu1 %v2690_v56  ;;  %2902 = vrot.lane.b32.xlu0 %v8624_v43, %s4254_s23  ;;  %v2641_v3 = vsel %vm2614_vm6, %v5879_v33, %v8633_v61  ;;  %v2683_v56 = vmul.f32 %v6362_v10, %v2642_v4  ;;  %v2625_v21 = vsel %vm2614_vm6, %v8633_v61, %v5879_v33  ;;  %v4081_v61 = vld [vmem:[%s8253_s4 + $0x1f8] sm:$0xff] }
 0x307   : > { %2711 = vmatprep.subr.mxu1 %v2689_v22  ;;  %2934 = vrot.lane.b32.xlu1 %v8623_v40, %s4254_s23  ;;  %v6674_v23 = vpop.permute.xlu1 %3312  ;;  %v8634_v22 = vld [vmem:[#allocation48_spill] sm:$0xff]  ;;  %v2681_v14 = vmul.f32 %v6362_v10, %v2641_v3  ;;  %v2680_v60 = vmul.f32 %v6615_v24, %v2625_v21  ;;  %v8637_v21 = vld [vmem:[#allocation86_spill] sm:$0xff] }
 0x308   : > { %2712 = vmatpush1.msra.mxu1 %v2688_v62  ;;  %1931 = vmatprep.mubr.f32.mxu0 %v8519_v8  ;;  %v2640_v62 = vsel %vm2614_vm6, %v8634_v22, %v5919_v38  ;;  %v2624_v33 = vsel %vm2614_vm6, %v5919_v38, %v8634_v22  ;;  %v4080_v38 = vld [vmem:[%s8253_s4 + $0x1f0] sm:$0xff] }
 0x309   : > { %2075 = vmatprep.mubr.f32.mxu1 %v8519_v8  ;;  %2713 = vmatprep.subr.mxu1 %v2687_v45  ;;  %v2679_v45 = vmul.f32 %v6362_v10, %v2640_v62  ;;  %v2678_v54 = vmul.f32 %v6615_v24, %v2624_v33 }
 0x30a   : > { %1932 = vmatmul.mubr.f32.gmra.mxu0 %v4078_v58  ;;  %2076 = vmatmul.mubr.f32.gmra.mxu1 %v4083_v7  ;;  %v6688_v6 = vpop.permute.xlu0 %2924  ;;  %v2623_v7 = vsel %vm2614_vm6, %v5979_v39, %v5993_v31  ;;  %v3620_v39 = vld [vmem:[%s8254_s5 + $0x70] sm:$0xff]  ;;  %v2677_v31 = vmul.f32 %v6362_v10, %v2639_v59  ;;  %v2635_v59 = vsel %vm2614_vm6, %v6169_v57, %v6164_v51 }
 0x30b   : > { %2714 = vmatpush1.msra.mxu1 %v2686_v17  ;;  %3256 = vrot.lane.b32.xlu0 %v8620_v29, %s4255_s13  ;;  %v2638_v17 = vsel %vm2614_vm6, %v6058_v48, %v6032_v35  ;;  %v2676_v18 = vmul.f32 %v6615_v24, %v2623_v7  ;;  %v4086_v35 = vld [vmem:[%s8253_s4 + $0x220] sm:$0xff] }
 0x30c   : > { %2715 = vmatprep.subr.mxu1 %v2685_v27  ;;  %3288 = vrot.lane.b32.xlu1 %v8617_v2, %s4255_s13  ;;  %v6710_v29 = vpop.permute.xlu1 %2956  ;;  %v2682_v2 = vmul.f32 %v6615_v24, %v2626_v46  ;;  %v8635_v27 = vld [vmem:[#allocation47_spill] sm:$0xff]  ;;  %v2675_v46 = vmul.f32 %v6362_v10, %v2638_v17  ;;  %v2619_v17 = vsel %vm2614_vm6, %v6164_v51, %v6169_v57  ;;  %v3616_v57 = vld [vmem:[%s8254_s5 + $0x50] sm:$0xff] }
 0x30d   : > { %2716 = vmatpush1.msra.mxu1 %v2684_v55  ;;  %1937 = vmatprep.mubr.f32.mxu0 %v8519_v8  ;;  %v2637_v55 = vsel %vm2614_vm6, %v8635_v27, %v6098_v20  ;;  %v2621_v3 = vsel %vm2614_vm6, %v6098_v20, %v8635_v27  ;;  %v3618_v20 = vld [vmem:[%s8254_s5 + $0x60] sm:$0xff]  ;;  %v2669_v51 = vmul.f32 %v6362_v10, %v2635_v59 }
 0x30e   : > { %2081 = vmatprep.mubr.f32.mxu1 %v8519_v8  ;;  %2717 = vmatprep.subr.mxu1 %v2683_v56  ;;  %v3619_v56 = vld [vmem:[%s8254_s5 + $0x68] sm:$0xff]  ;;  %v2673_v22 = vmul.f32 %v6362_v10, %v2637_v55  ;;  %v2672_v62 = vmul.f32 %v6615_v24, %v2621_v3  ;;  %v2996_v27 = vsel %vm2966_vm8, %v6561_v5, %v6541_v50 }
 0x30f   : > { %1938 = vmatmul.mubr.f32.gmra.mxu0 %v4079_v0  ;;  %2082 = vmatmul.mubr.f32.gmra.mxu1 %v4084_v41  ;;  %v2674_v0 = vmul.f32 %v6615_v24, %v2622_v16  ;;  %v8636_v41 = vld [vmem:[#allocation87_spill] sm:$0xff]  ;;  %v2995_v3 = vsel %vm2966_vm8, %v6644_v13, %v6618_v30 }
 0x310   : > { %2718 = vmatpush1.msra.mxu1 %v2682_v2  ;;  %3254 = vrot.lane.b32.xlu0 %v8624_v43, %s4255_s13  ;;  %v6731_v44 = vpop.permute.xlu0 %3278  ;;  %v4085_v43 = vld [vmem:[%s8253_s4 + $0x218] sm:$0xff]  ;;  %v2636_v2 = vsel %vm2614_vm6, %v8637_v21, %v8636_v41 }
 0x311   : > { %2719 = vmatprep.subr.mxu1 %v2681_v14  ;;  %3286 = vrot.lane.b32.xlu1 %v8623_v40, %s4255_s13  ;;  %v6746_v58 = vpop.permute.xlu1 %3310  ;;  %v3621_v40 = vld [vmem:[%s8254_s5 + $0x78] sm:$0xff]  ;;  %v2620_v14 = vsel %vm2614_vm6, %v8636_v41, %v8637_v21  ;;  %v8638_v41 = vld [vmem:[#allocation40_spill] sm:$0xff]  ;;  %v8639_v21 = vld [vmem:[#allocation39_spill] sm:$0xff] }
 0x312   : > { %2720 = vmatpush1.msra.mxu1 %v2680_v60  ;;  %1943 = vmatprep.mubr.f32.mxu0 %v8519_v8  ;;  %v6811_v60 = vrot.slane %v6550_v34, %v5113_v52  ;;  %v4087_v34 = vld [vmem:[%s8253_s4 + $0x228] sm:$0xff] }
 0x313   : > { %2087 = vmatprep.mubr.f32.mxu1 %v8519_v8  ;;  %2721 = vmatprep.subr.mxu1 %v2679_v45  ;;  %v2982_v45 = vsel %vm2966_vm8, %v6409_v53, %v6411_v9  ;;  %v2997_v53 = vsel %vm2966_vm8, %v6457_v25, %v6455_v15  ;;  %v4099_v9 = vld [vmem:[%s8253_s4 + $0x280] sm:$0xff] }
 0x314   : > { %1944 = vmatmul.mubr.f32.gmra.mxu0 %v4080_v38  ;;  %2088 = vmatmul.mubr.f32.gmra.mxu1 %v4085_v43  ;;  %v2671_v38 = vmul.f32 %v6362_v10, %v2636_v2  ;;  %v3617_v43 = vld [vmem:[%s8254_s5 + $0x58] sm:$0xff]  ;;  %v3042_v16 = vmul.f32 %v6811_v60, %v2982_v45  ;;  %v3039_v2 = vmul.f32 %v6574_v42, %v2996_v27 }
 0x315   : > { %2722 = vmatpush1.msra.mxu1 %v2678_v54  ;;  %3699 = vperm.xlu0 %4220, %v3621_v40   ;;  %v6771_v4 = vpop.permute.xlu0 %2922  ;;  %v2670_v54 = vmul.f32 %v6615_v24, %v2620_v14  ;;  %v2617_v45 = vsel %vm2614_vm6, %v8638_v41, %v8639_v21 }
 0x316   : > { %2723 = vmatprep.subr.mxu1 %v2677_v31  ;;  %3694 = vperm.xlu1 %4221, %v3620_v39   ;;  %v6784_v48 = vpop.permute.xlu1 %2954  ;;  %v2981_v39 = vsel %vm2966_vm8, %v6455_v15, %v6457_v25  ;;  %v3041_v25 = vmul.f32 %v6574_v42, %v2997_v53 }
 0x317   : > { %2724 = vmatpush1.msra.mxu1 %v2676_v18  ;;  %1949 = vmatprep.mubr.f32.mxu0 %v8519_v8  ;;  %v2634_v18 = vsel %vm2614_vm6, %v6206_v11, %v6193_v36 }
 0x318   : > { %2093 = vmatprep.mubr.f32.mxu1 %v8519_v8  ;;  %2725 = vmatprep.subr.mxu1 %v2675_v46  ;;  %v2668_v46 = vmul.f32 %v6615_v24, %v2619_v17  ;;  %v8641_v17 = vld [vmem:[#allocation82_spill] sm:$0xff] }
 0x319   : > { %1950 = vmatmul.mubr.f32.gmra.mxu0 %v4081_v61  ;;  %2094 = vmatmul.mubr.f32.gmra.mxu1 %v4086_v35  ;;  %v2618_v61 = vsel %vm2614_vm6, %v6193_v36, %v6206_v11  ;;  %v3040_v35 = vmul.f32 %v6811_v60, %v2981_v39  ;;  %v2633_v36 = vsel %vm2614_vm6, %v8639_v21, %v8638_v41 }
 0x31a   : > { %3689 = vperm.xlu0 %4220, %v3619_v56   ;;  %2726 = vmatpush1.msra.mxu1 %v2674_v0  ;;  %v6813_v33 = vpop.permute.xlu0 %3276  ;;  %v2667_v56 = vmul.f32 %v6362_v10, %v2634_v18  ;;  %v2980_v11 = vsel %vm2966_vm8, %v6541_v50, %v6561_v5  ;;  %v2666_v14 = vmul.f32 %v6615_v24, %v2618_v61  ;;  %v4100_v50 = vld [vmem:[%s8253_s4 + $0x288] sm:$0xff] }
 0x31b   : > { %2727 = vmatprep.subr.mxu1 %v2673_v22  ;;  %3684 = vperm.xlu1 %4221, %v3618_v20   ;;  %v6830_v7 = vpop.permute.xlu1 %3308  ;;  %v6832_v40 = vpop.f32.mrf.mxu1  ;;  %v4088_v20 = vld [vmem:[%s8253_s4 + $0x230] sm:$0xff]  ;;  %v3615_v22 = vld [vmem:[%s8254_s5 + $0x48] sm:$0xff]  ;;  %v3038_v53 = vmul.f32 %v6811_v60, %v2980_v11  ;;  %v2631_v61 = vsel %vm2614_vm6, %v6372_v28, %v6370_v49  ;;  %v2615_v41 = vsel %vm2614_vm6, %v6370_v49, %v6372_v28 }
 0x31c   : > { %2728 = vmatpush1.msra.mxu1 %v2672_v62  ;;  %2099 = vmatprep.mubr.f32.mxu1 %v8519_v8  ;;  %v2661_v28 = vmul.f32 %v6362_v10, %v2631_v61 }
 0x31d   : > { %2421 = vmatprep.mubr.f32.mxu0 %v8519_v8  ;;  %2729 = vmatprep.subr.mxu1 %v2671_v38  ;;  %v6852_v31 = vpop.f32.mrf.mxu1  ;;  %v2979_v38 = vsel %vm2966_vm8, %v6618_v30, %v6644_v13  ;;  %v2664_v30 = vmul.f32 %v6615_v24, %v2617_v45  ;;  %v6934_v13 = vld [vmem:[%s8250_s1 + $0x10] ss:$8 sm:$0x3]  ;;  %v3610_v45 = vld [vmem:[%s8254_s5 + $0x20] sm:$0xff] }
 0x31e   : > { %2100 = vmatmul.mubr.f32.gmra.mxu1 %v4087_v34  ;;  %3679 = vperm.xlu0 %4220, %v3617_v43   ;;  %v6863_v15 = vpop.permute.xlu0 %2920  ;;  %v3037_v34 = vmul.f32 %v6574_v42, %v2995_v3  ;;  %v2665_v43 = vmul.f32 %v6362_v10, %v2633_v36  ;;  %v3036_v18 = vmul.f32 %v6811_v60, %v2979_v38  ;;  %v4101_v3 = vld [vmem:[%s8253_s4 + $0x290] sm:$0xff] }
 0x31f   : > { %2422 = vmatmul.mubr.f32.vlgmr.msra.gmra.mxu0 %v4099_v9  ;;  %2730 = vmatpush1.msra.mxu1 %v2670_v54  ;;  %v6870_v55 = vpop.permute.xlu1 %2952  ;;  %v3614_v9 = vld [vmem:[%s8254_s5 + $0x40] sm:$0xff]  ;;  %v8640_v54 = vld [vmem:[#allocation83_spill] sm:$0xff]  ;;  %v6969_v21 = vrot.slane %v6934_v13, %v5119_v63  ;;  %v3612_v36 = vld [vmem:[%s8254_s5 + $0x30] sm:$0xff]  ;;  %v2994_v63 = vsel %vm2966_vm8, %v6710_v29, %v6688_v6 }
 0x320   : > { %3062 = vmatpush1.msra.mxu0 %v3042_v16  ;;  %2731 = vmatprep.subr.mxu1 %v2669_v51  ;;  %v2632_v39 = vsel %vm2614_vm6, %v8641_v17, %v8640_v54 }
 0x321   : > { %3063 = vmatprep.subr.mxu0 %v3041_v25  ;;  %3674 = vperm.xlu1 %4221, %v3616_v57   ;;  %v6883_v0 = vpop.f32.mrf.mxu1  ;;  %v2616_v57 = vsel %vm2614_vm6, %v8640_v54, %v8641_v17  ;;  %v4089_v25 = vld [vmem:[%s8253_s4 + $0x238] sm:$0xff] }
 0x322   : > { %2732 = vmatpush1.msra.mxu1 %v2668_v46  ;;  %3064 = vmatpush1.msra.mxu0 %v3040_v35  ;;  %v6900_v62 = vpop.permute.xlu0 %3274  ;;  %v2663_v46 = vmul.f32 %v6362_v10, %v2632_v39  ;;  %v3613_v35 = vld [vmem:[%s8254_s5 + $0x38] sm:$0xff]  ;;  %v2662_v11 = vmul.f32 %v6615_v24, %v2616_v57  ;;  %v4103_v39 = vld [vmem:[%s8253_s4 + $0x2a0] sm:$0xff]  ;;  %v2992_v57 = vsel %vm2966_vm8, %v6870_v55, %v6863_v15 }
 0x323   : > { %2105 = vmatprep.mubr.f32.mxu1 %v8519_v8  ;;  %2427 = vmatprep.mubr.f32.mxu0 %v8519_v8  ;;  %v6908_v5 = vpop.permute.xlu1 %3306  ;;  %v6910_v59 = vpop.f32.mrf.mxu1  ;;  %v3609_v17 = vld [vmem:[%s8254_s5 + $0x18] sm:$0xff] }
 0x324   : > { %2733 = vmatprep.subr.mxu1 %v2667_v56  ;;  %3065 = vmatprep.subr.mxu0 %v3039_v2  ;;  %v3350_v2 = vsel %vm3318_vm7, %v6503_v19, %v6501_v47  ;;  %v2660_v47 = vmul.f32 %v6615_v24, %v2615_v41  ;;  %v4090_v19 = vld [vmem:[%s8253_s4 + $0x240] sm:$0xff]  ;;  %v4102_v24 = vld [vmem:[%s8253_s4 + $0x298] sm:$0xff] }
 0x325   : > { %2106 = vmatmul.mubr.f32.gmra.mxu1 %v4088_v20  ;;  %3669 = vperm.xlu0 %4220, %v3615_v22   ;;  %v2978_v20 = vsel %vm2966_vm8, %v6688_v6, %v6710_v29  ;;  %v3395_v10 = vmul.f32 %v6969_v21, %v3350_v2  ;;  %v3611_v6 = vld [vmem:[%s8254_s5 + $0x28] sm:$0xff] }
 0x326   : > { %2428 = vmatmul.mubr.f32.gmra.mxu0 %v4100_v50  ;;  %2734 = vmatpush1.msra.mxu1 %v2666_v14  ;;  %v3035_v50 = vmul.f32 %v6574_v42, %v2994_v63  ;;  %v3034_v29 = vmul.f32 %v6811_v60, %v2978_v20  ;;  %v4093_v63 = vld [vmem:[%s8253_s4 + $0x258] sm:$0xff] }
 0x327   : > { %3066 = vmatpush1.msra.mxu0 %v3038_v53  ;;  %2735 = vmatprep.subr.mxu1 %v2665_v43  ;;  %v6937_v16 = vpop.permute.xlu0 %2918  ;;  %v6939_v51 = vpop.f32.mrf.mxu1  ;;  %v2977_v53 = vsel %vm2966_vm8, %v6771_v4, %v6784_v48 }
 0x328   : > { %3067 = vmatprep.subr.mxu0 %v3037_v34  ;;  %3664 = vperm.xlu1 %4221, %v3614_v9   ;;  %v6948_v27 = vpop.permute.xlu1 %2950  ;;  %v2993_v34 = vsel %vm2966_vm8, %v6784_v48, %v6771_v4  ;;  %v4091_v9 = vld [vmem:[%s8253_s4 + $0x248] sm:$0xff]  ;;  %v3608_v48 = vld [vmem:[%s8254_s5 + $0x10] sm:$0xff] }
 0x329   : > { %2736 = vmatpush1.msra.mxu1 %v2664_v30  ;;  %3068 = vmatpush1.msra.mxu0 %v3036_v18  ;;  %v6961_v56 = vpop.f32.mrf.mxu1  ;;  %v3033_v4 = vmul.f32 %v6574_v42, %v2993_v34  ;;  %v3032_v18 = vmul.f32 %v6811_v60, %v2977_v53  ;;  %v2991_v2 = vsel %vm2966_vm8, %v6948_v27, %v6937_v16  ;;  %v4094_v34 = vld [vmem:[%s8253_s4 + $0x260] sm:$0xff] }
 0x32a   : > { %2111 = vmatprep.mubr.f32.mxu1 %v8519_v8  ;;  %2433 = vmatprep.mubr.f32.mxu0 %v8519_v8 }
 0x32b   : > { %2737 = vmatprep.subr.mxu1 %v2663_v46  ;;  %2112 = vmatmul.mubr.f32.gmra.mxu1 %v4089_v25  ;;  %v6985_v49 = vpop.permute.xlu0 %3272  ;;  %v4092_v25 = vld [vmem:[%s8253_s4 + $0x250] sm:$0xff]  ;;  %v2976_v46 = vsel %vm2966_vm8, %v6863_v15, %v6870_v55  ;;  %v3606_v15 = vld [vmem:[%s8254_s5] sm:$0xff]  ;;  %v3031_v55 = vmul.f32 %v6574_v42, %v2992_v57  ;;  %v4095_v57 = vld [vmem:[%s8253_s4 + $0x268] sm:$0xff] }
 0x32c   : > { %3659 = vperm.xlu0 %4220, %v3613_v35   ;;  %2434 = vmatmul.mubr.f32.gmra.mxu0 %v4101_v3  ;;  %v6992_v22 = vpop.permute.xlu1 %3304  ;;  %v3607_v35 = vld [vmem:[%s8254_s5 + $0x8] sm:$0xff] }
 0x32d   : > { %2738 = vmatpush1.msra.mxu1 %v2662_v11  ;;  %3654 = vperm.xlu1 %4221, %v3612_v36   ;;  %v6998_v14 = vpop.f32.mrf.mxu1  ;;  %v4104_v3 = vld [vmem:[%s8253_s4 + $0x2a8] sm:$0xff]  ;;  %v3030_v11 = vmul.f32 %v6811_v60, %v2976_v46 }
 0x32e   : > { %2739 = vmatprep.subr.mxu1 %v2661_v28  ;;  %2117 = vmatprep.mubr.f32.mxu1 %v8519_v8  ;;  %v2975_v28 = vsel %vm2966_vm8, %v6937_v16, %v6948_v27  ;;  %v3743_v16 = vld [vmem:[%s8256_s7 + $0x8] sm:$0xff]  ;;  %v3029_v27 = vmul.f32 %v6574_v42, %v2991_v2 }
 0x32f   : > { %2740 = vmatpush1.msra.mxu1 %v2660_v47  ;;  %2439 = vmatprep.mubr.f32.mxu0 %v8519_v8  ;;  %v7014_v38 = vpop.f32.mrf.mxu1  ;;  %v3742_v47 = vld [vmem:[%s8256_s7] sm:$0xff] }
 0x330   : > { %3413 = vmatprep.subr.mxu1 %v3395_v10  ;;  %2118 = vmatmul.mubr.f32.gmra.mxu1 %v4090_v19  ;;  %v7020_v43 = vpop.permute.xlu0 %2916  ;;  %v4105_v19 = vld [vmem:[%s8253_s4 + $0x2b0] sm:$0xff] }
 0x331   : > { %3649 = vperm.xlu0 %4220, %v3611_v6   ;;  %2440 = vmatmul.mubr.f32.gmra.mxu0 %v4102_v24  ;;  %v2949_v54 = vpop.permute.xlu1 %2948  ;;  %v3028_v6 = vmul.f32 %v6811_v60, %v2975_v28 }
 0x332   : > { %3069 = vmatprep.subr.mxu0 %v3035_v50  ;;  %3644 = vperm.xlu1 %4221, %v3610_v45   ;;  %v2990_v24 = vsel %vm2966_vm8, %v2949_v54, %v7020_v43 }
 0x333   : > { %3070 = vmatpush1.msra.mxu0 %v3034_v29  ;;  %2123 = vmatprep.mubr.f32.mxu1 %v8519_v8  ;;  %v7040_v30 = vpop.f32.mrf.mxu1 }
 0x334   : > { %2445 = vmatprep.mubr.f32.mxu0 %v8519_v8  ;;  %2124 = vmatmul.mubr.f32.gmra.mxu1 %v4091_v9 }
 0x335   : > { %3639 = vperm.xlu0 %4220, %v3609_v17   ;;  %2446 = vmatmul.mubr.f32.gmra.mxu0 %v4103_v39  ;;  %v7055_v61 = vpop.f32.mrf.mxu1  ;;  %v7064_v41 = vpop.permute.xlu0 %3270  ;;  %v3744_v17 = vld [vmem:[%s8256_s7 + $0x10] sm:$0xff]  ;;  %v4106_v39 = vld [vmem:[%s8253_s4 + $0x2b8] sm:$0xff] }
 0x336   : > { %3634 = vperm.xlu1 %4221, %v3608_v48   ;;  %2129 = vmatprep.mubr.f32.mxu1 %v8519_v8  ;;  %v7071_v36 = vpop.permute.xlu1 %3302 }
 0x337   : > { %2451 = vmatprep.mubr.f32.mxu0 %v8519_v8  ;;  %3071 = vmatprep.subr.mxu0 %v3033_v4 }
 0x338   : > { %2130 = vmatmul.mubr.f32.gmra.mxu1 %v4092_v25  ;;  %3072 = vmatpush1.msra.mxu0 %v3032_v18 }
 0x339   : > { %3629 = vperm.xlu0 %4220, %v3607_v35   ;;  %2452 = vmatmul.mubr.f32.gmra.mxu0 %v4104_v3  ;;  %v7085_v20 = vpop.f32.mrf.mxu1  ;;  %v3746_v35 = vld [vmem:[%s8256_s7 + $0x20] sm:$0xff] }
 0x33a   : > { %3624 = vperm.xlu1 %4221, %v3606_v15   ;;  %2135 = vmatprep.mubr.f32.mxu1 %v8519_v8  ;;  %v1189_v10 = vpop.f32.mrf.mxu0  ;;  %v2915_v29 = vpop.permute.xlu0 %2914  ;;  %v4107_v3 = vld [vmem:[%s8253_s4 + $0x2c0] sm:$0xff] }
 0x33b   : > { %2457 = vmatprep.mubr.f32.mxu0 %v8519_v8  ;;  %3073 = vmatprep.subr.mxu0 %v3031_v55  ;;  %v7100_v50 = vadd.f32 %v1189_v10, %v6832_v40  ;;  %v7106_v45 = vpop.f32.mrf.mxu1  ;;  %v2974_v40 = vsel %vm2966_vm8, %v7020_v43, %v2949_v54  ;;  %v2947_v53 = vpop.permute.xlu1 %2946  ;;  %v3745_v43 = vld [vmem:[%s8256_s7 + $0x18] sm:$0xff]  ;;  %v3027_v54 = vmul.f32 %v6574_v42, %v2990_v24  ;;  %v3748_v10 = vld [vmem:[%s8256_s7 + $0x30] sm:$0xff] }
 0x33c   : > { %2136 = vmatmul.mubr.f32.gmra.mxu1 %v4093_v63  ;;  %3074 = vmatpush1.msra.mxu0 %v3030_v11  ;;  %v7114_v9 = vpop.f32.mrf.mxu0  ;;  %v3026_v4 = vmul.f32 %v6811_v60, %v2974_v40  ;;  %v2989_v48 = vsel %vm2966_vm8, %v2947_v53, %v2915_v29  ;;  %v2973_v25 = vsel %vm2966_vm8, %v2915_v29, %v2947_v53  ;;  %v3747_v11 = vld [vmem:[%s8256_s7 + $0x28] sm:$0xff] }
 0x33d   : > { %3752 = vperm.xlu0 %4220, %v3742_v47   ;;  %2458 = vmatmul.mubr.f32.gmra.mxu0 %v4105_v19  ;;  %v3025_v2 = vmul.f32 %v6574_v42, %v2989_v48  ;;  %v3024_v47 = vmul.f32 %v6811_v60, %v2973_v25  ;;  %v4116_v25 = vld [vmem:[%s8253_s4 + $0x300] sm:$0xff] }
 0x33e   : > { %3757 = vperm.xlu1 %4221, %v3743_v16   ;;  %2141 = vmatprep.mubr.f32.mxu1 %v8519_v8  ;;  %v4108_v16 = vld [vmem:[%s8253_s4 + $0x2c8] sm:$0xff] }
 0x33f   : > { %2463 = vmatprep.mubr.f32.mxu0 %v8519_v8  ;;  %3075 = vmatprep.subr.mxu0 %v3029_v27  ;;  %v3749_v27 = vld [vmem:[%s8256_s7 + $0x38] sm:$0xff] }
 0x340   : > { %2142 = vmatmul.mubr.f32.gmra.mxu1 %v4094_v34  ;;  %3076 = vmatpush1.msra.mxu0 %v3028_v6  ;;  %v7131_v18 = vpop.f32.mrf.mxu1  ;;  %v7145_v15 = vpop.permute.xlu0 %3268  ;;  %v4097_v34 = vld [vmem:[%s8253_s4 + $0x278] sm:$0xff] }
 0x341   : > { %3762 = vperm.xlu0 %4220, %v3744_v17   ;;  %2464 = vmatmul.mubr.f32.gmra.mxu0 %v4106_v39  ;;  %v1195_v46 = vpop.f32.mrf.mxu0  ;;  %v4109_v17 = vld [vmem:[%s8253_s4 + $0x2d0] sm:$0xff] }
 0x342   : > { %3767 = vperm.xlu1 %4221, %v3745_v43   ;;  %2147 = vmatprep.mubr.f32.mxu1 %v8519_v8  ;;  %v7148_v55 = vadd.f32 %v1195_v46, %v6883_v0  ;;  %v7155_v63 = vpop.permute.xlu1 %3300  ;;  %v7157_v28 = vpop.f32.mrf.mxu1  ;;  %v4096_v0 = vld [vmem:[%s8253_s4 + $0x270] sm:$0xff] }
 0x343   : > { %2469 = vmatprep.mubr.f32.mxu0 %v8519_v8  ;;  %3077 = vmatprep.subr.mxu0 %v3027_v54  ;;  %v7160_v19 = vpop.f32.mrf.mxu0 }
 0x344   : > { %2148 = vmatmul.mubr.f32.gmra.mxu1 %v4095_v57  ;;  %3078 = vmatpush1.msra.mxu0 %v3026_v4  ;;  %v7196_v4 = vrot.slane %v6934_v13, %v5113_v52  ;;  %v4110_v52 = vld [vmem:[%s8253_s4 + $0x2d8] sm:$0xff] }
 0x345   : > { %3772 = vperm.xlu0 %4220, %v3746_v35   ;;  %2470 = vmatmul.mubr.f32.gmra.mxu0 %v4107_v3  ;;  %v3348_v3 = vsel %vm3318_vm7, %v6674_v23, %v6652_v26 }
 0x346   : > { %3777 = vperm.xlu1 %4221, %v3747_v11   ;;  %2153 = vmatprep.mubr.f32.mxu1 %v8519_v8  ;;  %v3394_v35 = vmul.f32 %v7196_v4, %v6518_v12 }
 0x347   : > { %2475 = vmatprep.mubr.f32.mxu0 %v8519_v8  ;;  %3079 = vmatprep.subr.mxu0 %v3025_v2  ;;  %v7176_v6 = vpop.f32.mrf.mxu1  ;;  %v2913_v24 = vpop.permute.xlu0 %2912  ;;  %v3393_v2 = vmul.f32 %v6969_v21, %v6600_v32  ;;  %v3347_v32 = vsel %vm3318_vm7, %v6746_v58, %v6731_v44 }
 0x348   : > { %2154 = vmatmul.mubr.f32.gmra.mxu1 %v4096_v0  ;;  %3080 = vmatpush1.msra.mxu0 %v3024_v47  ;;  %v1201_v29 = vpop.f32.mrf.mxu0  ;;  %v3332_v47 = vsel %vm3318_vm7, %v6652_v26, %v6674_v23  ;;  %v4117_v26 = vld [vmem:[%s8253_s4 + $0x308] sm:$0xff] }
 0x349   : > { %3782 = vperm.xlu0 %4220, %v3748_v10   ;;  %2476 = vmatmul.mubr.f32.gmra.mxu0 %v4108_v16  ;;  %v2945_v40 = vpop.permute.xlu1 %2944  ;;  %v7182_v53 = vadd.f32 %v1201_v29, %v6939_v51  ;;  %v7192_v54 = vpop.f32.mrf.mxu1  ;;  %v3392_v16 = vmul.f32 %v7196_v4, %v6596_v1  ;;  %v3331_v1 = vsel %vm3318_vm7, %v6731_v44, %v6746_v58 }
 0x34a   : > { %3787 = vperm.xlu1 %4221, %v3749_v27   ;;  %2159 = vmatprep.mubr.f32.mxu1 %v8519_v8  ;;  %v2972_v39 = vsel %vm2966_vm8, %v2913_v24, %v2945_v40  ;;  %v2988_v43 = vsel %vm2966_vm8, %v2945_v40, %v2913_v24  ;;  %v7201_v57 = vpop.f32.mrf.mxu0  ;;  %v4111_v27 = vld [vmem:[%s8253_s4 + $0x2e0] sm:$0xff]  ;;  %v3390_v24 = vmul.f32 %v7196_v4, %v3332_v47 }
 0x34b   : > { %2481 = vmatprep.mubr.f32.mxu0 %v8519_v8  ;;  %v3022_v51 = vmul.f32 %v6811_v60, %v2972_v39  ;;  %v3023_v48 = vmul.f32 %v6574_v42, %v2988_v43  ;;  %v3346_v29 = vsel %vm3318_vm7, %v6830_v7, %v6813_v33  ;;  %v3330_v44 = vsel %vm3318_vm7, %v6813_v33, %v6830_v7  ;;  %v4118_v33 = vld [vmem:[%s8253_s4 + $0x310] sm:$0xff] }
 0x34c   : > { %2160 = vmatmul.mubr.f32.gmra.mxu1 %v4097_v34  ;;  %v3389_v34 = vmul.f32 %v6969_v21, %v3347_v32  ;;  %v3329_v39 = vsel %vm3318_vm7, %v6900_v62, %v6908_v5  ;;  %v3345_v43 = vsel %vm3318_vm7, %v6908_v5, %v6900_v62  ;;  %v4112_v62 = vld [vmem:[%s8253_s4 + $0x2e8] sm:$0xff] }
 0x34d   : > { %2482 = vmatmul.mubr.f32.gmra.mxu0 %v4109_v17  ;;  %2773 = vmatprep.mubr.f32.mxu1 %v8519_v8  ;;  %v3388_v17 = vmul.f32 %v7196_v4, %v3331_v1  ;;  %v3385_v47 = vmul.f32 %v6969_v21, %v3345_v43  ;;  %v3326_v1 = vsel %vm3318_vm7, %v7145_v15, %v7155_v63 }
 0x34e   : > { %2487 = vmatprep.mubr.f32.mxu0 %v8519_v8  ;;  %v7211_v13 = vpop.permute.xlu0 %3266  ;;  %3081 = vmatprep.subr.mxu0 %v3023_v48  ;;  %v7213_v46 = vpop.f32.mrf.mxu1  ;;  %v3387_v48 = vmul.f32 %v6969_v21, %v3346_v29 }
 0x34f   : > { %3082 = vmatpush1.msra.mxu0 %v3022_v51  ;;  %v1207_v11 = vpop.f32.mrf.mxu0 }
 0x350   : > { %2774 = vmatmul.mubr.f32.vlgmr.msra.gmra.mxu1 %v4116_v25  ;;  %v7227_v0 = vpop.permute.xlu1 %3298  ;;  %v7230_v12 = vadd.f32 %v1207_v11, %v6998_v14  ;;  %v7232_v10 = vpop.f32.mrf.mxu1  ;;  %v3391_v14 = vmul.f32 %v6969_v21, %v3348_v3  ;;  %v3328_v25 = vsel %vm3318_vm7, %v6985_v49, %v6992_v22  ;;  %v3344_v3 = vsel %vm3318_vm7, %v6992_v22, %v6985_v49  ;;  %v4119_v22 = vld [vmem:[%s8253_s4 + $0x318] sm:$0xff] }
 0x351   : > { %2488 = vmatmul.mubr.f32.gmra.mxu0 %v4110_v52  ;;  %3414 = vmatpush1.msra.mxu1 %v3394_v35  ;;  %v7243_v23 = vpop.f32.mrf.mxu0  ;;  %v3386_v35 = vmul.f32 %v7196_v4, %v3330_v44  ;;  %v3343_v49 = vsel %vm3318_vm7, %v7071_v36, %v7064_v41  ;;  %v3325_v29 = vsel %vm3318_vm7, %v7211_v13, %v7227_v0 }
 0x352   : > { %3415 = vmatprep.subr.mxu1 %v3393_v2  ;;  %2493 = vmatprep.mubr.f32.mxu0 %v8519_v8  ;;  %v3384_v2 = vmul.f32 %v7196_v4, %v3329_v39 }
 0x353   : > { %3416 = vmatpush1.msra.mxu1 %v3392_v16  ;;  %2779 = vmatprep.mubr.f32.mxu1 %v8519_v8  ;;  %v3327_v16 = vsel %vm3318_vm7, %v7064_v41, %v7071_v36  ;;  %v3342_v41 = vsel %vm3318_vm7, %v7155_v63, %v7145_v15  ;;  %v4113_v36 = vld [vmem:[%s8253_s4 + $0x2f0] sm:$0xff]  ;;  %v3341_v15 = vsel %vm3318_vm7, %v7227_v0, %v7211_v13 }
 0x354   : > { %3417 = vmatprep.subr.mxu1 %v3391_v14  ;;  %2780 = vmatmul.mubr.f32.gmra.mxu1 %v4117_v26  ;;  %v2911_v58 = vpop.permute.xlu0 %2910  ;;  %v7265_v40 = vpop.f32.mrf.mxu1  ;;  %v3383_v14 = vmul.f32 %v6969_v21, %v3344_v3  ;;  %v3380_v44 = vmul.f32 %v7196_v4, %v3327_v16  ;;  %v3379_v13 = vmul.f32 %v6969_v21, %v3342_v41 }
 0x355   : > { %2494 = vmatmul.mubr.f32.gmra.mxu0 %v4111_v27  ;;  %3418 = vmatpush1.msra.mxu1 %v3390_v24  ;;  %v2943_v7 = vpop.permute.xlu1 %2942  ;;  %v1213_v51 = vpop.f32.mrf.mxu0 }
 0x356   : > { %3419 = vmatprep.subr.mxu1 %v3389_v34  ;;  %2499 = vmatprep.mubr.f32.mxu0 %v8519_v8  ;;  %v7289_v5 = vadd.f32 %v1213_v51, %v7040_v30  ;;  %v7291_v52 = vpop.f32.mrf.mxu1  ;;  %v3382_v30 = vmul.f32 %v7196_v4, %v3328_v25  ;;  %v2987_v39 = vsel %vm2966_vm8, %v2943_v7, %v2911_v58 }
 0x357   : > { %3420 = vmatpush1.msra.mxu1 %v3388_v17  ;;  %2785 = vmatprep.mubr.f32.mxu1 %v8519_v8  ;;  %v7299_v11 = vpop.f32.mrf.mxu0  ;;  %v3381_v17 = vmul.f32 %v6969_v21, %v3343_v49  ;;  %v2971_v0 = vsel %vm2966_vm8, %v2911_v58, %v2943_v7  ;;  %v3377_v25 = vmul.f32 %v6969_v21, %v3341_v15 }
 0x358   : > { %3421 = vmatprep.subr.mxu1 %v3387_v48  ;;  %2786 = vmatmul.mubr.f32.gmra.mxu1 %v4118_v33  ;;  %v3378_v33 = vmul.f32 %v7196_v4, %v3326_v1  ;;  %v3376_v48 = vmul.f32 %v7196_v4, %v3325_v29  ;;  %v3021_v58 = vmul.f32 %v6574_v42, %v2987_v39 }
 0x359   : > { %2500 = vmatmul.mubr.f32.gmra.mxu0 %v4112_v62  ;;  %3422 = vmatpush1.msra.mxu1 %v3386_v35  ;;  %v3265_v32 = vpop.permute.xlu0 %3264  ;;  %v7315_v26 = vpop.f32.mrf.mxu1  ;;  %v4114_v62 = vld [vmem:[%s8253_s4 + $0x2f8] sm:$0xff]  ;;  %v3020_v49 = vmul.f32 %v6811_v60, %v2971_v0 }
 0x35a   : > { %3423 = vmatprep.subr.mxu1 %v3385_v47  ;;  %2505 = vmatprep.mubr.f32.mxu0 %v8519_v8  ;;  %v3297_v27 = vpop.permute.xlu1 %3296  ;;  %v1219_v24 = vpop.f32.mrf.mxu0 }
 0x35b   : > { %3424 = vmatpush1.msra.mxu1 %v3384_v2  ;;  %2791 = vmatprep.mubr.f32.mxu1 %v8519_v8  ;;  %v7340_v63 = vadd.f32 %v1219_v24, %v7085_v20  ;;  %v7342_v34 = vpop.f32.mrf.mxu1  ;;  %v4120_v20 = vld [vmem:[%s8253_s4 + $0x320] sm:$0xff]  ;;  %v3340_v35 = vsel %vm3318_vm7, %v3297_v27, %v3265_v32  ;;  %v3324_v7 = vsel %vm3318_vm7, %v3265_v32, %v3297_v27 }
 0x35c   : > { %3425 = vmatprep.subr.mxu1 %v3383_v14  ;;  %2792 = vmatmul.mubr.f32.gmra.mxu1 %v4119_v22  ;;  %v7348_v43 = vpop.f32.mrf.mxu0  ;;  %v3375_v32 = vmul.f32 %v6969_v21, %v3340_v35  ;;  %v3374_v41 = vmul.f32 %v7196_v4, %v3324_v7 }
 0x35d   : > { %2506 = vmatmul.mubr.f32.gmra.mxu0 %v4113_v36  ;;  %3426 = vmatpush1.msra.mxu1 %v3382_v30  ;;  %v7357_v51 = vpop.f32.mrf.mxu1 }
 0x35e   : > { %3427 = vmatprep.subr.mxu1 %v3381_v17  ;;  %2511 = vmatprep.mubr.f32.mxu0 %v8519_v8  ;;  %v2909_v3 = vpop.permute.xlu0 %2908  ;;  %v1225_v2 = vpop.f32.mrf.mxu0 }
 0x35f   : > { %3428 = vmatpush1.msra.mxu1 %v3380_v44  ;;  %2797 = vmatprep.mubr.f32.mxu1 %v8519_v8  ;;  %v2941_v47 = vpop.permute.xlu1 %2940  ;;  %v7372_v30 = vadd.f32 %v1225_v2, %v7131_v18  ;;  %v7374_v16 = vpop.f32.mrf.mxu1  ;;  %v4121_v18 = vld [vmem:[%s8253_s4 + $0x328] sm:$0xff] }
 0x360   : > { %3429 = vmatprep.subr.mxu1 %v3379_v13  ;;  %2798 = vmatmul.mubr.f32.gmra.mxu1 %v4120_v20  ;;  %v2970_v22 = vsel %vm2966_vm8, %v2909_v3, %v2941_v47  ;;  %v2986_v14 = vsel %vm2966_vm8, %v2941_v47, %v2909_v3  ;;  %v7381_v1 = vpop.f32.mrf.mxu0  ;;  %v4123_v3 = vld [vmem:[%s8253_s4 + $0x338] sm:$0xff] }
 0x361   : > { %2512 = vmatmul.mubr.f32.gmra.mxu0 %v4114_v62  ;;  %3430 = vmatpush1.msra.mxu1 %v3378_v33  ;;  %v3019_v36 = vmul.f32 %v6574_v42, %v2986_v14  ;;  %v3018_v24 = vmul.f32 %v6811_v60, %v2970_v22  ;;  %v4122_v33 = vld [vmem:[%s8253_s4 + $0x330] sm:$0xff] }
 0x362   : > { %2803 = vmatprep.mubr.f32.mxu1 %v8519_v8  ;;  %3431 = vmatprep.subr.mxu1 %v3377_v25  ;;  %v7390_v27 = vpop.f32.mrf.mxu1 }
 0x363   : > { %3432 = vmatpush1.msra.mxu1 %v3376_v48  ;;  %3083 = vmatprep.subr.mxu0 %v3021_v58  ;;  %v3263_v29 = vpop.permute.xlu0 %3262  ;;  %v1231_v15 = vpop.f32.mrf.mxu0 }
 0x364   : > { %2804 = vmatmul.mubr.f32.gmra.mxu1 %v4121_v18  ;;  %3084 = vmatpush1.msra.mxu0 %v3020_v49  ;;  %v3295_v44 = vpop.permute.xlu1 %3294  ;;  %v7394_v17 = vadd.f32 %v1231_v15, %v7176_v6  ;;  %v7396_v39 = vpop.f32.mrf.mxu1 }
 0x365   : > { %2809 = vmatprep.mubr.f32.mxu1 %v8519_v8  ;;  %3433 = vmatprep.subr.mxu1 %v3375_v32  ;;  %v3323_v13 = vsel %vm3318_vm7, %v3263_v29, %v3295_v44  ;;  %v3339_v20 = vsel %vm3318_vm7, %v3295_v44, %v3263_v29  ;;  %v7406_v0 = vpop.f32.mrf.mxu0 }
 0x366   : > { %3434 = vmatpush1.msra.mxu1 %v3374_v41  ;;  %v3372_v6 = vmul.f32 %v7196_v4, %v3323_v13  ;;  %v3373_v48 = vmul.f32 %v6969_v21, %v3339_v20  ;;  %3085 = vmatprep.subr.mxu0 %v3019_v36  ;;  %v4124_v36 = vld [vmem:[%s8253_s4 + $0x340] sm:$0xff] }
 0x367   : > { %3086 = vmatpush1.msra.mxu0 %v3018_v24  ;;  %v7410_v25 = vpop.f32.mrf.mxu1  ;;  %3125 = vmatprep.mubr.f32.mxu0 %v8519_v8 }
 0x368   : > { %2810 = vmatmul.mubr.f32.gmra.mxu1 %v4122_v33  ;;  %v2907_v62 = vpop.permute.xlu0 %2906  ;;  %3435 = vmatprep.subr.mxu1 %v3373_v48  ;;  %v1237_v35 = vpop.f32.mrf.mxu0 }
 0x369   : > { %2815 = vmatprep.mubr.f32.mxu1 %v8519_v8  ;;  %v2939_v2 = vpop.permute.xlu1 %2938  ;;  %3436 = vmatpush1.msra.mxu1 %v3372_v6  ;;  %v7418_v58 = vadd.f32 %v1237_v35, %v7213_v46  ;;  %v7420_v7 = vpop.f32.mrf.mxu1  ;;  %v4125_v35 = vld [vmem:[%s8253_s4 + $0x348] sm:$0xff] }
 0x36a   : > { %v2969_v47 = vsel %vm2966_vm8, %v2907_v62, %v2939_v2  ;;  %v2985_v49 = vsel %vm2966_vm8, %v2939_v2, %v2907_v62  ;;  %v7426_v22 = vpop.f32.mrf.mxu0 }
 0x36b   : > { %v3016_v14 = vmul.f32 %v6811_v60, %v2969_v47  ;;  %v3017_v18 = vmul.f32 %v6574_v42, %v2985_v49  ;;  %v7430_v32 = vpop.f32.mrf.mxu1 }
 0x36c   : > { %2816 = vmatmul.mubr.f32.gmra.mxu1 %v4123_v3  ;;  %v3261_v41 = vpop.permute.xlu0 %3260  ;;  %v1243_v46 = vpop.f32.mrf.mxu0 }
 0x36d   : > { %2821 = vmatprep.mubr.f32.mxu1 %v8519_v8  ;;  %v3293_v24 = vpop.permute.xlu1 %3292  ;;  %3087 = vmatprep.subr.mxu0 %v3017_v18  ;;  %v7437_v29 = vadd.f32 %v1243_v46, %v7265_v40  ;;  %v7439_v15 = vpop.f32.mrf.mxu1 }
 0x36e   : > { %v3322_v44 = vsel %vm3318_vm7, %v3261_v41, %v3293_v24  ;;  %v3338_v33 = vsel %vm3318_vm7, %v3293_v24, %v3261_v41  ;;  %3088 = vmatpush1.msra.mxu0 %v3016_v14  ;;  %v7445_v13 = vpop.f32.mrf.mxu0 }
 0x36f   : > { %8642 = vst [vmem:[#allocation34_spill] sm:$0xff] %v7445_v13  ;;  %v3370_v20 = vmul.f32 %v7196_v4, %v3322_v44  ;;  %v3371_v6 = vmul.f32 %v6969_v21, %v3338_v33  ;;  %v7449_v48 = vpop.f32.mrf.mxu1  ;;  %v4126_v33 = vld [vmem:[%s8253_s4 + $0x350] sm:$0xff] }
 0x370   : > { %2822 = vmatmul.mubr.f32.gmra.mxu1 %v4124_v36  ;;  %v2905_v40 = vpop.permute.xlu0 %2904  ;;  %v1249_v62 = vpop.f32.mrf.mxu0 }
 0x371   : > { %2827 = vmatprep.mubr.f32.mxu1 %v8519_v8  ;;  %v2937_v3 = vpop.permute.xlu1 %2936  ;;  %3437 = vmatprep.subr.mxu1 %v3371_v6  ;;  %v7456_v2 = vadd.f32 %v1249_v62, %v7315_v26  ;;  %v7458_v47 = vpop.f32.mrf.mxu1 }
 0x372   : > { %v2968_v49 = vsel %vm2966_vm8, %v2905_v40, %v2937_v3  ;;  %v2984_v14 = vsel %vm2966_vm8, %v2937_v3, %v2905_v40  ;;  %3438 = vmatpush1.msra.mxu1 %v3370_v20  ;;  %v7464_v18 = vpop.f32.mrf.mxu0 }
 0x373   : > { %v3014_v41 = vmul.f32 %v6811_v60, %v2968_v49  ;;  %v3015_v46 = vmul.f32 %v6574_v42, %v2984_v14  ;;  %v1509_v36 = vpop.f32.mrf.mxu1 }
 0x374   : > { %2828 = vmatmul.mubr.f32.gmra.mxu1 %v4125_v35  ;;  %v3259_v24 = vpop.permute.xlu0 %3258  ;;  %v1255_v26 = vpop.f32.mrf.mxu0  ;;  %v7469_v44 = vadd.f32 %v1509_v36, %v7100_v50 }
 0x375   : > { %2833 = vmatprep.mubr.f32.mxu1 %v8519_v8  ;;  %v3291_v20 = vpop.permute.xlu1 %3290  ;;  %3089 = vmatprep.subr.mxu0 %v3015_v46  ;;  %v7476_v6 = vadd.f32 %v1255_v26, %v7357_v51  ;;  %v7478_v40 = vpop.f32.mrf.mxu1  ;;  %v4127_v51 = vld [vmem:[%s8253_s4 + $0x358] sm:$0xff] }
 0x376   : > { %v3321_v62 = vsel %vm3318_vm7, %v3259_v24, %v3291_v20  ;;  %v3337_v50 = vsel %vm3318_vm7, %v3291_v20, %v3259_v24  ;;  %3090 = vmatpush1.msra.mxu0 %v3014_v41  ;;  %v7484_v35 = vpop.f32.mrf.mxu0 }
 0x377   : > { %v3368_v3 = vmul.f32 %v7196_v4, %v3321_v62  ;;  %v3369_v49 = vmul.f32 %v6969_v21, %v3337_v50 }
 0x378   : > { %2834 = vmatmul.mubr.f32.gmra.mxu1 %v4126_v33  ;;  %v2903_v14 = vpop.permute.xlu0 %2902  ;;  %v1261_v46 = vpop.f32.mrf.mxu0 }
 0x379   : > { %2839 = vmatprep.mubr.f32.mxu1 %v8519_v8  ;;  %v2935_v36 = vpop.permute.xlu1 %2934  ;;  %3439 = vmatprep.subr.mxu1 %v3369_v49  ;;  %v7493_v24 = vadd.f32 %v1261_v46, %v7390_v27  ;;  %v1515_v41 = vpop.f32.mrf.mxu1  ;;  %v4133_v27 = vld [vmem:[%s8253_s4 + $0x380] sm:$0xff] }
 0x37a   : > { %v2967_v26 = vsel %vm2966_vm8, %v2903_v14, %v2935_v36  ;;  %v2983_v33 = vsel %vm2966_vm8, %v2935_v36, %v2903_v14  ;;  %3440 = vmatpush1.msra.mxu1 %v3368_v3  ;;  %v7500_v20 = vadd.f32 %v1515_v41, %v7148_v55  ;;  %v7502_v62 = vpop.f32.mrf.mxu0  ;;  %v4128_v55 = vld [vmem:[%s8253_s4 + $0x360] sm:$0xff] }
 0x37b   : > { %v3012_v50 = vmul.f32 %v6811_v60, %v2967_v26  ;;  %v3013_v49 = vmul.f32 %v6574_v42, %v2983_v33  ;;  %v7506_v13 = vpop.f32.mrf.mxu1 }
 0x37c   : > { %2840 = vmatmul.mubr.f32.gmra.mxu1 %v4127_v51 }
 0x37d   : > { %2845 = vmatprep.mubr.f32.mxu1 %v8519_v8  ;;  %v3257_v3 = vpop.permute.xlu0 %3256  ;;  %3091 = vmatprep.subr.mxu0 %v3013_v49  ;;  %v1267_v14 = vpop.f32.mrf.mxu0 }
 0x37e   : > { %v3289_v46 = vpop.permute.xlu1 %3288  ;;  %3092 = vmatpush1.msra.mxu0 %v3012_v50  ;;  %v7516_v42 = vadd.f32 %v1267_v14, %v7410_v25  ;;  %v1521_v60 = vpop.f32.mrf.mxu1  ;;  %v4134_v25 = vld [vmem:[%s8253_s4 + $0x388] sm:$0xff] }
 0x37f   : > { %v3320_v51 = vsel %vm3318_vm7, %v3257_v3, %v3289_v46  ;;  %v3336_v36 = vsel %vm3318_vm7, %v3289_v46, %v3257_v3  ;;  %3126 = vmatmul.mubr.f32.vlgmr.msra.gmra.mxu0 %v4133_v27  ;;  %v7523_v41 = vadd.f32 %v1521_v60, %v7182_v53  ;;  %v7525_v26 = vpop.f32.mrf.mxu0  ;;  %v4129_v53 = vld [vmem:[%s8253_s4 + $0x368] sm:$0xff] }
 0x380   : > { %2846 = vmatmul.mubr.f32.gmra.mxu1 %v4128_v55  ;;  %v3366_v33 = vmul.f32 %v7196_v4, %v3320_v51  ;;  %v3367_v50 = vmul.f32 %v6969_v21, %v3336_v36  ;;  %3131 = vmatprep.mubr.f32.mxu0 %v8519_v8  ;;  %v7533_v49 = vpop.f32.mrf.mxu1  ;;  %v4135_v36 = vld [vmem:[%s8253_s4 + $0x390] sm:$0xff] }
 0x381   : > { %2851 = vmatprep.mubr.f32.mxu1 %v8519_v8 }
 0x382   : > { %v3255_v27 = vpop.permute.xlu0 %3254  ;;  %3441 = vmatprep.subr.mxu1 %v3367_v50  ;;  %v1273_v55 = vpop.f32.mrf.mxu0 }
 0x383   : > { %v3287_v3 = vpop.permute.xlu1 %3286  ;;  %3442 = vmatpush1.msra.mxu1 %v3366_v33  ;;  %3132 = vmatmul.mubr.f32.gmra.mxu0 %v4134_v25  ;;  %v7540_v14 = vadd.f32 %v1273_v55, %v7430_v32  ;;  %v1527_v46 = vpop.f32.mrf.mxu1  ;;  %v4130_v32 = vld [vmem:[%s8253_s4 + $0x370] sm:$0xff]  ;;  %v4136_v55 = vld [vmem:[%s8253_s4 + $0x398] sm:$0xff] }
 0x384   : > { %2852 = vmatmul.mubr.f32.gmra.mxu1 %v4129_v53  ;;  %v3319_v60 = vsel %vm3318_vm7, %v3255_v27, %v3287_v3  ;;  %v3335_v51 = vsel %vm3318_vm7, %v3287_v3, %v3255_v27  ;;  %3137 = vmatprep.mubr.f32.mxu0 %v8519_v8  ;;  %v7551_v33 = vadd.f32 %v1527_v46, %v7230_v12  ;;  %v1275_v50 = vpop.f32.mrf.mxu0 }
 0x385   : > { %2857 = vmatprep.mubr.f32.mxu1 %v8519_v8  ;;  %v3364_v25 = vmul.f32 %v7196_v4, %v3319_v60  ;;  %v3365_v37 = vmul.f32 %v6969_v21, %v3335_v51  ;;  %v7560_v53 = vadd.f32 %v1275_v50, %v7439_v15  ;;  %v7562_v27 = vpop.f32.mrf.mxu1  ;;  %v4131_v21 = vld [vmem:[%s8253_s4 + $0x378] sm:$0xff] }
 0x387   : > { %3443 = vmatprep.subr.mxu1 %v3365_v37  ;;  %3138 = vmatmul.mubr.f32.gmra.mxu0 %v4135_v36  ;;  %v1279_v12 = vpop.f32.mrf.mxu0  ;;  %v4137_v36 = vld [vmem:[%s8253_s4 + $0x3a0] sm:$0xff] }
 0x388   : > { %2858 = vmatmul.mubr.f32.gmra.mxu1 %v4130_v32  ;;  %3143 = vmatprep.mubr.f32.mxu0 %v8519_v8  ;;  %v7569_v3 = vadd.f32 %v1279_v12, %v7449_v48  ;;  %v1533_v4 = vpop.f32.mrf.mxu1  ;;  %v1192_v48 = vadd.f32 %v7114_v9, %v6852_v31  ;;  %v4138_v12 = vld [vmem:[%s8253_s4 + $0x3a8] sm:$0xff] }
 0x389   : > { %2863 = vmatprep.mubr.f32.mxu1 %v8519_v8  ;;  %3444 = vmatpush1.msra.mxu1 %v3364_v25  ;;  %v7576_v15 = vadd.f32 %v1533_v4, %v7289_v5  ;;  %v1281_v46 = vpop.f32.mrf.mxu0  ;;  %v4150_v5 = vld [vmem:[%s8253_s4 + $0x400] sm:$0xff]  ;;  %v4139_v4 = vld [vmem:[%s8253_s4 + $0x3b0] sm:$0xff] }
 0x38a   : > { %v7579_v60 = vadd.f32 %v1281_v46, %v7458_v47  ;;  %v7581_v51 = vpop.f32.mrf.mxu1  ;;  %v1605_v31 = vadd.f32 %v7478_v40, %v1192_v48 }
 0x38b   : > { %3144 = vmatmul.mubr.f32.gmra.mxu0 %v4136_v55 }
 0x38c   : > { %2864 = vmatmul.mubr.f32.gmra.mxu1 %v4131_v21  ;;  %3149 = vmatprep.mubr.f32.mxu0 %v8519_v8  ;;  %v1539_v50 = vpop.f32.mrf.mxu1 }
 0x38d   : > { %3477 = vmatprep.mubr.f32.mxu1 %v8519_v8  ;;  %v7594_v47 = vadd.f32 %v1539_v50, %v7340_v63  ;;  %v1861_v32 = vpop.f32.mrf.mxu0  ;;  %v4151_v63 = vld [vmem:[%s8253_s4 + $0x408] sm:$0xff] }
 0x38e   : > { %v7598_v9 = vadd.f32 %v1861_v32, %v7469_v44  ;;  %v7600_v25 = vpop.f32.mrf.mxu1  ;;  %v1198_v44 = vadd.f32 %v7160_v19, %v6910_v59  ;;  %v4152_v59 = vld [vmem:[%s8253_s4 + $0x410] sm:$0xff] }
 0x38f   : > { %3150 = vmatmul.mubr.f32.gmra.mxu0 %v4137_v36  ;;  %v1863_v37 = vpop.f32.mrf.mxu0 }
 0x390   : > { %3478 = vmatmul.mubr.f32.vlgmr.msra.gmra.mxu1 %v4150_v5  ;;  %3155 = vmatprep.mubr.f32.mxu0 %v8519_v8  ;;  %v7606_v55 = vadd.f32 %v1863_v37, %v1605_v31  ;;  %v1607_v48 = vadd.f32 %v7506_v13, %v1198_v44  ;;  %v4153_v13 = vld [vmem:[%s8253_s4 + $0x418] sm:$0xff]  ;;  %v1234_v31 = vadd.f32 %v7406_v0, %v7192_v54  ;;  %v4141_v44 = vld [vmem:[%s8253_s4 + $0x3c0] sm:$0xff] }
 0x391   : > { %3483 = vmatprep.mubr.f32.mxu1 %v8519_v8  ;;  %v4154_v54 = vld [vmem:[%s8253_s4 + $0x420] sm:$0xff] }
 0x393   : > { %3156 = vmatmul.mubr.f32.gmra.mxu0 %v4138_v12  ;;  %v1545_v40 = vpop.f32.mrf.mxu1 }
 0x394   : > { %3484 = vmatmul.mubr.f32.gmra.mxu1 %v4151_v63  ;;  %3161 = vmatprep.mubr.f32.mxu0 %v8519_v8  ;;  %v7619_v21 = vadd.f32 %v1545_v40, %v7372_v30  ;;  %v1867_v46 = vpop.f32.mrf.mxu0  ;;  %v4140_v30 = vld [vmem:[%s8253_s4 + $0x3b8] sm:$0xff]  ;;  %v1210_v40 = vadd.f32 %v7243_v23, %v7014_v38  ;;  %v4143_v23 = vld [vmem:[%s8253_s4 + $0x3d0] sm:$0xff] }
 0x395   : > { %3489 = vmatprep.mubr.f32.mxu1 %v8519_v8  ;;  %v7627_v19 = vadd.f32 %v1867_v46, %v7500_v20  ;;  %v7629_v36 = vpop.f32.mrf.mxu1  ;;  %v1204_v20 = vadd.f32 %v7201_v57, %v6961_v56 }
 0x396   : > { %v1869_v50 = vpop.f32.mrf.mxu0 }
 0x397   : > { %3162 = vmatmul.mubr.f32.gmra.mxu0 %v4139_v4  ;;  %v7631_v5 = vadd.f32 %v1869_v50, %v1607_v48  ;;  %v1609_v63 = vadd.f32 %v7533_v49, %v1204_v20  ;;  %v4155_v4 = vld [vmem:[%s8253_s4 + $0x428] sm:$0xff]  ;;  %v1611_v50 = vadd.f32 %v7562_v27, %v1210_v40  ;;  %v4145_v40 = vld [vmem:[%s8253_s4 + $0x3e0] sm:$0xff] }
 0x398   : > { %3490 = vmatmul.mubr.f32.gmra.mxu1 %v4152_v59  ;;  %3167 = vmatprep.mubr.f32.mxu0 %v8519_v8 }
 0x399   : > { %3495 = vmatprep.mubr.f32.mxu1 %v8519_v8 }
 0x39a   : > { %v1551_v32 = vpop.f32.mrf.mxu1 }
 0x39b   : > { %3168 = vmatmul.mubr.f32.gmra.mxu0 %v4140_v30  ;;  %v7646_v37 = vadd.f32 %v1551_v32, %v7394_v17  ;;  %v1873_v12 = vpop.f32.mrf.mxu0 }
 0x39c   : > { %3496 = vmatmul.mubr.f32.gmra.mxu1 %v4153_v13  ;;  %3173 = vmatprep.mubr.f32.mxu0 %v8519_v8  ;;  %v7654_v56 = vadd.f32 %v1873_v12, %v7523_v41  ;;  %v1553_v57 = vpop.f32.mrf.mxu1  ;;  %v4142_v41 = vld [vmem:[%s8253_s4 + $0x3c8] sm:$0xff] }
 0x39d   : > { %3501 = vmatprep.mubr.f32.mxu1 %v8519_v8  ;;  %v7660_v17 = vadd.f32 %v1553_v57, %v1234_v31  ;;  %v1875_v0 = vpop.f32.mrf.mxu0 }
 0x39e   : > { %v7662_v49 = vadd.f32 %v1875_v0, %v1609_v63 }
 0x39f   : > { %3174 = vmatmul.mubr.f32.gmra.mxu0 %v4141_v44 }
 0x3a0   : > { %3502 = vmatmul.mubr.f32.gmra.mxu1 %v4154_v54  ;;  %3179 = vmatprep.mubr.f32.mxu0 %v8519_v8  ;;  %v1252_v54 = vadd.f32 %v7464_v18, %v7342_v34 }
 0x3a1   : > { %3507 = vmatprep.mubr.f32.mxu1 %v8519_v8  ;;  %v1557_v46 = vpop.f32.mrf.mxu1 }
 0x3a2   : > { %v7675_v48 = vadd.f32 %v1557_v46, %v7418_v58  ;;  %v1879_v59 = vpop.f32.mrf.mxu0  ;;  %v4156_v58 = vld [vmem:[%s8253_s4 + $0x430] sm:$0xff] }
 0x3a3   : > { %3180 = vmatmul.mubr.f32.gmra.mxu0 %v4142_v41  ;;  %v7679_v30 = vadd.f32 %v1879_v59, %v7551_v33  ;;  %v7681_v13 = vpop.f32.mrf.mxu1  ;;  %v1216_v33 = vadd.f32 %v7299_v11, %v7055_v61  ;;  %v4144_v61 = vld [vmem:[%s8253_s4 + $0x3d8] sm:$0xff]  ;;  %v1228_v59 = vadd.f32 %v7381_v1, %v7157_v28 }
 0x3a4   : > { %3508 = vmatmul.mubr.f32.gmra.mxu1 %v4155_v4  ;;  %3185 = vmatprep.mubr.f32.mxu0 %v8519_v8  ;;  %v1881_v38 = vpop.f32.mrf.mxu0  ;;  %v4157_v11 = vld [vmem:[%s8253_s4 + $0x438] sm:$0xff] }
 0x3a5   : > { %3513 = vmatprep.mubr.f32.mxu1 %v8519_v8  ;;  %v7691_v27 = vadd.f32 %v1881_v38, %v1611_v50  ;;  %v1613_v12 = vadd.f32 %v7581_v51, %v1216_v33  ;;  %v4146_v50 = vld [vmem:[%s8253_s4 + $0x3e8] sm:$0xff]  ;;  %v1617_v1 = vadd.f32 %v7629_v36, %v1228_v59  ;;  %v1264_v36 = vadd.f32 %v7502_v62, %v7396_v39 }
 0x3a6   : > { %v1563_v20 = vpop.f32.mrf.mxu1  ;;  %v4159_v38 = vld [vmem:[%s8253_s4 + $0x448] sm:$0xff]  ;;  %v1240_v39 = vadd.f32 %v7426_v22, %v7232_v10 }
 0x3a7   : > { %3186 = vmatmul.mubr.f32.gmra.mxu0 %v4143_v23  ;;  %v7696_v32 = vadd.f32 %v1563_v20, %v7437_v29  ;;  %v1885_v31 = vpop.f32.mrf.mxu0 }
 0x3a8   : > { %3514 = vmatmul.mubr.f32.gmra.mxu1 %v4156_v58  ;;  %v7700_v63 = vadd.f32 %v1885_v31, %v7576_v15  ;;  %3191 = vmatprep.mubr.f32.mxu0 %v8519_v8  ;;  %v7703_v44 = vpop.f32.mrf.mxu1  ;;  %v1222_v15 = vadd.f32 %v7348_v43, %v7106_v45  ;;  %v4158_v45 = vld [vmem:[%s8253_s4 + $0x440] sm:$0xff] }
 0x3a9   : > { %3519 = vmatprep.mubr.f32.mxu1 %v8519_v8  ;;  %v1887_v29 = vpop.f32.mrf.mxu0 }
 0x3aa   : > { %v7712_v51 = vadd.f32 %v1887_v29, %v1613_v12  ;;  %v1615_v4 = vadd.f32 %v7600_v25, %v1222_v15 }
 0x3ab   : > { %3192 = vmatmul.mubr.f32.gmra.mxu0 %v4144_v61  ;;  %v1569_v57 = vpop.f32.mrf.mxu1 }
 0x3ac   : > { %3520 = vmatmul.mubr.f32.gmra.mxu1 %v4157_v11  ;;  %v7719_v0 = vadd.f32 %v1569_v57, %v7456_v2  ;;  %v1891_v41 = vpop.f32.mrf.mxu0  ;;  %3197 = vmatprep.mubr.f32.mxu0 %v8519_v8 }
 0x3ad   : > { %3525 = vmatprep.mubr.f32.mxu1 %v8519_v8  ;;  %v7731_v34 = vadd.f32 %v1891_v41, %v7594_v47  ;;  %v1571_v43 = vpop.f32.mrf.mxu1  ;;  %v1258_v47 = vadd.f32 %v7484_v35, %v7374_v16  ;;  %v4160_v35 = vld [vmem:[%s8253_s4 + $0x450] sm:$0xff]  ;;  %v1270_v41 = vadd.f32 %v7525_v26, %v7420_v7  ;;  %v4162_v7 = vld [vmem:[%s8253_s4 + $0x460] sm:$0xff] }
 0x3ae   : > { %v7733_v2 = vadd.f32 %v1571_v43, %v1252_v54  ;;  %v1893_v18 = vpop.f32.mrf.mxu0  ;;  %v4148_v54 = vld [vmem:[%s8253_s4 + $0x3f8] sm:$0xff] }
 0x3af   : > { %v7735_v46 = vadd.f32 %v1893_v18, %v1615_v4  ;;  %3198 = vmatmul.mubr.f32.gmra.mxu0 %v4145_v40 }
 0x3b0   : > { %3526 = vmatmul.mubr.f32.gmra.mxu1 %v4158_v45  ;;  %v1575_v25 = vpop.f32.mrf.mxu1  ;;  %3203 = vmatprep.mubr.f32.mxu0 %v8519_v8  ;;  %v1621_v45 = vadd.f32 %v7681_v13, %v1240_v39 }
 0x3b1   : > { %3531 = vmatprep.mubr.f32.mxu1 %v8519_v8  ;;  %v7750_v23 = vadd.f32 %v1575_v25, %v7476_v6  ;;  %v1897_v28 = vpop.f32.mrf.mxu0  ;;  %v4147_v6 = vld [vmem:[%s8253_s4 + $0x3f0] sm:$0xff] }
 0x3b2   : > { %v7754_v58 = vadd.f32 %v1897_v28, %v7619_v21  ;;  %v1577_v33 = vpop.f32.mrf.mxu1  ;;  %v4163_v28 = vld [vmem:[%s8253_s4 + $0x468] sm:$0xff] }
 0x3b3   : > { %v7756_v20 = vadd.f32 %v1577_v33, %v1258_v47  ;;  %v1899_v31 = vpop.f32.mrf.mxu0  ;;  %3204 = vmatmul.mubr.f32.gmra.mxu0 %v4146_v50 }
 0x3b4   : > { %3532 = vmatmul.mubr.f32.gmra.mxu1 %v4159_v38  ;;  %v7758_v16 = vadd.f32 %v1899_v31, %v1617_v1  ;;  %3209 = vmatprep.mubr.f32.mxu0 %v8519_v8 }
 0x3b5   : > { %3537 = vmatprep.mubr.f32.mxu1 %v8519_v8  ;;  %v1581_v21 = vpop.f32.mrf.mxu1  ;;  %v1903_v61 = vpop.f32.mrf.mxu0 }
 0x3b6   : > { %v7771_v12 = vadd.f32 %v1581_v21, %v7493_v24  ;;  %v7774_v11 = vadd.f32 %v1903_v61, %v7646_v37  ;;  %v4161_v24 = vld [vmem:[%s8253_s4 + $0x458] sm:$0xff] }
 0x3b7   : > { %v1583_v29 = vpop.f32.mrf.mxu1  ;;  %3210 = vmatmul.mubr.f32.gmra.mxu0 %v4147_v6  ;;  %v1905_v57 = vpop.f32.mrf.mxu0 }
 0x3b8   : > { %3538 = vmatmul.mubr.f32.gmra.mxu1 %v4160_v35  ;;  %v7776_v15 = vadd.f32 %v1583_v29, %v1264_v36  ;;  %3215 = vmatprep.mubr.f32.mxu0 %v8519_v8  ;;  %v7789_v62 = vadd.f32 %v1905_v57, %v7660_v17  ;;  %v8643_v17 = vld [vmem:[#allocation34_spill] sm:$0xff]  ;;  %v4164_v35 = vld [vmem:[%s8253_s4 + $0x470] sm:$0xff] }
 0x3b9   : > { %3543 = vmatprep.mubr.f32.mxu1 %v8519_v8  ;;  %v1587_v37 = vpop.f32.mrf.mxu1  ;;  %v1909_v4 = vpop.f32.mrf.mxu0  ;;  %v1246_v59 = vadd.f32 %v8643_v17, %v7291_v52 }
 0x3ba   : > { %v1630_v40 = vadd.f32 %v1587_v37, %v7516_v42  ;;  %v7796_v10 = vadd.f32 %v1909_v4, %v7675_v48 }
 0x3bb   : > { %v1589_v22 = vpop.f32.mrf.mxu1  ;;  %3216 = vmatmul.mubr.f32.gmra.mxu0 %v4148_v54  ;;  %v1911_v18 = vpop.f32.mrf.mxu0  ;;  %v1623_v25 = vadd.f32 %v7703_v44, %v1246_v59  ;;  %v4165_v54 = vld [vmem:[%s8253_s4 + $0x478] sm:$0xff] }
 0x3bc   : > { %3544 = vmatmul.mubr.f32.gmra.mxu1 %v4161_v24  ;;  %v1631_v43 = vadd.f32 %v1589_v22, %v1270_v41  ;;  %3854 = vmatprep.mubr.f32.mxu0 %v8519_v8  ;;  %v7805_v42 = vadd.f32 %v1911_v18, %v1621_v45 }
 0x3bd   : > { %3549 = vmatprep.mubr.f32.mxu1 %v8519_v8  ;;  %v1593_v26 = vpop.f32.mrf.mxu1  ;;  %v1915_v13 = vpop.f32.mrf.mxu0 }
 0x3be   : > { %v1632_v48 = vadd.f32 %v1593_v26, %v7540_v14  ;;  %v7810_v50 = vadd.f32 %v1915_v13, %v7696_v32 }
 0x3bf   : > { %v1595_v47 = vpop.f32.mrf.mxu1  ;;  %v1917_v38 = vpop.f32.mrf.mxu0 }
 0x3c0   : > { %3550 = vmatmul.mubr.f32.gmra.mxu1 %v4162_v7  ;;  %v1633_v52 = vadd.f32 %v1595_v47, %v7560_v53  ;;  %v7817_v1 = vadd.f32 %v1917_v38, %v1623_v25 }
 0x3c1   : > { %3555 = vmatprep.mubr.f32.mxu1 %v8519_v8  ;;  %v1599_v14 = vpop.f32.mrf.mxu1  ;;  %v1921_v44 = vpop.f32.mrf.mxu0 }
 0x3c2   : > { %v1634_v33 = vadd.f32 %v1599_v14, %v7569_v3  ;;  %v7821_v32 = vadd.f32 %v1921_v44, %v7719_v0 }
 0x3c3   : > { %v1601_v31 = vpop.f32.mrf.mxu1  ;;  %v1923_v6 = vpop.f32.mrf.mxu0 }
 0x3c4   : > { %3556 = vmatmul.mubr.f32.gmra.mxu1 %v4163_v28  ;;  %v1635_v53 = vadd.f32 %v1601_v31, %v7579_v60  ;;  %v7829_v21 = vadd.f32 %v1923_v6, %v7733_v2 }
 0x3c5   : > { %3561 = vmatprep.mubr.f32.mxu1 %v8519_v8  ;;  %v2071_v36 = vpop.f32.mrf.mxu1  ;;  %v1927_v3 = vpop.f32.mrf.mxu0 }
 0x3c6   : > { %v2166_v61 = vadd.f32 %v2071_v36, %v7598_v9  ;;  %v7833_v0 = vadd.f32 %v1927_v3, %v7750_v23 }
 0x3c7   : > { %v2073_v29 = vpop.f32.mrf.mxu1  ;;  %v1929_v60 = vpop.f32.mrf.mxu0 }
 0x3c8   : > { %3562 = vmatmul.mubr.f32.gmra.mxu1 %v4164_v35  ;;  %v2167_v57 = vadd.f32 %v2073_v29, %v7606_v55  ;;  %v7841_v2 = vadd.f32 %v1929_v60, %v7756_v20 }
 0x3c9   : > { %3567 = vmatprep.mubr.f32.mxu1 %v8519_v8 }
 0x3ca   : > { %v1933_v39 = vpop.f32.mrf.mxu0  ;;  %v2077_v24 = vpop.f32.mrf.mxu1 }
 0x3cb   : > { %v7844_v9 = vadd.f32 %v1933_v39, %v7771_v12  ;;  %v2168_v23 = vadd.f32 %v2077_v24, %v7627_v19 }
 0x3cc   : > { %3568 = vmatmul.mubr.f32.gmra.mxu1 %v4165_v54  ;;  %v1935_v37 = vpop.f32.mrf.mxu0  ;;  %v2079_v41 = vpop.f32.mrf.mxu1 }
 0x3cd   : > { %v7848_v55 = vadd.f32 %v1935_v37, %v7776_v15  ;;  %v2169_v4 = vadd.f32 %v2079_v41, %v7631_v5  ;;  %3890 = vmatprep.mubr.f32.mxu1 %v8519_v8 }
 0x3cf   : > { %v1939_v45 = vpop.f32.mrf.mxu0  ;;  %v2083_v20 = vpop.f32.mrf.mxu1 }
 0x3d0   : > { %v7852_v22 = vadd.f32 %v1939_v45, %v1630_v40  ;;  %v2170_v18 = vadd.f32 %v2083_v20, %v7654_v56 }
 0x3d1   : > { %v1941_v12 = vpop.f32.mrf.mxu0  ;;  %v2085_v17 = vpop.f32.mrf.mxu1 }
 0x3d2   : > { %v7855_v59 = vadd.f32 %v1941_v12, %v1631_v43  ;;  %v2171_v19 = vadd.f32 %v2085_v17, %v7662_v49 }
 0x3d4   : > { %v1945_v7 = vpop.f32.mrf.mxu0  ;;  %v2089_v26 = vpop.f32.mrf.mxu1 }
 0x3d5   : > { %v7858_v15 = vadd.f32 %v1945_v7, %v1632_v48  ;;  %v2172_v5 = vadd.f32 %v2089_v26, %v7679_v30 }
 0x3d6   : > { %v1947_v13 = vpop.f32.mrf.mxu0  ;;  %v2091_v25 = vpop.f32.mrf.mxu1 }
 0x3d7   : > { %v7861_v47 = vadd.f32 %v1947_v13, %v1633_v52  ;;  %v2173_v40 = vadd.f32 %v2091_v25, %v7691_v27 }
 0x3d9   : > { %v1951_v38 = vpop.f32.mrf.mxu0  ;;  %v2095_v56 = vpop.f32.mrf.mxu1 }
 0x3da   : > { %v7864_v28 = vadd.f32 %v1951_v38, %v1634_v33  ;;  %v2174_v43 = vadd.f32 %v2095_v56, %v7700_v63 }
 0x3db   : > { %v1953_v14 = vpop.f32.mrf.mxu0  ;;  %v2097_v49 = vpop.f32.mrf.mxu1 }
 0x3dc   : > { %v7867_v44 = vadd.f32 %v1953_v14, %v1635_v53  ;;  %v2175_v48 = vadd.f32 %v2097_v49, %v7712_v51 }
 0x3de   : > { %v2101_v31 = vpop.f32.mrf.mxu1 }
 0x3df   : > { %v2176_v30 = vadd.f32 %v2101_v31, %v7731_v34  ;;  %v2423_v6 = vpop.f32.mrf.mxu0 }
 0x3e0   : > { %v7871_v52 = vadd.f32 %v2423_v6, %v2166_v61  ;;  %v2103_v35 = vpop.f32.mrf.mxu1 }
 0x3e1   : > { %v2177_v27 = vadd.f32 %v2103_v35, %v7735_v46  ;;  %v2425_v36 = vpop.f32.mrf.mxu0 }
 0x3e2   : > { %v7874_v33 = vadd.f32 %v2425_v36, %v2167_v57 }
 0x3e5   : > { %v2107_v3 = vpop.f32.mrf.mxu1 }
 0x3e6   : > { %v2178_v63 = vadd.f32 %v2107_v3, %v7754_v58  ;;  %v2429_v29 = vpop.f32.mrf.mxu0 }
 0x3e7   : > { %v7877_v53 = vadd.f32 %v2429_v29, %v2168_v23  ;;  %v2109_v60 = vpop.f32.mrf.mxu1 }
 0x3e8   : > { %v2179_v51 = vadd.f32 %v2109_v60, %v7758_v16  ;;  %v2431_v54 = vpop.f32.mrf.mxu0 }
 0x3e9   : > { %v7880_v34 = vadd.f32 %v2431_v54, %v2169_v4 }
 0x3eb   : > { %v2113_v61 = vpop.f32.mrf.mxu1 }
 0x3ec   : > { %v2180_v39 = vadd.f32 %v2113_v61, %v7774_v11  ;;  %v2435_v24 = vpop.f32.mrf.mxu0 }
 0x3ed   : > { %v7883_v46 = vadd.f32 %v2435_v24, %v2170_v18  ;;  %v2115_v57 = vpop.f32.mrf.mxu1 }
 0x3ee   : > { %v2181_v37 = vadd.f32 %v2115_v57, %v7789_v62  ;;  %v2437_v41 = vpop.f32.mrf.mxu0 }
 0x3ef   : > { %v7886_v58 = vadd.f32 %v2437_v41, %v2171_v19 }
 0x3f0   : > { %v2119_v23 = vpop.f32.mrf.mxu1 }
 0x3f1   : > { %v2182_v45 = vadd.f32 %v2119_v23, %v7796_v10  ;;  %v2441_v20 = vpop.f32.mrf.mxu0 }
 0x3f2   : > { %v7889_v16 = vadd.f32 %v2441_v20, %v2172_v5  ;;  %v2121_v4 = vpop.f32.mrf.mxu1 }
 0x3f3   : > { %v2183_v12 = vadd.f32 %v2121_v4, %v7805_v42  ;;  %v2443_v17 = vpop.f32.mrf.mxu0 }
 0x3f4   : > { %v7892_v11 = vadd.f32 %v2443_v17, %v2173_v40  ;;  %v2125_v18 = vpop.f32.mrf.mxu1 }
 0x3f5   : > { %v2184_v7 = vadd.f32 %v2125_v18, %v7810_v50  ;;  %v2447_v26 = vpop.f32.mrf.mxu0 }
 0x3f6   : > { %v7895_v62 = vadd.f32 %v2447_v26, %v2174_v43  ;;  %v2127_v19 = vpop.f32.mrf.mxu1 }
 0x3f7   : > { %v2185_v13 = vadd.f32 %v2127_v19, %v7817_v1  ;;  %v2449_v25 = vpop.f32.mrf.mxu0 }
 0x3f8   : > { %v7898_v10 = vadd.f32 %v2449_v25, %v2175_v48  ;;  %v2131_v5 = vpop.f32.mrf.mxu1 }
 0x3f9   : > { %v2186_v38 = vadd.f32 %v2131_v5, %v7821_v32  ;;  %v2453_v56 = vpop.f32.mrf.mxu0 }
 0x3fa   : > { %v7901_v42 = vadd.f32 %v2453_v56, %v2176_v30  ;;  %v2133_v40 = vpop.f32.mrf.mxu1 }
 0x3fb   : > { %v2187_v14 = vadd.f32 %v2133_v40, %v7829_v21  ;;  %v2455_v49 = vpop.f32.mrf.mxu0 }
 0x3fc   : > { %v7904_v50 = vadd.f32 %v2455_v49, %v2177_v27  ;;  %v2137_v43 = vpop.f32.mrf.mxu1 }
 0x3fd   : > { %v2188_v31 = vadd.f32 %v2137_v43, %v7833_v0  ;;  %v2459_v6 = vpop.f32.mrf.mxu0 }
 0x3fe   : > { %v7907_v1 = vadd.f32 %v2459_v6, %v2178_v63  ;;  %v2139_v48 = vpop.f32.mrf.mxu1 }
 0x3ff   : > { %v2189_v35 = vadd.f32 %v2139_v48, %v7841_v2  ;;  %v2461_v36 = vpop.f32.mrf.mxu0 }
 0x400   : > { %v7910_v32 = vadd.f32 %v2461_v36, %v2179_v51  ;;  %v2143_v30 = vpop.f32.mrf.mxu1 }
 0x401   : > { %v2190_v3 = vadd.f32 %v2143_v30, %v7844_v9  ;;  %v2465_v29 = vpop.f32.mrf.mxu0 }
 0x402   : > { %v7913_v21 = vadd.f32 %v2465_v29, %v2180_v39  ;;  %v2145_v27 = vpop.f32.mrf.mxu1 }
 0x403   : > { %v2191_v60 = vadd.f32 %v2145_v27, %v7848_v55  ;;  %v2467_v54 = vpop.f32.mrf.mxu0 }
 0x404   : > { %v7916_v0 = vadd.f32 %v2467_v54, %v2181_v37  ;;  %v2149_v63 = vpop.f32.mrf.mxu1 }
 0x405   : > { %v2192_v61 = vadd.f32 %v2149_v63, %v7852_v22  ;;  %v2471_v24 = vpop.f32.mrf.mxu0 }
 0x406   : > { %v7919_v2 = vadd.f32 %v2471_v24, %v2182_v45  ;;  %v2151_v51 = vpop.f32.mrf.mxu1 }
 0x407   : > { %v2193_v57 = vadd.f32 %v2151_v51, %v7855_v59  ;;  %v2473_v41 = vpop.f32.mrf.mxu0 }
 0x408   : > { %v7922_v9 = vadd.f32 %v2473_v41, %v2183_v12  ;;  %v2155_v39 = vpop.f32.mrf.mxu1 }
 0x409   : > { %v2194_v23 = vadd.f32 %v2155_v39, %v7858_v15  ;;  %v2477_v20 = vpop.f32.mrf.mxu0 }
 0x40a   : > { %v7925_v55 = vadd.f32 %v2477_v20, %v2184_v7  ;;  %v2157_v37 = vpop.f32.mrf.mxu1 }
 0x40b   : > { %v2195_v4 = vadd.f32 %v2157_v37, %v7861_v47  ;;  %v2479_v17 = vpop.f32.mrf.mxu0 }
 0x40c   : > { %v7928_v22 = vadd.f32 %v2479_v17, %v2185_v13  ;;  %v2161_v45 = vpop.f32.mrf.mxu1 }
 0x40d   : > { %v7931_v18 = vadd.f32 %v2161_v45, %v7864_v28  ;;  %v2483_v59 = vpop.f32.mrf.mxu0 }
 0x40e   : > { %v7933_v26 = vadd.f32 %v2483_v59, %v2186_v38  ;;  %v2163_v12 = vpop.f32.mrf.mxu1 }
 0x40f   : > { %v7936_v19 = vadd.f32 %v2163_v12, %v7867_v44  ;;  %v2485_v15 = vpop.f32.mrf.mxu0 }
 0x410   : > { %v2539_v7 = vadd.f32 %v2485_v15, %v2187_v14  ;;  %v2775_v25 = vpop.f32.mrf.mxu1 }
 0x411   : > { %v2489_v5 = vpop.f32.mrf.mxu0  ;;  %v7939_v47 = vadd.f32 %v2775_v25, %v7871_v52 }
 0x412   : > { %v2540_v13 = vadd.f32 %v2489_v5, %v2188_v31  ;;  %v2777_v56 = vpop.f32.mrf.mxu1 }
 0x413   : > { %v2491_v40 = vpop.f32.mrf.mxu0  ;;  %v7942_v28 = vadd.f32 %v2777_v56, %v7874_v33 }
 0x414   : > { %v2541_v49 = vadd.f32 %v2491_v40, %v2189_v35  ;;  %v2781_v38 = vpop.f32.mrf.mxu1 }
 0x415   : > { %v2495_v43 = vpop.f32.mrf.mxu0  ;;  %v7945_v6 = vadd.f32 %v2781_v38, %v7877_v53 }
 0x416   : > { %v2542_v44 = vadd.f32 %v2495_v43, %v2190_v3  ;;  %v2783_v48 = vpop.f32.mrf.mxu1 }
 0x417   : > { %v2497_v14 = vpop.f32.mrf.mxu0  ;;  %v7948_v36 = vadd.f32 %v2783_v48, %v7880_v34 }
 0x418   : > { %v2543_v52 = vadd.f32 %v2497_v14, %v2191_v60  ;;  %v2787_v30 = vpop.f32.mrf.mxu1 }
 0x419   : > { %v2501_v31 = vpop.f32.mrf.mxu0  ;;  %v7951_v29 = vadd.f32 %v2787_v30, %v7883_v46 }
 0x41a   : > { %v2544_v33 = vadd.f32 %v2501_v31, %v2192_v61  ;;  %v2789_v27 = vpop.f32.mrf.mxu1 }
 0x41b   : > { %v2503_v35 = vpop.f32.mrf.mxu0  ;;  %v7954_v54 = vadd.f32 %v2789_v27, %v7886_v58 }
 0x41c   : > { %v2545_v53 = vadd.f32 %v2503_v35, %v2193_v57  ;;  %v2793_v63 = vpop.f32.mrf.mxu1 }
 0x41d   : > { %v2507_v3 = vpop.f32.mrf.mxu0  ;;  %v7957_v24 = vadd.f32 %v2793_v63, %v7889_v16 }
 0x41e   : > { %v2546_v34 = vadd.f32 %v2507_v3, %v2194_v23  ;;  %v2795_v51 = vpop.f32.mrf.mxu1 }
 0x41f   : > { %v2509_v60 = vpop.f32.mrf.mxu0  ;;  %v7960_v41 = vadd.f32 %v2795_v51, %v7892_v11 }
 0x420   : > { %v2547_v46 = vadd.f32 %v2509_v60, %v2195_v4  ;;  %v2799_v39 = vpop.f32.mrf.mxu1 }
 0x421   : > { %v7963_v61 = vadd.f32 %v2799_v39, %v7895_v62  ;;  %v7998_v40 = vpop.f32.mrf.mxu0 }
 0x422   : > { %v2801_v20 = vpop.f32.mrf.mxu1 }
 0x423   : > { %v7966_v58 = vadd.f32 %v2801_v20, %v7898_v10 }
 0x424   : > { %v2805_v57 = vpop.f32.mrf.mxu1 }
 0x425   : > { %v7969_v37 = vadd.f32 %v2805_v57, %v7901_v42 }
 0x426   : > { %v2807_v16 = vpop.f32.mrf.mxu1 }
 0x427   : > { %8644 = vst [vmem:[#allocation33_spill] sm:$0xff] %v7969_v37  ;;  %v7972_v23 = vadd.f32 %v2807_v16, %v7904_v50  ;;  %v2548_v37 = vadd.f32 %v7998_v40, %v7931_v18 }
 0x428   : > { %v2811_v17 = vpop.f32.mrf.mxu1 }
 0x429   : > { %8645 = vst [vmem:[#allocation78_spill] sm:$0xff] %v7972_v23  ;;  %v7975_v11 = vadd.f32 %v2811_v17, %v7907_v1 }
 0x42a   : > { %v2813_v4 = vpop.f32.mrf.mxu1 }
 0x42b   : > { %8646 = vst [vmem:[#allocation77_spill] sm:$0xff] %v7975_v11  ;;  %v7978_v62 = vadd.f32 %v2813_v4, %v7910_v32 }
 0x42c   : > { %v2817_v45 = vpop.f32.mrf.mxu1 }
 0x42d   : > { %8647 = vst [vmem:[#allocation30_spill] sm:$0xff] %v7978_v62  ;;  %v7981_v10 = vadd.f32 %v2817_v45, %v7913_v21 }
 0x42e   : > { %v2819_v59 = vpop.f32.mrf.mxu1 }
 0x42f   : > { %8648 = vst [vmem:[#allocation28_spill] sm:$0xff] %v7981_v10  ;;  %v7984_v42 = vadd.f32 %v2819_v59, %v7916_v0 }
 0x430   : > { %v2823_v12 = vpop.f32.mrf.mxu1 }
 0x431   : > { %8649 = vst [vmem:[#allocation72_spill] sm:$0xff] %v7984_v42  ;;  %v7987_v50 = vadd.f32 %v2823_v12, %v7919_v2 }
 0x432   : > { %v2825_v15 = vpop.f32.mrf.mxu1 }
 0x433   : > { %v7990_v1 = vadd.f32 %v2825_v15, %v7922_v9  ;;  %v8005_v9 = vpop.f32.mrf.mxu0 }
 0x434   : > { %v2829_v25 = vpop.f32.mrf.mxu1  ;;  %v2549_v23 = vadd.f32 %v8005_v9, %v7936_v19 }
 0x435   : > { %v7993_v32 = vadd.f32 %v2829_v25, %v7925_v55 }
 0x436   : > { %v2831_v5 = vpop.f32.mrf.mxu1 }
 0x437   : > { %v7996_v21 = vadd.f32 %v2831_v5, %v7928_v22 }
 0x438   : > { %v2835_v56 = vpop.f32.mrf.mxu1 }
 0x439   : > { %v8001_v0 = vadd.f32 %v2835_v56, %v7933_v26 }
 0x43a   : > { %v2837_v2 = vpop.f32.mrf.mxu1 }
 0x43b   : > { %v8003_v38 = vadd.f32 %v2837_v2, %v2539_v7 }
 0x43c   : > { %v2841_v43 = vpop.f32.mrf.mxu1 }
 0x43d   : > { %v8007_v48 = vadd.f32 %v2841_v43, %v2540_v13 }
 0x43e   : > { %v2843_v55 = vpop.f32.mrf.mxu1 }
 0x43f   : > { %v8009_v14 = vadd.f32 %v2843_v55, %v2541_v49  ;;  %v3127_v30 = vpop.f32.mrf.mxu0 }
 0x440   : > { %v2847_v22 = vpop.f32.mrf.mxu1  ;;  %v3222_v31 = vadd.f32 %v3127_v30, %v7939_v47 }
 0x441   : > { %v8012_v27 = vadd.f32 %v2847_v22, %v2542_v44  ;;  %v3129_v35 = vpop.f32.mrf.mxu0 }
 0x442   : > { %v2849_v26 = vpop.f32.mrf.mxu1  ;;  %v3223_v63 = vadd.f32 %v3129_v35, %v7942_v28 }
 0x443   : > { %v8015_v7 = vadd.f32 %v2849_v26, %v2543_v52  ;;  %v3133_v3 = vpop.f32.mrf.mxu0 }
 0x444   : > { %v2853_v51 = vpop.f32.mrf.mxu1  ;;  %v3224_v13 = vadd.f32 %v3133_v3, %v7945_v6 }
 0x445   : > { %v8018_v60 = vadd.f32 %v2853_v51, %v2544_v33  ;;  %v3135_v49 = vpop.f32.mrf.mxu0 }
 0x446   : > { %v2855_v39 = vpop.f32.mrf.mxu1  ;;  %v3225_v20 = vadd.f32 %v3135_v49, %v7948_v36 }
 0x447   : > { %v8021_v57 = vadd.f32 %v2855_v39, %v2545_v53  ;;  %v3139_v47 = vpop.f32.mrf.mxu0 }
 0x448   : > { %v2859_v44 = vpop.f32.mrf.mxu1  ;;  %v3226_v16 = vadd.f32 %v3139_v47, %v7951_v29 }
 0x449   : > { %v8024_v17 = vadd.f32 %v2859_v44, %v2546_v34  ;;  %v3141_v28 = vpop.f32.mrf.mxu0 }
 0x44a   : > { %v2861_v52 = vpop.f32.mrf.mxu1  ;;  %v3227_v4 = vadd.f32 %v3141_v28, %v7954_v54 }
 0x44b   : > { %v8027_v45 = vadd.f32 %v2861_v52, %v2547_v46  ;;  %v3145_v6 = vpop.f32.mrf.mxu0 }
 0x44c   : > { %v8029_v33 = vpop.f32.mrf.mxu1  ;;  %v3228_v59 = vadd.f32 %v3145_v6, %v7957_v24 }
 0x44d   : > { %v3147_v36 = vpop.f32.mrf.mxu0 }
 0x44e   : > { %v8032_v53 = vpop.f32.mrf.mxu1  ;;  %v3229_v12 = vadd.f32 %v3147_v36, %v7960_v41 }
 0x44f   : > { %v3151_v15 = vpop.f32.mrf.mxu0 }
 0x450   : > { %v3479_v29 = vpop.f32.mrf.mxu1  ;;  %v3230_v34 = vadd.f32 %v3151_v15, %v7963_v61 }
 0x451   : > { %v8036_v25 = vadd.f32 %v3479_v29, %v3222_v31  ;;  %v3153_v5 = vpop.f32.mrf.mxu0 }
 0x452   : > { %v3481_v54 = vpop.f32.mrf.mxu1  ;;  %v3231_v46 = vadd.f32 %v3153_v5, %v7966_v58 }
 0x453   : > { %8650 = vst [vmem:[#allocation71_spill] sm:$0xff] %v8036_v25  ;;  %v8039_v56 = vadd.f32 %v3481_v54, %v3223_v63  ;;  %v8041_v2 = vpop.f32.mrf.mxu0 }
 0x454   : > { %8652 = vst [vmem:[#allocation23_spill] sm:$0xff] %v8041_v2  ;;  %v3485_v24 = vpop.f32.mrf.mxu1 }
 0x455   : > { %8651 = vst [vmem:[#allocation24_spill] sm:$0xff] %v8039_v56  ;;  %v8043_v43 = vadd.f32 %v3485_v24, %v3224_v13  ;;  %v8045_v55 = vpop.f32.mrf.mxu0 }
 0x456   : > { %8654 = vst [vmem:[#allocation65_spill] sm:$0xff] %v8045_v55  ;;  %v3487_v41 = vpop.f32.mrf.mxu1 }
 0x457   : > { %8653 = vst [vmem:[#allocation66_spill] sm:$0xff] %v8043_v43  ;;  %v8047_v30 = vadd.f32 %v3487_v41, %v3225_v20  ;;  %v8049_v22 = vpop.f32.mrf.mxu0 }
 0x458   : > { %8656 = vst [vmem:[#allocation18_spill] sm:$0xff] %v8049_v22  ;;  %v3491_v61 = vpop.f32.mrf.mxu1 }
 0x459   : > { %8655 = vst [vmem:[#allocation59_spill] sm:$0xff] %v8047_v30  ;;  %v8051_v31 = vadd.f32 %v3491_v61, %v3226_v16  ;;  %v8053_v35 = vpop.f32.mrf.mxu0 }
 0x45a   : > { %8658 = vst [vmem:[#allocation58_spill] sm:$0xff] %v8053_v35  ;;  %v3493_v58 = vpop.f32.mrf.mxu1 }
 0x45b   : > { %8657 = vst [vmem:[#allocation17_spill] sm:$0xff] %v8051_v31  ;;  %v8055_v26 = vadd.f32 %v3493_v58, %v3227_v4  ;;  %v8057_v63 = vpop.f32.mrf.mxu0 }
 0x45c   : > { %8660 = vst [vmem:[#allocation61_spill] sm:$0xff] %v8057_v63  ;;  %v3497_v3 = vpop.f32.mrf.mxu1 }
 0x45d   : > { %8659 = vst [vmem:[#allocation57_spill] sm:$0xff] %v8055_v26  ;;  %v8059_v51 = vadd.f32 %v3497_v3, %v3228_v59  ;;  %v8061_v13 = vpop.f32.mrf.mxu0 }
 0x45e   : > { %8662 = vst [vmem:[#allocation11_spill] sm:$0xff] %v8061_v13  ;;  %v3499_v49 = vpop.f32.mrf.mxu1 }
 0x45f   : > { %8661 = vst [vmem:[#allocation12_spill] sm:$0xff] %v8059_v51  ;;  %v8063_v39 = vadd.f32 %v3499_v49, %v3229_v12  ;;  %v8065_v20 = vpop.f32.mrf.mxu0  ;;  %v3700_v51 = vpop.permute.xlu0 %3699 }
 0x460   : > { %v3503_v47 = vpop.f32.mrf.mxu1 }
 0x461   : > { %8663 = vst [vmem:[#allocation50_spill] sm:$0xff] %v8063_v39  ;;  %v8067_v44 = vadd.f32 %v3503_v47, %v3230_v34  ;;  %v8069_v16 = vpop.f32.mrf.mxu0 }
 0x462   : > { %v3505_v28 = vpop.f32.mrf.mxu1 }
 0x463   : > { %8664 = vst [vmem:[#allocation49_spill] sm:$0xff] %v8067_v44  ;;  %v8071_v52 = vadd.f32 %v3505_v28, %v3231_v46  ;;  %v8073_v4 = vpop.f32.mrf.mxu0  ;;  %v3690_v2 = vpop.permute.xlu0 %3689 }
 0x464   : > { %v8075_v6 = vpop.f32.mrf.mxu1 }
 0x465   : > { %8665 = vst [vmem:[#allocation51_spill] sm:$0xff] %v8071_v52  ;;  %8666 = vst [vmem:[#allocation42_spill] sm:$0xff] %v8075_v6  ;;  %v8077_v59 = vpop.f32.mrf.mxu0  ;;  %v3695_v52 = vpop.permute.xlu1 %3694 }
 0x466   : > { %v8079_v36 = vpop.f32.mrf.mxu1 }
 0x467   : > { %8667 = vst [vmem:[#allocation41_spill] sm:$0xff] %v8079_v36  ;;  %v8081_v12 = vpop.f32.mrf.mxu0  ;;  %v3680_v10 = vpop.permute.xlu0 %3679 }
 0x468   : > { %v8083_v15 = vpop.f32.mrf.mxu1 }
 0x469   : > { %8668 = vst [vmem:[#allocation53_spill] sm:$0xff] %v8083_v15  ;;  %v8085_v29 = vpop.f32.mrf.mxu0  ;;  %v3685_v55 = vpop.permute.xlu1 %3684 }
 0x46a   : > { %v8087_v34 = vpop.f32.mrf.mxu1 }
 0x46b   : > { %8669 = vst [vmem:[#allocation38_spill] sm:$0xff] %v8087_v34  ;;  %v3193_v5 = vpop.f32.mrf.mxu0 }
 0x46c   : > { %v8089_v54 = vpop.f32.mrf.mxu1 }
 0x46d   : > { %8670 = vst [vmem:[#allocation36_spill] sm:$0xff] %v8089_v54  ;;  %v3195_v46 = vpop.f32.mrf.mxu0  ;;  %v2900_v54 = vadd.f32 %v8029_v33, %v2548_v37  ;;  %v3675_v9 = vpop.permute.xlu1 %3674 }
 0x46e   : > { %v8091_v24 = vpop.f32.mrf.mxu1 }
 0x46f   : > { %8671 = vst [vmem:[#allocation97_spill] sm:$0xff] %v8091_v24  ;;  %v3199_v41 = vpop.f32.mrf.mxu0  ;;  %v2901_v24 = vadd.f32 %v8032_v53, %v2549_v23 }
 0x470   : > { %v8093_v61 = vpop.f32.mrf.mxu1 }
 0x471   : > { %8672 = vst [vmem:[#allocation96_spill] sm:$0xff] %v8093_v61  ;;  %v3201_v3 = vpop.f32.mrf.mxu0 }
 0x472   : > { %v8095_v58 = vpop.f32.mrf.mxu1  ;;  %v3247_v23 = vadd.f32 %v3201_v3, %v8015_v7  ;;  %v3243_v7 = vadd.f32 %v8085_v29, %v8003_v38  ;;  %v3240_v38 = vadd.f32 %v8073_v4, %v7993_v32 }
 0x473   : > { %8673 = vst [vmem:[#allocation32_spill] sm:$0xff] %v8095_v58  ;;  %v3205_v28 = vpop.f32.mrf.mxu0 }
 0x474   : > { %v8097_v49 = vpop.f32.mrf.mxu1  ;;  %v3248_v37 = vadd.f32 %v3205_v28, %v8018_v60 }
 0x475   : > { %v3207_v56 = vpop.f32.mrf.mxu0 }
 0x476   : > { %v8099_v47 = vpop.f32.mrf.mxu1  ;;  %v3249_v13 = vadd.f32 %v3207_v56, %v8021_v57  ;;  %v3244_v57 = vadd.f32 %v3193_v5, %v8007_v48  ;;  %v3241_v48 = vadd.f32 %v8077_v59, %v7996_v21 }
 0x477   : > { %v3211_v31 = vpop.f32.mrf.mxu0 }
 0x478   : > { %v8101_v8 = vpop.f32.mrf.mxu1  ;;  %v3250_v58 = vadd.f32 %v3211_v31, %v8024_v17  ;;  %v3245_v17 = vadd.f32 %v3195_v46, %v8009_v14  ;;  %v8682_v46 = vld [vmem:[#allocation97_spill] sm:$0xff] }
 0x479   : > { %v3213_v39 = vpop.f32.mrf.mxu0 }
 0x47a   : > { %v8103_v25 = vpop.f32.mrf.mxu1  ;;  %v3251_v61 = vadd.f32 %v3213_v39, %v8027_v45  ;;  %v3246_v45 = vadd.f32 %v3199_v41, %v8012_v27 }
 0x47b   : > { %v3217_v36 = vpop.f32.mrf.mxu0 }
 0x47c   : > { %v3545_v43 = vpop.f32.mrf.mxu1  ;;  %v3252_v35 = vadd.f32 %v3217_v36, %v2900_v54 }
 0x47d   : > { %v3219_v22 = vpop.f32.mrf.mxu0  ;;  %v3596_v14 = vadd.f32 %v3545_v43, %v3244_v57 }
 0x47e   : > { %v3547_v30 = vpop.f32.mrf.mxu1  ;;  %v3253_v63 = vadd.f32 %v3219_v22, %v2901_v24 }
 0x47f   : > { %v3724_v32 = vadd.f32 %v3680_v10, %v3596_v14 }
 0x480   : > { %v3551_v26 = vpop.f32.mrf.mxu1 }
 0x481   : > { %v3598_v56 = vadd.f32 %v3551_v26, %v3246_v45  ;;  %v3595_v26 = vadd.f32 %v8103_v25, %v3243_v7  ;;  %v3238_v25 = vadd.f32 %v8065_v20, %v7987_v50  ;;  %v8681_v20 = vld [vmem:[#allocation58_spill] sm:$0xff] }
 0x482   : > { %v3553_v44 = vpop.f32.mrf.mxu1 }
 0x484   : > { %v3557_v6 = vpop.f32.mrf.mxu1 }
 0x485   : > { %v3600_v22 = vadd.f32 %v3557_v6, %v3248_v37  ;;  %v8676_v6 = vld [vmem:[#allocation32_spill] sm:$0xff] }
 0x486   : > { %v3559_v15 = vpop.f32.mrf.mxu1 }
 0x487   : > { %v3601_v53 = vadd.f32 %v3559_v15, %v3249_v13  ;;  %v8678_v15 = vld [vmem:[#allocation61_spill] sm:$0xff] }
 0x488   : > { %v3563_v34 = vpop.f32.mrf.mxu1 }
 0x489   : > { %v3602_v33 = vadd.f32 %v3563_v34, %v3250_v58  ;;  %v3729_v27 = vadd.f32 %v3690_v2, %v3601_v53  ;;  %v8679_v34 = vld [vmem:[#allocation96_spill] sm:$0xff]  ;;  %v8684_v58 = vld [vmem:[#allocation18_spill] sm:$0xff]  ;;  %v8689_v53 = vld [vmem:[#allocation33_spill] sm:$0xff] }
 0x48a   : > { %v3565_v11 = vpop.f32.mrf.mxu1  ;;  %v3590_v5 = vadd.f32 %v8679_v34, %v3238_v25  ;;  %v3740_v34 = vld [vmem:[%s8255_s6 + $0x30] sm:$0xff] }
 0x48b   : > { %v3603_v42 = vadd.f32 %v3565_v11, %v3251_v61  ;;  %v3670_v11 = vpop.permute.xlu0 %3669  ;;  %v3730_v60 = vadd.f32 %v3695_v52, %v3602_v33  ;;  %v8683_v61 = vld [vmem:[#allocation77_spill] sm:$0xff] }
 0x48c   : > { %v3569_v62 = vpop.f32.mrf.mxu1  ;;  %v3234_v3 = vadd.f32 %v8684_v58, %v8683_v61 }
 0x48d   : > { %v3604_v18 = vadd.f32 %v3569_v62, %v3252_v35  ;;  %v3599_v62 = vadd.f32 %v3553_v44, %v3247_v23  ;;  %v3731_v31 = vadd.f32 %v3695_v52, %v3603_v42  ;;  %v3597_v35 = vadd.f32 %v3547_v30, %v3245_v17 }
 0x48e   : > { %v3571_v40 = vpop.f32.mrf.mxu1  ;;  %v3242_v42 = vadd.f32 %v8081_v12, %v8001_v0  ;;  %v3726_v44 = vadd.f32 %v3685_v55, %v3598_v56  ;;  %v3239_v0 = vadd.f32 %v8069_v16, %v7990_v1  ;;  %v3592_v52 = vadd.f32 %v8097_v49, %v3240_v38  ;;  %v8677_v12 = vld [vmem:[#allocation28_spill] sm:$0xff]  ;;  %v8693_v56 = vld [vmem:[#allocation42_spill] sm:$0xff] }
 0x48f   : > { %v3605_v19 = vadd.f32 %v3571_v40, %v3253_v63  ;;  %v3732_v39 = vadd.f32 %v3700_v51, %v3604_v18  ;;  %v3665_v63 = vpop.permute.xlu1 %3664  ;;  %v3727_v13 = vadd.f32 %v3685_v55, %v3599_v62  ;;  %v3725_v43 = vadd.f32 %v3680_v10, %v3597_v35  ;;  %v3660_v21 = vpop.permute.xlu0 %3659  ;;  %v8675_v55 = vld [vmem:[#allocation11_spill] sm:$0xff]  ;;  %v8680_v10 = vld [vmem:[#allocation30_spill] sm:$0xff]  ;;  %v8685_v49 = vld [vmem:[#allocation36_spill] sm:$0xff] }
 0x490   : > { %v3594_v30 = vadd.f32 %v8101_v8, %v3242_v42  ;;  %v8674_v8 = vld [vmem:[#allocation72_spill] sm:$0xff]  ;;  %v3591_v59 = vadd.f32 %v8676_v6, %v3239_v0  ;;  %v3723_v1 = vadd.f32 %v3675_v9, %v3595_v26  ;;  %v3236_v29 = vadd.f32 %v8678_v15, %v8677_v12  ;;  %v8686_v18 = vld [vmem:[#allocation78_spill] sm:$0xff]  ;;  %v8687_v40 = vld [vmem:[#allocation65_spill] sm:$0xff] }
 0x491   : > { %v3733_v36 = vadd.f32 %v3700_v51, %v3605_v19  ;;  %v3728_v51 = vadd.f32 %v3690_v2, %v3600_v22  ;;  %v3593_v2 = vadd.f32 %v8099_v47, %v3241_v48  ;;  %v3237_v4 = vadd.f32 %v8675_v55, %v8674_v8  ;;  %v8691_v22 = vld [vmem:[#allocation53_spill] sm:$0xff]  ;;  %v8697_v0 = vld [vmem:[#allocation12_spill] sm:$0xff]  ;;  %v8700_v8 = vld [vmem:[#allocation59_spill] sm:$0xff] }
 0x492   : > { %v3722_v50 = vadd.f32 %v3675_v9, %v3594_v30  ;;  %v3235_v54 = vadd.f32 %v8681_v20, %v8680_v10  ;;  %v3588_v47 = vadd.f32 %v8685_v49, %v3236_v29  ;;  %v3720_v28 = vadd.f32 %v3670_v11, %v3592_v52  ;;  %v8688_v9 = vld [vmem:[#allocation38_spill] sm:$0xff]  ;;  %v8692_v62 = vld [vmem:[#allocation41_spill] sm:$0xff]  ;;  %v8703_v12 = vld [vmem:[#allocation71_spill] sm:$0xff] }
 0x493   : > { %3790 = vmatprep.subr.mxu0 %v3733_v36  ;;  %4170 = vmatprep.subr.mxu1 %v3733_v36  ;;  %v3655_v16 = vpop.permute.xlu1 %3654  ;;  %v3589_v24 = vadd.f32 %v8682_v46, %v3237_v4  ;;  %v3721_v41 = vadd.f32 %v3670_v11, %v3593_v2  ;;  %v3233_v19 = vadd.f32 %v8687_v40, %v8686_v18  ;;  %v3650_v23 = vpop.permute.xlu0 %3649  ;;  %v8690_v36 = vld [vmem:[#allocation23_spill] sm:$0xff]  ;;  %v8696_v30 = vld [vmem:[#allocation50_spill] sm:$0xff]  ;;  %v8699_v52 = vld [vmem:[#allocation17_spill] sm:$0xff] }
 0x494   : > { %3791 = vmatpush1.msra.mxu0 %v3732_v39  ;;  %4186 = vmatpush1.msra.mxu1 %v3732_v39  ;;  %v3587_v37 = vadd.f32 %v8688_v9, %v3235_v54  ;;  %v3719_v33 = vadd.f32 %v3665_v63, %v3591_v59  ;;  %v3232_v45 = vadd.f32 %v8690_v36, %v8689_v53  ;;  %v8701_v6 = vld [vmem:[#allocation66_spill] sm:$0xff]  ;;  %v3741_v10 = vld [vmem:[%s8255_s6 + $0x38] sm:$0xff]  ;;  %v3736_v20 = vld [vmem:[%s8255_s6 + $0x10] sm:$0xff] }
 0x495   : > { %3792 = vmatprep.subr.mxu0 %v3731_v31  ;;  %4171 = vmatprep.subr.mxu1 %v3731_v31  ;;  %v3586_v39 = vadd.f32 %v8691_v22, %v3234_v3  ;;  %v3718_v17 = vadd.f32 %v3665_v63, %v3590_v5  ;;  %v3585_v31 = vadd.f32 %v8692_v62, %v3233_v19  ;;  %v3734_v29 = vld [vmem:[%s8255_s6] sm:$0xff]  ;;  %v8704_v5 = vmov 0.0   ;;  %v3737_v54 = vld [vmem:[%s8255_s6 + $0x18] sm:$0xff] }
 0x496   : > { %3793 = vmatpush1.msra.mxu0 %v3730_v60  ;;  %4187 = vmatpush1.msra.mxu1 %v3730_v60  ;;  %v3717_v11 = vadd.f32 %v3660_v21, %v3589_v24  ;;  %v3584_v60 = vadd.f32 %v8693_v56, %v3232_v45  ;;  %v3716_v7 = vadd.f32 %v3660_v21, %v3588_v47  ;;  %v3738_v46 = vld [vmem:[%s8255_s6 + $0x20] sm:$0xff]  ;;  %v3739_v24 = vld [vmem:[%s8255_s6 + $0x28] sm:$0xff] }
 0x497   : > { %3794 = vmatprep.subr.mxu0 %v3729_v27  ;;  %4172 = vmatprep.subr.mxu1 %v3729_v27  ;;  %v3645_v57 = vpop.permute.xlu1 %3644  ;;  %v3715_v35 = vadd.f32 %v3655_v16, %v3587_v37  ;;  %v3714_v27 = vadd.f32 %v3655_v16, %v3586_v39  ;;  %v3713_v63 = vadd.f32 %v3650_v23, %v3585_v31  ;;  %v3640_v42 = vpop.permute.xlu0 %3639  ;;  %v4223_v36 = vld [vmem:[%s4328_s16 + $0x60] sm:$0xff]  ;;  %v4224_v56 = vld [vmem:[%s4328_s16 + $0x8] sm:$0xff] }
 0x498   : > { %3795 = vmatpush1.msra.mxu0 %v3728_v51  ;;  %4188 = vmatpush1.msra.mxu1 %v3728_v51  ;;  %v3712_v14 = vadd.f32 %v3650_v23, %v3584_v60  ;;  %v8694_v51 = vld [vmem:[#allocation51_spill] sm:$0xff]  ;;  %v3708_v2 = vadd.f32 %v3640_v42, %v8697_v0  ;;  %v4222_v23 = vld [vmem:[%s4328_s16] sm:$0xff] }
 0x499   : > { %3796 = vmatprep.subr.mxu0 %v3727_v13  ;;  %4173 = vmatprep.subr.mxu1 %v3727_v13  ;;  %v3711_v48 = vadd.f32 %v3645_v57, %v8694_v51  ;;  %v8695_v13 = vld [vmem:[#allocation49_spill] sm:$0xff] }
 0x49a   : > { %3797 = vmatpush1.msra.mxu0 %v3726_v44  ;;  %4189 = vmatpush1.msra.mxu1 %v3726_v44  ;;  %v3710_v38 = vadd.f32 %v3645_v57, %v8695_v13  ;;  %v3709_v44 = vadd.f32 %v3640_v42, %v8696_v30 }
 0x49b   : > { %3798 = vmatprep.subr.mxu0 %v3725_v43  ;;  %4174 = vmatprep.subr.mxu1 %v3725_v43  ;;  %v3635_v26 = vpop.permute.xlu1 %3634  ;;  %v8698_v43 = vld [vmem:[#allocation57_spill] sm:$0xff]  ;;  %v3630_v25 = vpop.permute.xlu0 %3629 }
 0x49c   : > { %3799 = vmatpush1.msra.mxu0 %v3724_v32  ;;  %4190 = vmatpush1.msra.mxu1 %v3724_v32  ;;  %v3707_v21 = vadd.f32 %v3635_v26, %v8698_v43  ;;  %v3706_v32 = vadd.f32 %v3635_v26, %v8699_v52  ;;  %v3705_v55 = vadd.f32 %v3630_v25, %v8700_v8  ;;  %v4228_v43 = vld [vmem:[%s4328_s16 + $0x18] sm:$0xff] }
 0x49d   : > { %3800 = vmatprep.subr.mxu0 %v3723_v1  ;;  %4175 = vmatprep.subr.mxu1 %v3723_v1  ;;  %v3704_v59 = vadd.f32 %v3630_v25, %v8701_v6  ;;  %v8702_v1 = vld [vmem:[#allocation24_spill] sm:$0xff]  ;;  %v4229_v25 = vld [vmem:[%s4328_s16 + $0x78] sm:$0xff] }
 0x49e   : > { %3801 = vmatpush1.msra.mxu0 %v3722_v50  ;;  %4191 = vmatpush1.msra.mxu1 %v3722_v50  ;;  %v3735_v50 = vld [vmem:[%s8255_s6 + $0x8] sm:$0xff] }
 0x49f   : > { %3802 = vmatprep.subr.mxu0 %v3721_v41  ;;  %4176 = vmatprep.subr.mxu1 %v3721_v41  ;;  %v3625_v4 = vpop.permute.xlu1 %3624  ;;  %v3753_v41 = vpop.permute.xlu0 %3752 }
 0x4a0   : > { %3803 = vmatpush1.msra.mxu0 %v3720_v28  ;;  %4192 = vmatpush1.msra.mxu1 %v3720_v28  ;;  %v3703_v16 = vadd.f32 %v3625_v4, %v8702_v1  ;;  %v3702_v15 = vadd.f32 %v3625_v4, %v8703_v12  ;;  %v4230_v1 = vld [vmem:[%s4328_s16 + $0x20] sm:$0xff] }
 0x4a1   : > { %3804 = vmatprep.subr.mxu0 %v3719_v33  ;;  %4177 = vmatprep.subr.mxu1 %v3719_v33 }
 0x4a2   : > { %3805 = vmatpush1.msra.mxu0 %v3718_v17  ;;  %4193 = vmatpush1.msra.mxu1 %v3718_v17 }
 0x4a3   : > { %3806 = vmatprep.subr.mxu0 %v3717_v11  ;;  %4178 = vmatprep.subr.mxu1 %v3717_v11  ;;  %v3758_v61 = vpop.permute.xlu1 %3757  ;;  %v3763_v58 = vpop.permute.xlu0 %3762 }
 0x4a4   : > { %3807 = vmatpush1.msra.mxu0 %v3716_v7  ;;  %4194 = vmatpush1.msra.mxu1 %v3716_v7  ;;  %v4225_v7 = vld [vmem:[%s4328_s16 + $0x68] sm:$0xff] }
 0x4a5   : > { %3808 = vmatprep.subr.mxu0 %v3715_v35  ;;  %4179 = vmatprep.subr.mxu1 %v3715_v35 }
 0x4a6   : > { %3809 = vmatpush1.msra.mxu0 %v3714_v27  ;;  %4195 = vmatpush1.msra.mxu1 %v3714_v27 }
 0x4a7   : > { %3810 = vmatprep.subr.mxu0 %v3713_v63  ;;  %4180 = vmatprep.subr.mxu1 %v3713_v63  ;;  %v8195_v3 = vpop.permute.xlu1 %3767  ;;  %v8197_v49 = vpop.permute.xlu0 %3772 }
 0x4a8   : > { %3811 = vmatpush1.msra.mxu0 %v3712_v14  ;;  %4196 = vmatpush1.msra.mxu1 %v3712_v14 }
 0x4a9   : > { %3812 = vmatprep.subr.mxu0 %v3711_v48  ;;  %4181 = vmatprep.subr.mxu1 %v3711_v48 }
 0x4aa   : > { %3813 = vmatpush1.msra.mxu0 %v3710_v38  ;;  %4197 = vmatpush1.msra.mxu1 %v3710_v38  ;;  %v4226_v38 = vld [vmem:[%s4328_s16 + $0x10] sm:$0xff] }
 0x4ab   : > { %3814 = vmatprep.subr.mxu0 %v3709_v44  ;;  %4182 = vmatprep.subr.mxu1 %v3709_v44  ;;  %v8199_v47 = vpop.permute.xlu1 %3777  ;;  %v3783_v28 = vpop.permute.xlu0 %3782  ;;  %v4227_v44 = vld [vmem:[%s4328_s16 + $0x70] sm:$0xff] }
 0x4ac   : > { %3815 = vmatpush1.msra.mxu0 %v3708_v2  ;;  %4198 = vmatpush1.msra.mxu1 %v3708_v2 }
 0x4ad   : > { %3816 = vmatprep.subr.mxu0 %v3707_v21  ;;  %4183 = vmatprep.subr.mxu1 %v3707_v21 }
 0x4ae   : > { %3817 = vmatpush1.msra.mxu0 %v3706_v32  ;;  %4199 = vmatpush1.msra.mxu1 %v3706_v32 }
 0x4af   : > { %3818 = vmatprep.subr.mxu0 %v3705_v55  ;;  %4184 = vmatprep.subr.mxu1 %v3705_v55  ;;  %v3788_v31 = vpop.permute.xlu1 %3787 }
 0x4b0   : > { %3819 = vmatpush1.msra.mxu0 %v3704_v59  ;;  %4200 = vmatpush1.msra.mxu1 %v3704_v59 }
 0x4b1   : > { %3820 = vmatprep.subr.mxu0 %v3703_v16  ;;  %4185 = vmatprep.subr.mxu1 %v3703_v16 }
 0x4b2   : > { %3821 = vmatpush1.msra.mxu0 %v3702_v15  ;;  %4201 = vmatpush1.msra.mxu1 %v3702_v15 }
 0x4b3   : > { %3855 = vmatmul.mubr.f32.vlgmr.msra.gmra.mxu0 %v3734_v29  ;;  %3891 = vmatmul.mubr.f32.vlgmr.msra.gmra.mxu1 %v3740_v34  ;;  %v4231_v34 = vld [vmem:[%s4328_s16 + $0x28] sm:$0xff] }
 0x4b4   : > { %3860 = vmatprep.mubr.f32.mxu0 %v8704_v5  ;;  %3896 = vmatprep.mubr.f32.mxu1 %v8704_v5 }
 0x4b7   : > { %3861 = vmatmul.mubr.f32.gmra.mxu0 %v3735_v50  ;;  %3897 = vmatmul.mubr.f32.gmra.mxu1 %v3741_v10 }
 0x4b8   : > { %3866 = vmatprep.mubr.f32.mxu0 %v8704_v5 }
 0x4bb   : > { %3867 = vmatmul.mubr.f32.gmra.mxu0 %v3736_v20 }
 0x4bc   : > { %3872 = vmatprep.mubr.f32.mxu0 %v8704_v5 }
 0x4bf   : > { %3873 = vmatmul.mubr.f32.gmra.mxu0 %v3737_v54  ;;  %v4232_v54 = vld [vmem:[%s4328_s16 + $0x30] sm:$0xff] }
 0x4c0   : > { %3878 = vmatprep.mubr.f32.mxu0 %v8704_v5 }
 0x4c3   : > { %3879 = vmatmul.mubr.f32.gmra.mxu0 %v3738_v46 }
 0x4c4   : > { %3884 = vmatprep.mubr.f32.mxu0 %v8704_v5 }
 0x4c7   : > { %3885 = vmatmul.mubr.f32.gmra.mxu0 %v3739_v24 }
 0x573   : > { %v3856_v18 = vpop.f32.mrf.mxu0  ;;  %v3892_v40 = vpop.f32.mrf.mxu1 }
 0x574   : > { %v3857_v19 = vadd.f32 %v3856_v18, %v3753_v41  ;;  %v3893_v9 = vadd.f32 %v3892_v40, %v3783_v28 }
 0x575   : > { %v3858_v37 = vpop.f32.mrf.mxu0  ;;  %v3894_v33 = vpop.f32.mrf.mxu1 }
 0x576   : > { %v3903_v53 = vadd.f32 %v4222_v23, %v3857_v19  ;;  %v3915_v45 = vadd.f32 %v4223_v36, %v3893_v9  ;;  %v3859_v22 = vadd.f32 %v3858_v37, %v3753_v41  ;;  %v3895_v39 = vadd.f32 %v3894_v33, %v3783_v28  ;;  %v4234_v9 = vld [vmem:[%s4328_s16 + $0x40] sm:$0xff] }
 0x577   : > { %v3862_v17 = vpop.f32.mrf.mxu0  ;;  %v3898_v62 = vpop.f32.mrf.mxu1 }
 0x578   : > { %v3919_v11 = vmax.f32 %v3903_v53, 0.0  ;;  %v3931_v57 = vmax.f32 %v3915_v45, 0.0  ;;  %v3904_v60 = vadd.f32 %v4224_v56, %v3859_v22  ;;  %v3916_v35 = vadd.f32 %v4225_v7, %v3895_v39  ;;  %v4235_v53 = vld [vmem:[%s4328_s16 + $0x48] sm:$0xff] }
 0x579   : > { %v3863_v27 = vadd.f32 %v3862_v17, %v3758_v61  ;;  %v3899_v63 = vadd.f32 %v3898_v62, %v3788_v31  ;;  %v3864_v42 = vpop.f32.mrf.mxu0  ;;  %v3900_v14 = vpop.f32.mrf.mxu1  ;;  %v4236_v17 = vld [vmem:[%s4328_s16 + $0x50] sm:$0xff] }
 0x57a   : > { %3935 = vst [vmem:[%s8208_s17] sm:$0xff] %v3919_v11  ;;  %3947 = vst [vmem:[%s8208_s17 + $0x60] sm:$0xff] %v3931_v57  ;;  %v3920_v51 = vmax.f32 %v3904_v60, 0.0  ;;  %v3932_v48 = vmax.f32 %v3916_v35, 0.0  ;;  %v3865_v26 = vadd.f32 %v3864_v42, %v3758_v61  ;;  %v3901_v13 = vadd.f32 %v3900_v14, %v3788_v31  ;;  %v4237_v57 = vld [vmem:[%s4328_s16 + $0x58] sm:$0xff] }
 0x57b   : > { %v3905_v30 = vadd.f32 %v4226_v38, %v3863_v27  ;;  %v3917_v0 = vadd.f32 %v4227_v44, %v3899_v63  ;;  %v3868_v2 = vpop.f32.mrf.mxu0 }
 0x57c   : > { %3936 = vst [vmem:[%s8208_s17 + $0x8] sm:$0xff] %v3920_v51  ;;  %3948 = vst [vmem:[%s8208_s17 + $0x68] sm:$0xff] %v3932_v48  ;;  %v3906_v21 = vadd.f32 %v4228_v43, %v3865_v26  ;;  %v3918_v52 = vadd.f32 %v4229_v25, %v3901_v13  ;;  %v3869_v32 = vadd.f32 %v3868_v2, %v3763_v58 }
 0x57d   : > { %v3921_v8 = vmax.f32 %v3905_v30, 0.0  ;;  %v3933_v55 = vmax.f32 %v3917_v0, 0.0  ;;  %v3870_v4 = vpop.f32.mrf.mxu0 }
 0x57e   : > { %v3922_v6 = vmax.f32 %v3906_v21, 0.0  ;;  %v3934_v59 = vmax.f32 %v3918_v52, 0.0  ;;  %v3907_v16 = vadd.f32 %v4230_v1, %v3869_v32  ;;  %v3871_v12 = vadd.f32 %v3870_v4, %v3763_v58  ;;  %v4233_v58 = vld [vmem:[%s4328_s16 + $0x38] sm:$0xff] }
 0x57f   : > { %3937 = vst [vmem:[%s8208_s17 + $0x10] sm:$0xff] %v3921_v8  ;;  %3949 = vst [vmem:[%s8208_s17 + $0x70] sm:$0xff] %v3933_v55  ;;  %v3874_v15 = vpop.f32.mrf.mxu0 }
 0x580   : > { %3938 = vst [vmem:[%s8208_s17 + $0x18] sm:$0xff] %v3922_v6  ;;  %3950 = vst [vmem:[%s8208_s17 + $0x78] sm:$0xff] %v3934_v59  ;;  %v3923_v29 = vmax.f32 %v3907_v16, 0.0  ;;  %v3908_v5 = vadd.f32 %v4231_v34, %v3871_v12  ;;  %v3875_v50 = vadd.f32 %v3874_v15, %v8195_v3 }
 0x581   : > { %v3876_v10 = vpop.f32.mrf.mxu0 }
 0x582   : > { %3939 = vst [vmem:[%s8208_s17 + $0x20] sm:$0xff] %v3923_v29  ;;  %v3924_v20 = vmax.f32 %v3908_v5, 0.0  ;;  %v3909_v46 = vadd.f32 %v4232_v54, %v3875_v50  ;;  %v3877_v24 = vadd.f32 %v3876_v10, %v8195_v3 }
 0x583   : > { %v3880_v41 = vpop.f32.mrf.mxu0 }
 0x584   : > { %3940 = vst [vmem:[%s8208_s17 + $0x28] sm:$0xff] %v3924_v20  ;;  %v3925_v61 = vmax.f32 %v3909_v46, 0.0  ;;  %v3910_v28 = vadd.f32 %v4233_v58, %v3877_v24  ;;  %v3881_v18 = vadd.f32 %v3880_v41, %v8197_v49 }
 0x585   : > { %v3882_v40 = vpop.f32.mrf.mxu0 }
 0x586   : > { %3941 = vst [vmem:[%s8208_s17 + $0x30] sm:$0xff] %v3925_v61  ;;  %v3926_v19 = vmax.f32 %v3910_v28, 0.0  ;;  %v3911_v37 = vadd.f32 %v4234_v9, %v3881_v18  ;;  %v3883_v33 = vadd.f32 %v3882_v40, %v8197_v49 }
 0x587   : > { %v3886_v3 = vpop.f32.mrf.mxu0 }
 0x588   : > { %3942 = vst [vmem:[%s8208_s17 + $0x38] sm:$0xff] %v3926_v19  ;;  %v3927_v23 = vmax.f32 %v3911_v37, 0.0  ;;  %v3912_v36 = vadd.f32 %v4235_v53, %v3883_v33  ;;  %v3887_v45 = vadd.f32 %v3886_v3, %v8199_v47 }
 0x589   : > { %v3888_v22 = vpop.f32.mrf.mxu0 }
 0x58a   : > { %3943 = vst [vmem:[%s8208_s17 + $0x40] sm:$0xff] %v3927_v23  ;;  %v3928_v39 = vmax.f32 %v3912_v36, 0.0  ;;  %v3913_v62 = vadd.f32 %v4236_v17, %v3887_v45  ;;  %v3889_v31 = vadd.f32 %v3888_v22, %v8199_v47 }
 0x58c   : > { %3944 = vst [vmem:[%s8208_s17 + $0x48] sm:$0xff] %v3928_v39  ;;  %v3929_v11 = vmax.f32 %v3913_v62, 0.0  ;;  %v3914_v49 = vadd.f32 %v4237_v57, %v3889_v31 }
 0x58e   : > { %3945 = vst [vmem:[%s8208_s17 + $0x50] sm:$0xff] %v3929_v11  ;;  %v3930_v56 = vmax.f32 %v3914_v49, 0.0 }
 0x590   : > { %3946 = vst [vmem:[%s8208_s17 + $0x58] sm:$0xff] %v3930_v56 }
 0x591 PF: > { %s18_s27 = sadd.s32 1, %s4244_s27  }
 0x592   : > { %p15_p4 = scmp.ge.s32.totalorder %s18_s27, 4  }
 0x594   :  { %17 = sbr.rel (!%p15_p4) target bundleno = 1 (0x1), region = 97 }

</bundles_post_ra>
